<compile_context>
chip_gen: v7x
topology: tpu7x:2x2x1
jax: 0.10.0
libtpu: 0.0.40
codegen_flags: <defaults>
</compile_context>

<pallas_src>
import functools
import math

import jax
import jax.numpy as jnp
from jax.experimental import pallas as pl
from jax.experimental.pallas import tpu as pltpu


# ----------------------------------------------------------------------------
# Fused attention kernel: one grid step = (batch b, query tile qt)
# ----------------------------------------------------------------------------
def _attention_kernel(x_ref, wq_ref, wkv_ref, wo_ref, bo_ref, o_ref,
                      kT_scr, v_scr, ctx_scr, *, num_heads, head_dim, tq):
    C = num_heads * head_dim
    qt = pl.program_id(1)

    # K / V for the whole sequence of this batch element are computed once per
    # batch element (first query tile) in a single fused (C, 2C) matmul and
    # kept resident in VMEM scratch across its query tiles.  K is stored
    # transposed so per-head QK^T needs no per-tile relayout.
    @pl.when(qt == 0)
    def _():
        x_all = x_ref[0]                                           # (N, C) bf16
        kv = jnp.dot(x_all, wkv_ref[...],
                     preferred_element_type=jnp.float32)           # (N, 2C) f32
        kT_scr[...] = kv[:, :C].T.astype(jnp.bfloat16)             # (C, N)
        v_scr[...] = kv[:, C:].astype(jnp.bfloat16)                # (N, C)

    # Q projection for this query tile (attention scale folded into Wq).
    qs = pl.multiple_of(qt * tq, tq)
    xq = x_ref[0, pl.ds(qs, tq), :]                                # (TQ, C) bf16
    q = jnp.dot(xq, wq_ref[...],
                preferred_element_type=jnp.float32).astype(jnp.bfloat16)

    # Per-head softmax attention; small static head loop, results written into
    # the (TQ, C) ctx scratch (no lane-axis concatenate).
    # TODO(synk): for num_heads >= 12 switch to lax.fori_loop(..., unroll=True).
    for h in range(num_heads):
        lo = h * head_dim
        qh = q[:, lo:lo + head_dim]                                # (TQ, D) bf16
        s = jnp.dot(qh, kT_scr[lo:lo + head_dim, :],
                    preferred_element_type=jnp.float32)            # (TQ, N) f32
        m = jnp.max(s, axis=-1, keepdims=True)
        p = jnp.exp(s - m)
        denom = jnp.sum(p, axis=-1, keepdims=True)
        inv = pl.reciprocal(denom, approx=True)                    # EUP, (TQ,1)
        o_h = jnp.dot(p.astype(jnp.bfloat16), v_scr[:, lo:lo + head_dim],
                      preferred_element_type=jnp.float32)          # (TQ, D) f32
        ctx_scr[:, lo:lo + head_dim] = o_h * inv

    # Output projection + bias (proj_drop is identity at p=0.0).
    out = jnp.dot(ctx_scr[...].astype(jnp.bfloat16), wo_ref[...],
                  preferred_element_type=jnp.float32) + bo_ref[...]
    o_ref[0] = out.astype(o_ref.dtype)


# ----------------------------------------------------------------------------
# Wrapper: PyTorch-layout weights -> fused pallas_call
# ----------------------------------------------------------------------------
def attention_forward(x, w_qkv, w_proj, b_proj, *, num_heads, tq=None):
    """x: (B, N, C).  w_qkv: (3C, C), w_proj: (C, C), b_proj: (C,) in PyTorch
    nn.Linear layout (out_features, in_features)."""
    B, N, C = x.shape
    assert C % num_heads == 0
    head_dim = C // num_heads
    scale = head_dim ** (-0.5)                   # qk_scale=None default

    if tq is None:
        if N % 256 == 0:
            tq = 256
        elif N % 128 == 0:
            tq = 128
        else:
            tq = N                               # single tile fallback
    assert N % tq == 0 and tq % 8 == 0

    # nn.Linear computes x @ W^T; pre-transpose to (in, out).  Columns of the
    # transposed (C, 3C) weight are [Q | K | V] (matches the reshape
    # (B, N, 3, H, D) ordering in the PyTorch forward).  Fold `scale` into Wq
    # and keep K|V fused as one (C, 2C) matmul weight.  All matmul operands
    # are bf16; accumulation stays f32.
    w_in_out = jnp.transpose(w_qkv).astype(jnp.float32)            # (C, 3C)
    wq = (w_in_out[:, :C] * scale).astype(jnp.bfloat16)            # (C, C)
    wkv = w_in_out[:, C:].astype(jnp.bfloat16)                     # (C, 2C)
    wo = jnp.transpose(w_proj).astype(jnp.bfloat16)                # (C, C)
    bo = b_proj.reshape(1, C).astype(jnp.float32)

    kernel = functools.partial(_attention_kernel, num_heads=num_heads,
                               head_dim=head_dim, tq=tq)

    flops = B * (2 * N * C * (3 * C)             # QKV projections
                 + 4 * N * N * C                 # QK^T and PV over all heads
                 + 2 * N * C * C)                # output projection
    bytes_accessed = (2 * x.size                 # x in (bf16), fetched once/b
                      + 4 * x.size               # output (f32)
                      + 2 * (wq.size + wkv.size + wo.size) + 4 * bo.size)
    cost = pl.CostEstimate(flops=flops,
                           transcendentals=B * num_heads * N * N,
                           bytes_accessed=bytes_accessed)

    return pl.pallas_call(
        kernel,
        out_shape=jax.ShapeDtypeStruct((B, N, C), x.dtype),
        grid=(B, N // tq),
        in_specs=[
            # Full sequence of this batch element; block index is constant
            # across query tiles, so it stays resident (no re-fetch per tile).
            pl.BlockSpec((1, N, C), lambda b, q: (b, 0, 0)),
            pl.BlockSpec((C, C), lambda b, q: (0, 0)),             # Wq*scale
            pl.BlockSpec((C, 2 * C), lambda b, q: (0, 0)),         # [Wk|Wv]
            pl.BlockSpec((C, C), lambda b, q: (0, 0)),             # Wo
            pl.BlockSpec((1, C), lambda b, q: (0, 0)),             # bias
        ],
        out_specs=pl.BlockSpec((1, tq, C), lambda b, q: (b, q, 0)),
        scratch_shapes=[
            pltpu.VMEM((C, N), jnp.bfloat16),                      # K^T
            pltpu.VMEM((N, C), jnp.bfloat16),                      # V
            pltpu.VMEM((tq, C), jnp.float32),                      # ctx
        ],
        compiler_params=pltpu.CompilerParams(
            dimension_semantics=("parallel", "arbitrary"),
            vmem_limit_bytes=64 * 1024 * 1024),
        cost_estimate=cost,
    )(x.astype(jnp.bfloat16), wq, wkv, wo, bo)


# ----------------------------------------------------------------------------
# Pure-JAX reference (mirrors the PyTorch forward exactly, f32)
# ----------------------------------------------------------------------------
def attention_reference(x, w_qkv, w_proj, b_proj, num_heads):
    B, N, C = x.shape
    D = C // num_heads
    scale = D ** (-0.5)
    qkv = x @ w_qkv.T                                              # (B, N, 3C)
    qkv = qkv.reshape(B, N, 3, num_heads, D).transpose(2, 0, 3, 1, 4)
    q, k, v = qkv[0], qkv[1], qkv[2]                               # (B, H, N, D)
    attn = (q @ jnp.swapaxes(k, -2, -1)) * scale
    attn = jax.nn.softmax(attn, axis=-1)
    out = (attn @ v).transpose(0, 2, 1, 3).reshape(B, N, C)
    return out @ w_proj.T + b_proj


# ----------------------------------------------------------------------------
if __name__ == "__main__":
    key = jax.random.PRNGKey(0)
    kx, kqkv, kp, kb = jax.random.split(key, 4)

    B, N, C, H = 2, 128, 128, 8        # dim=128, num_heads=8 -> head_dim=16
    x = jax.random.normal(kx, (B, N, C), jnp.float32)
    w_qkv = jax.random.normal(kqkv, (3 * C, C), jnp.float32) / math.sqrt(C)
    w_proj = jax.random.normal(kp, (C, C), jnp.float32) / math.sqrt(C)
    b_proj = 0.1 * jax.random.normal(kb, (C,), jnp.float32)

    y = attention_forward(x, w_qkv, w_proj, b_proj, num_heads=H)
    y = jax.block_until_ready(y)

    y_ref = attention_reference(x, w_qkv, w_proj, b_proj, H)
    assert y.shape == (B, N, C), y.shape
    assert bool(jnp.all(jnp.isfinite(y)))
    # bf16 MXU operands + approx reciprocal -> tolerance loosened vs f32.
    max_err = float(jnp.max(jnp.abs(y - y_ref)))
    assert max_err < 1e-1, f"max abs error {max_err}"
    print("KERNEL_OK")
</pallas_src>

<mosaic_0001>
module attributes {stable_mosaic.version = 11 : i64} {
  func.func @_attention_kernel(%arg0: i32, %arg1: i32, %arg2: memref<1x128x128xbf16, #tpu.memory_space<vmem>>, %arg3: memref<128x128xbf16, #tpu.memory_space<vmem>>, %arg4: memref<128x256xbf16, #tpu.memory_space<vmem>>, %arg5: memref<128x128xbf16, #tpu.memory_space<vmem>>, %arg6: memref<1x128xf32, #tpu.memory_space<vmem>>, %arg7: memref<1x128x128xf32, #tpu.memory_space<vmem>>, %arg8: memref<128x128xbf16, #tpu.memory_space<vmem>>, %arg9: memref<128x128xbf16, #tpu.memory_space<vmem>>, %arg10: memref<128x128xf32, #tpu.memory_space<vmem>>) attributes {dimension_semantics = [#tpu.dimension_semantics<parallel>, #tpu.dimension_semantics<arbitrary>], iteration_bounds = array<i64: 2, 1>, scalar_prefetch = 0 : i64, scratch_operands = 3 : i64, tpu.core_type = #tpu.core_type<tc>, window_params = [{transform_indices = @transform_0, window_bounds = array<i64: 1, 128, 128>}, {pipeline_mode = #tpu.pipeline_mode<synchronous>, transform_indices = @transform_1, window_bounds = array<i64: 128, 128>}, {pipeline_mode = #tpu.pipeline_mode<synchronous>, transform_indices = @transform_2, window_bounds = array<i64: 128, 256>}, {pipeline_mode = #tpu.pipeline_mode<synchronous>, transform_indices = @transform_3, window_bounds = array<i64: 128, 128>}, {pipeline_mode = #tpu.pipeline_mode<synchronous>, transform_indices = @transform_4, window_bounds = array<i64: 1, 128>}, {transform_indices = @transform_5, window_bounds = array<i64: 1, 128, 128>}]} {
    %c0_i32 = arith.constant 0 : i32
    %0 = arith.cmpi eq, %arg1, %c0_i32 : i32
    %1 = arith.extui %0 : i1 to i32
    %c0_i32_0 = arith.constant 0 : i32
    %2 = arith.cmpi ne, %1, %c0_i32_0 : i32
    scf.if %2 {
      %c0_87 = arith.constant 0 : index
      %c0_88 = arith.constant 0 : index
      %c0_89 = arith.constant 0 : index
      %157 = vector.load %arg2[%c0_87, %c0_88, %c0_89] : memref<1x128x128xbf16, #tpu.memory_space<vmem>>, vector<1x128x128xbf16>
      %158 = vector.shape_cast %157 : vector<1x128x128xbf16> to vector<128x128xbf16>
      %c0_90 = arith.constant 0 : index
      %c0_91 = arith.constant 0 : index
      %159 = vector.load %arg4[%c0_90, %c0_91] : memref<128x256xbf16, #tpu.memory_space<vmem>>, vector<128x256xbf16>
      %cst_92 = arith.constant dense<0.000000e+00> : vector<128x256xf32>
      %160 = tpu.matmul %158, %159, %cst_92 {dimension_numbers = #tpu.dot_dimension_numbers<[1], [0], [0], [1], [0, 0, 1, 1], [], []>} : vector<128x128xbf16>, vector<128x256xbf16>, vector<128x256xf32> -> vector<128x256xf32>
      %161 = vector.extract_strided_slice %160 {offsets = [0, 0], sizes = [128, 128], strides = [1, 1]} : vector<128x256xf32> to vector<128x128xf32>
      %162 = tpu.transpose %161, [1, 0] : vector<128x128xf32> -> vector<128x128xf32>
      %163 = arith.truncf %162 : vector<128x128xf32> to vector<128x128xbf16>
      %c0_93 = arith.constant 0 : index
      %c0_94 = arith.constant 0 : index
      %164 = vector.load %arg8[%c0_93, %c0_94] : memref<128x128xbf16, #tpu.memory_space<vmem>>, vector<128x128xbf16>
      tpu.vector_store %arg8[%c0_93, %c0_94], %163 {strides = array<i32>} : memref<128x128xbf16, #tpu.memory_space<vmem>>, vector<128x128xbf16>,
      %165 = vector.extract_strided_slice %160 {offsets = [0, 128], sizes = [128, 128], strides = [1, 1]} : vector<128x256xf32> to vector<128x128xf32>
      %166 = arith.truncf %165 : vector<128x128xf32> to vector<128x128xbf16>
      %c0_95 = arith.constant 0 : index
      %c0_96 = arith.constant 0 : index
      %167 = vector.load %arg9[%c0_95, %c0_96] : memref<128x128xbf16, #tpu.memory_space<vmem>>, vector<128x128xbf16>
      tpu.vector_store %arg9[%c0_95, %c0_96], %166 {strides = array<i32>} : memref<128x128xbf16, #tpu.memory_space<vmem>>, vector<128x128xbf16>,
    } else {
    }
    %c128_i32 = arith.constant 128 : i32
    %3 = arith.muli %arg1, %c128_i32 : i32
    %4 = tpu.assume_multiple %3, 128 : i32
    %c0 = arith.constant 0 : index
    %5 = arith.index_cast %4 : i32 to index
    %c0_1 = arith.constant 0 : index
    %6 = vector.load %arg2[%c0, %5, %c0_1] : memref<1x128x128xbf16, #tpu.memory_space<vmem>>, vector<1x128x128xbf16>
    %7 = vector.shape_cast %6 : vector<1x128x128xbf16> to vector<128x128xbf16>
    %c0_2 = arith.constant 0 : index
    %c0_3 = arith.constant 0 : index
    %8 = vector.load %arg3[%c0_2, %c0_3] : memref<128x128xbf16, #tpu.memory_space<vmem>>, vector<128x128xbf16>
    %cst = arith.constant dense<0.000000e+00> : vector<128x128xf32>
    %9 = tpu.matmul %7, %8, %cst {dimension_numbers = #tpu.dot_dimension_numbers<[1], [0], [0], [1], [0, 0, 1, 1], [], []>} : vector<128x128xbf16>, vector<128x128xbf16>, vector<128x128xf32> -> vector<128x128xf32>
    %10 = arith.truncf %9 : vector<128x128xf32> to vector<128x128xbf16>
    %11 = vector.extract_strided_slice %10 {offsets = [0, 0], sizes = [128, 16], strides = [1, 1]} : vector<128x128xbf16> to vector<128x16xbf16>
    %c0_4 = arith.constant 0 : index
    %c0_5 = arith.constant 0 : index
    %12 = vector.load %arg8[%c0_4, %c0_5] : memref<128x128xbf16, #tpu.memory_space<vmem>>, vector<16x128xbf16>
    %cst_6 = arith.constant dense<0.000000e+00> : vector<128x128xf32>
    %13 = tpu.matmul %11, %12, %cst_6 {dimension_numbers = #tpu.dot_dimension_numbers<[1], [0], [0], [1], [0, 0, 1, 1], [], []>} : vector<128x16xbf16>, vector<16x128xbf16>, vector<128x128xf32> -> vector<128x128xf32>
    %cst_7 = arith.constant dense<0xFF800000> : vector<128xf32>
    %14 = vector.multi_reduction <maximumf>, %13, %cst_7 [1] : vector<128x128xf32> to vector<128xf32>
    %15 = vector.shape_cast %14 : vector<128xf32> to vector<128x1xf32>
    %16 = vector.broadcast %15 : vector<128x1xf32> to vector<128x128xf32>
    %17 = arith.subf %13, %16 : vector<128x128xf32>
    %18 = math.exp %17 : vector<128x128xf32>
    %cst_8 = arith.constant dense<0.000000e+00> : vector<128xf32>
    %19 = vector.multi_reduction <add>, %18, %cst_8 [1] : vector<128x128xf32> to vector<128xf32>
    %20 = vector.shape_cast %19 : vector<128xf32> to vector<128x1xf32>
    %21 = tpu.reciprocal %20 {approx = true} : vector<128x1xf32> -> vector<128x1xf32>
    %22 = arith.truncf %18 : vector<128x128xf32> to vector<128x128xbf16>
    %c0_9 = arith.constant 0 : index
    %c0_10 = arith.constant 0 : index
    %23 = vector.load %arg9[%c0_9, %c0_10] : memref<128x128xbf16, #tpu.memory_space<vmem>>, vector<128x16xbf16>
    %cst_11 = arith.constant dense<0.000000e+00> : vector<128x16xf32>
    %24 = tpu.matmul %22, %23, %cst_11 {dimension_numbers = #tpu.dot_dimension_numbers<[1], [0], [0], [1], [0, 0, 1, 1], [], []>} : vector<128x128xbf16>, vector<128x16xbf16>, vector<128x16xf32> -> vector<128x16xf32>
    %25 = vector.broadcast %21 : vector<128x1xf32> to vector<128x16xf32>
    %26 = arith.mulf %24, %25 : vector<128x16xf32>
    %c0_12 = arith.constant 0 : index
    %c0_13 = arith.constant 0 : index
    %27 = vector.load %arg10[%c0_12, %c0_13] : memref<128x128xf32, #tpu.memory_space<vmem>>, vector<128x16xf32>
    tpu.vector_store %arg10[%c0_12, %c0_13], %26 {strides = array<i32>} : memref<128x128xf32, #tpu.memory_space<vmem>>, vector<128x16xf32>,
    %28 = vector.extract_strided_slice %10 {offsets = [0, 16], sizes = [128, 16], strides = [1, 1]} : vector<128x128xbf16> to vector<128x16xbf16>
    %c16 = arith.constant 16 : index
    %c0_14 = arith.constant 0 : index
    %29 = vector.load %arg8[%c16, %c0_14] : memref<128x128xbf16, #tpu.memory_space<vmem>>, vector<16x128xbf16>
    %cst_15 = arith.constant dense<0.000000e+00> : vector<128x128xf32>
    %30 = tpu.matmul %28, %29, %cst_15 {dimension_numbers = #tpu.dot_dimension_numbers<[1], [0], [0], [1], [0, 0, 1, 1], [], []>} : vector<128x16xbf16>, vector<16x128xbf16>, vector<128x128xf32> -> vector<128x128xf32>
    %cst_16 = arith.constant dense<0xFF800000> : vector<128xf32>
    %31 = vector.multi_reduction <maximumf>, %30, %cst_16 [1] : vector<128x128xf32> to vector<128xf32>
    %32 = vector.shape_cast %31 : vector<128xf32> to vector<128x1xf32>
    %33 = vector.broadcast %32 : vector<128x1xf32> to vector<128x128xf32>
    %34 = arith.subf %30, %33 : vector<128x128xf32>
    %35 = math.exp %34 : vector<128x128xf32>
    %cst_17 = arith.constant dense<0.000000e+00> : vector<128xf32>
    %36 = vector.multi_reduction <add>, %35, %cst_17 [1] : vector<128x128xf32> to vector<128xf32>
    %37 = vector.shape_cast %36 : vector<128xf32> to vector<128x1xf32>
    %38 = tpu.reciprocal %37 {approx = true} : vector<128x1xf32> -> vector<128x1xf32>
    %39 = arith.truncf %35 : vector<128x128xf32> to vector<128x128xbf16>
    %c0_18 = arith.constant 0 : index
    %c16_19 = arith.constant 16 : index
    %40 = vector.load %arg9[%c0_18, %c16_19] : memref<128x128xbf16, #tpu.memory_space<vmem>>, vector<128x16xbf16>
    %cst_20 = arith.constant dense<0.000000e+00> : vector<128x16xf32>
    %41 = tpu.matmul %39, %40, %cst_20 {dimension_numbers = #tpu.dot_dimension_numbers<[1], [0], [0], [1], [0, 0, 1, 1], [], []>} : vector<128x128xbf16>, vector<128x16xbf16>, vector<128x16xf32> -> vector<128x16xf32>
    %42 = vector.broadcast %38 : vector<128x1xf32> to vector<128x16xf32>
    %43 = arith.mulf %41, %42 : vector<128x16xf32>
    %c0_21 = arith.constant 0 : index
    %c16_22 = arith.constant 16 : index
    %44 = vector.load %arg10[%c0_21, %c16_22] : memref<128x128xf32, #tpu.memory_space<vmem>>, vector<128x16xf32>
    tpu.vector_store %arg10[%c0_21, %c16_22], %43 {strides = array<i32>} : memref<128x128xf32, #tpu.memory_space<vmem>>, vector<128x16xf32>,
    %45 = vector.extract_strided_slice %10 {offsets = [0, 32], sizes = [128, 16], strides = [1, 1]} : vector<128x128xbf16> to vector<128x16xbf16>
    %c32 = arith.constant 32 : index
    %c0_23 = arith.constant 0 : index
    %46 = vector.load %arg8[%c32, %c0_23] : memref<128x128xbf16, #tpu.memory_space<vmem>>, vector<16x128xbf16>
    %cst_24 = arith.constant dense<0.000000e+00> : vector<128x128xf32>
    %47 = tpu.matmul %45, %46, %cst_24 {dimension_numbers = #tpu.dot_dimension_numbers<[1], [0], [0], [1], [0, 0, 1, 1], [], []>} : vector<128x16xbf16>, vector<16x128xbf16>, vector<128x128xf32> -> vector<128x128xf32>
    %cst_25 = arith.constant dense<0xFF800000> : vector<128xf32>
    %48 = vector.multi_reduction <maximumf>, %47, %cst_25 [1] : vector<128x128xf32> to vector<128xf32>
    %49 = vector.shape_cast %48 : vector<128xf32> to vector<128x1xf32>
    %50 = vector.broadcast %49 : vector<128x1xf32> to vector<128x128xf32>
    %51 = arith.subf %47, %50 : vector<128x128xf32>
    %52 = math.exp %51 : vector<128x128xf32>
    %cst_26 = arith.constant dense<0.000000e+00> : vector<128xf32>
    %53 = vector.multi_reduction <add>, %52, %cst_26 [1] : vector<128x128xf32> to vector<128xf32>
    %54 = vector.shape_cast %53 : vector<128xf32> to vector<128x1xf32>
    %55 = tpu.reciprocal %54 {approx = true} : vector<128x1xf32> -> vector<128x1xf32>
    %56 = arith.truncf %52 : vector<128x128xf32> to vector<128x128xbf16>
    %c0_27 = arith.constant 0 : index
    %c32_28 = arith.constant 32 : index
    %57 = vector.load %arg9[%c0_27, %c32_28] : memref<128x128xbf16, #tpu.memory_space<vmem>>, vector<128x16xbf16>
    %cst_29 = arith.constant dense<0.000000e+00> : vector<128x16xf32>
    %58 = tpu.matmul %56, %57, %cst_29 {dimension_numbers = #tpu.dot_dimension_numbers<[1], [0], [0], [1], [0, 0, 1, 1], [], []>} : vector<128x128xbf16>, vector<128x16xbf16>, vector<128x16xf32> -> vector<128x16xf32>
    %59 = vector.broadcast %55 : vector<128x1xf32> to vector<128x16xf32>
    %60 = arith.mulf %58, %59 : vector<128x16xf32>
    %c0_30 = arith.constant 0 : index
    %c32_31 = arith.constant 32 : index
    %61 = vector.load %arg10[%c0_30, %c32_31] : memref<128x128xf32, #tpu.memory_space<vmem>>, vector<128x16xf32>
    tpu.vector_store %arg10[%c0_30, %c32_31], %60 {strides = array<i32>} : memref<128x128xf32, #tpu.memory_space<vmem>>, vector<128x16xf32>,
    %62 = vector.extract_strided_slice %10 {offsets = [0, 48], sizes = [128, 16], strides = [1, 1]} : vector<128x128xbf16> to vector<128x16xbf16>
    %c48 = arith.constant 48 : index
    %c0_32 = arith.constant 0 : index
    %63 = vector.load %arg8[%c48, %c0_32] : memref<128x128xbf16, #tpu.memory_space<vmem>>, vector<16x128xbf16>
    %cst_33 = arith.constant dense<0.000000e+00> : vector<128x128xf32>
    %64 = tpu.matmul %62, %63, %cst_33 {dimension_numbers = #tpu.dot_dimension_numbers<[1], [0], [0], [1], [0, 0, 1, 1], [], []>} : vector<128x16xbf16>, vector<16x128xbf16>, vector<128x128xf32> -> vector<128x128xf32>
    %cst_34 = arith.constant dense<0xFF800000> : vector<128xf32>
    %65 = vector.multi_reduction <maximumf>, %64, %cst_34 [1] : vector<128x128xf32> to vector<128xf32>
    %66 = vector.shape_cast %65 : vector<128xf32> to vector<128x1xf32>
    %67 = vector.broadcast %66 : vector<128x1xf32> to vector<128x128xf32>
    %68 = arith.subf %64, %67 : vector<128x128xf32>
    %69 = math.exp %68 : vector<128x128xf32>
    %cst_35 = arith.constant dense<0.000000e+00> : vector<128xf32>
    %70 = vector.multi_reduction <add>, %69, %cst_35 [1] : vector<128x128xf32> to vector<128xf32>
    %71 = vector.shape_cast %70 : vector<128xf32> to vector<128x1xf32>
    %72 = tpu.reciprocal %71 {approx = true} : vector<128x1xf32> -> vector<128x1xf32>
    %73 = arith.truncf %69 : vector<128x128xf32> to vector<128x128xbf16>
    %c0_36 = arith.constant 0 : index
    %c48_37 = arith.constant 48 : index
    %74 = vector.load %arg9[%c0_36, %c48_37] : memref<128x128xbf16, #tpu.memory_space<vmem>>, vector<128x16xbf16>
    %cst_38 = arith.constant dense<0.000000e+00> : vector<128x16xf32>
    %75 = tpu.matmul %73, %74, %cst_38 {dimension_numbers = #tpu.dot_dimension_numbers<[1], [0], [0], [1], [0, 0, 1, 1], [], []>} : vector<128x128xbf16>, vector<128x16xbf16>, vector<128x16xf32> -> vector<128x16xf32>
    %76 = vector.broadcast %72 : vector<128x1xf32> to vector<128x16xf32>
    %77 = arith.mulf %75, %76 : vector<128x16xf32>
    %c0_39 = arith.constant 0 : index
    %c48_40 = arith.constant 48 : index
    %78 = vector.load %arg10[%c0_39, %c48_40] : memref<128x128xf32, #tpu.memory_space<vmem>>, vector<128x16xf32>
    tpu.vector_store %arg10[%c0_39, %c48_40], %77 {strides = array<i32>} : memref<128x128xf32, #tpu.memory_space<vmem>>, vector<128x16xf32>,
    %79 = vector.extract_strided_slice %10 {offsets = [0, 64], sizes = [128, 16], strides = [1, 1]} : vector<128x128xbf16> to vector<128x16xbf16>
    %c64 = arith.constant 64 : index
    %c0_41 = arith.constant 0 : index
    %80 = vector.load %arg8[%c64, %c0_41] : memref<128x128xbf16, #tpu.memory_space<vmem>>, vector<16x128xbf16>
    %cst_42 = arith.constant dense<0.000000e+00> : vector<128x128xf32>
    %81 = tpu.matmul %79, %80, %cst_42 {dimension_numbers = #tpu.dot_dimension_numbers<[1], [0], [0], [1], [0, 0, 1, 1], [], []>} : vector<128x16xbf16>, vector<16x128xbf16>, vector<128x128xf32> -> vector<128x128xf32>
    %cst_43 = arith.constant dense<0xFF800000> : vector<128xf32>
    %82 = vector.multi_reduction <maximumf>, %81, %cst_43 [1] : vector<128x128xf32> to vector<128xf32>
    %83 = vector.shape_cast %82 : vector<128xf32> to vector<128x1xf32>
    %84 = vector.broadcast %83 : vector<128x1xf32> to vector<128x128xf32>
    %85 = arith.subf %81, %84 : vector<128x128xf32>
    %86 = math.exp %85 : vector<128x128xf32>
    %cst_44 = arith.constant dense<0.000000e+00> : vector<128xf32>
    %87 = vector.multi_reduction <add>, %86, %cst_44 [1] : vector<128x128xf32> to vector<128xf32>
    %88 = vector.shape_cast %87 : vector<128xf32> to vector<128x1xf32>
    %89 = tpu.reciprocal %88 {approx = true} : vector<128x1xf32> -> vector<128x1xf32>
    %90 = arith.truncf %86 : vector<128x128xf32> to vector<128x128xbf16>
    %c0_45 = arith.constant 0 : index
    %c64_46 = arith.constant 64 : index
    %91 = vector.load %arg9[%c0_45, %c64_46] : memref<128x128xbf16, #tpu.memory_space<vmem>>, vector<128x16xbf16>
    %cst_47 = arith.constant dense<0.000000e+00> : vector<128x16xf32>
    %92 = tpu.matmul %90, %91, %cst_47 {dimension_numbers = #tpu.dot_dimension_numbers<[1], [0], [0], [1], [0, 0, 1, 1], [], []>} : vector<128x128xbf16>, vector<128x16xbf16>, vector<128x16xf32> -> vector<128x16xf32>
    %93 = vector.broadcast %89 : vector<128x1xf32> to vector<128x16xf32>
    %94 = arith.mulf %92, %93 : vector<128x16xf32>
    %c0_48 = arith.constant 0 : index
    %c64_49 = arith.constant 64 : index
    %95 = vector.load %arg10[%c0_48, %c64_49] : memref<128x128xf32, #tpu.memory_space<vmem>>, vector<128x16xf32>
    tpu.vector_store %arg10[%c0_48, %c64_49], %94 {strides = array<i32>} : memref<128x128xf32, #tpu.memory_space<vmem>>, vector<128x16xf32>,
    %96 = vector.extract_strided_slice %10 {offsets = [0, 80], sizes = [128, 16], strides = [1, 1]} : vector<128x128xbf16> to vector<128x16xbf16>
    %c80 = arith.constant 80 : index
    %c0_50 = arith.constant 0 : index
    %97 = vector.load %arg8[%c80, %c0_50] : memref<128x128xbf16, #tpu.memory_space<vmem>>, vector<16x128xbf16>
    %cst_51 = arith.constant dense<0.000000e+00> : vector<128x128xf32>
    %98 = tpu.matmul %96, %97, %cst_51 {dimension_numbers = #tpu.dot_dimension_numbers<[1], [0], [0], [1], [0, 0, 1, 1], [], []>} : vector<128x16xbf16>, vector<16x128xbf16>, vector<128x128xf32> -> vector<128x128xf32>
    %cst_52 = arith.constant dense<0xFF800000> : vector<128xf32>
    %99 = vector.multi_reduction <maximumf>, %98, %cst_52 [1] : vector<128x128xf32> to vector<128xf32>
    %100 = vector.shape_cast %99 : vector<128xf32> to vector<128x1xf32>
    %101 = vector.broadcast %100 : vector<128x1xf32> to vector<128x128xf32>
    %102 = arith.subf %98, %101 : vector<128x128xf32>
    %103 = math.exp %102 : vector<128x128xf32>
    %cst_53 = arith.constant dense<0.000000e+00> : vector<128xf32>
    %104 = vector.multi_reduction <add>, %103, %cst_53 [1] : vector<128x128xf32> to vector<128xf32>
    %105 = vector.shape_cast %104 : vector<128xf32> to vector<128x1xf32>
    %106 = tpu.reciprocal %105 {approx = true} : vector<128x1xf32> -> vector<128x1xf32>
    %107 = arith.truncf %103 : vector<128x128xf32> to vector<128x128xbf16>
    %c0_54 = arith.constant 0 : index
    %c80_55 = arith.constant 80 : index
    %108 = vector.load %arg9[%c0_54, %c80_55] : memref<128x128xbf16, #tpu.memory_space<vmem>>, vector<128x16xbf16>
    %cst_56 = arith.constant dense<0.000000e+00> : vector<128x16xf32>
    %109 = tpu.matmul %107, %108, %cst_56 {dimension_numbers = #tpu.dot_dimension_numbers<[1], [0], [0], [1], [0, 0, 1, 1], [], []>} : vector<128x128xbf16>, vector<128x16xbf16>, vector<128x16xf32> -> vector<128x16xf32>
    %110 = vector.broadcast %106 : vector<128x1xf32> to vector<128x16xf32>
    %111 = arith.mulf %109, %110 : vector<128x16xf32>
    %c0_57 = arith.constant 0 : index
    %c80_58 = arith.constant 80 : index
    %112 = vector.load %arg10[%c0_57, %c80_58] : memref<128x128xf32, #tpu.memory_space<vmem>>, vector<128x16xf32>
    tpu.vector_store %arg10[%c0_57, %c80_58], %111 {strides = array<i32>} : memref<128x128xf32, #tpu.memory_space<vmem>>, vector<128x16xf32>,
    %113 = vector.extract_strided_slice %10 {offsets = [0, 96], sizes = [128, 16], strides = [1, 1]} : vector<128x128xbf16> to vector<128x16xbf16>
    %c96 = arith.constant 96 : index
    %c0_59 = arith.constant 0 : index
    %114 = vector.load %arg8[%c96, %c0_59] : memref<128x128xbf16, #tpu.memory_space<vmem>>, vector<16x128xbf16>
    %cst_60 = arith.constant dense<0.000000e+00> : vector<128x128xf32>
    %115 = tpu.matmul %113, %114, %cst_60 {dimension_numbers = #tpu.dot_dimension_numbers<[1], [0], [0], [1], [0, 0, 1, 1], [], []>} : vector<128x16xbf16>, vector<16x128xbf16>, vector<128x128xf32> -> vector<128x128xf32>
    %cst_61 = arith.constant dense<0xFF800000> : vector<128xf32>
    %116 = vector.multi_reduction <maximumf>, %115, %cst_61 [1] : vector<128x128xf32> to vector<128xf32>
    %117 = vector.shape_cast %116 : vector<128xf32> to vector<128x1xf32>
    %118 = vector.broadcast %117 : vector<128x1xf32> to vector<128x128xf32>
    %119 = arith.subf %115, %118 : vector<128x128xf32>
    %120 = math.exp %119 : vector<128x128xf32>
    %cst_62 = arith.constant dense<0.000000e+00> : vector<128xf32>
    %121 = vector.multi_reduction <add>, %120, %cst_62 [1] : vector<128x128xf32> to vector<128xf32>
    %122 = vector.shape_cast %121 : vector<128xf32> to vector<128x1xf32>
    %123 = tpu.reciprocal %122 {approx = true} : vector<128x1xf32> -> vector<128x1xf32>
    %124 = arith.truncf %120 : vector<128x128xf32> to vector<128x128xbf16>
    %c0_63 = arith.constant 0 : index
    %c96_64 = arith.constant 96 : index
    %125 = vector.load %arg9[%c0_63, %c96_64] : memref<128x128xbf16, #tpu.memory_space<vmem>>, vector<128x16xbf16>
    %cst_65 = arith.constant dense<0.000000e+00> : vector<128x16xf32>
    %126 = tpu.matmul %124, %125, %cst_65 {dimension_numbers = #tpu.dot_dimension_numbers<[1], [0], [0], [1], [0, 0, 1, 1], [], []>} : vector<128x128xbf16>, vector<128x16xbf16>, vector<128x16xf32> -> vector<128x16xf32>
    %127 = vector.broadcast %123 : vector<128x1xf32> to vector<128x16xf32>
    %128 = arith.mulf %126, %127 : vector<128x16xf32>
    %c0_66 = arith.constant 0 : index
    %c96_67 = arith.constant 96 : index
    %129 = vector.load %arg10[%c0_66, %c96_67] : memref<128x128xf32, #tpu.memory_space<vmem>>, vector<128x16xf32>
    tpu.vector_store %arg10[%c0_66, %c96_67], %128 {strides = array<i32>} : memref<128x128xf32, #tpu.memory_space<vmem>>, vector<128x16xf32>,
    %130 = vector.extract_strided_slice %10 {offsets = [0, 112], sizes = [128, 16], strides = [1, 1]} : vector<128x128xbf16> to vector<128x16xbf16>
    %c112 = arith.constant 112 : index
    %c0_68 = arith.constant 0 : index
    %131 = vector.load %arg8[%c112, %c0_68] : memref<128x128xbf16, #tpu.memory_space<vmem>>, vector<16x128xbf16>
    %cst_69 = arith.constant dense<0.000000e+00> : vector<128x128xf32>
    %132 = tpu.matmul %130, %131, %cst_69 {dimension_numbers = #tpu.dot_dimension_numbers<[1], [0], [0], [1], [0, 0, 1, 1], [], []>} : vector<128x16xbf16>, vector<16x128xbf16>, vector<128x128xf32> -> vector<128x128xf32>
    %cst_70 = arith.constant dense<0xFF800000> : vector<128xf32>
    %133 = vector.multi_reduction <maximumf>, %132, %cst_70 [1] : vector<128x128xf32> to vector<128xf32>
    %134 = vector.shape_cast %133 : vector<128xf32> to vector<128x1xf32>
    %135 = vector.broadcast %134 : vector<128x1xf32> to vector<128x128xf32>
    %136 = arith.subf %132, %135 : vector<128x128xf32>
    %137 = math.exp %136 : vector<128x128xf32>
    %cst_71 = arith.constant dense<0.000000e+00> : vector<128xf32>
    %138 = vector.multi_reduction <add>, %137, %cst_71 [1] : vector<128x128xf32> to vector<128xf32>
    %139 = vector.shape_cast %138 : vector<128xf32> to vector<128x1xf32>
    %140 = tpu.reciprocal %139 {approx = true} : vector<128x1xf32> -> vector<128x1xf32>
    %141 = arith.truncf %137 : vector<128x128xf32> to vector<128x128xbf16>
    %c0_72 = arith.constant 0 : index
    %c112_73 = arith.constant 112 : index
    %142 = vector.load %arg9[%c0_72, %c112_73] : memref<128x128xbf16, #tpu.memory_space<vmem>>, vector<128x16xbf16>
    %cst_74 = arith.constant dense<0.000000e+00> : vector<128x16xf32>
    %143 = tpu.matmul %141, %142, %cst_74 {dimension_numbers = #tpu.dot_dimension_numbers<[1], [0], [0], [1], [0, 0, 1, 1], [], []>} : vector<128x128xbf16>, vector<128x16xbf16>, vector<128x16xf32> -> vector<128x16xf32>
    %144 = vector.broadcast %140 : vector<128x1xf32> to vector<128x16xf32>
    %145 = arith.mulf %143, %144 : vector<128x16xf32>
    %c0_75 = arith.constant 0 : index
    %c112_76 = arith.constant 112 : index
    %146 = vector.load %arg10[%c0_75, %c112_76] : memref<128x128xf32, #tpu.memory_space<vmem>>, vector<128x16xf32>
    tpu.vector_store %arg10[%c0_75, %c112_76], %145 {strides = array<i32>} : memref<128x128xf32, #tpu.memory_space<vmem>>, vector<128x16xf32>,
    %c0_77 = arith.constant 0 : index
    %c0_78 = arith.constant 0 : index
    %147 = vector.load %arg10[%c0_77, %c0_78] : memref<128x128xf32, #tpu.memory_space<vmem>>, vector<128x128xf32>
    %148 = arith.truncf %147 : vector<128x128xf32> to vector<128x128xbf16>
    %c0_79 = arith.constant 0 : index
    %c0_80 = arith.constant 0 : index
    %149 = vector.load %arg5[%c0_79, %c0_80] : memref<128x128xbf16, #tpu.memory_space<vmem>>, vector<128x128xbf16>
    %cst_81 = arith.constant dense<0.000000e+00> : vector<128x128xf32>
    %150 = tpu.matmul %148, %149, %cst_81 {dimension_numbers = #tpu.dot_dimension_numbers<[1], [0], [0], [1], [0, 0, 1, 1], [], []>} : vector<128x128xbf16>, vector<128x128xbf16>, vector<128x128xf32> -> vector<128x128xf32>
    %c0_82 = arith.constant 0 : index
    %c0_83 = arith.constant 0 : index
    %151 = vector.load %arg6[%c0_82, %c0_83] : memref<1x128xf32, #tpu.memory_space<vmem>>, vector<1x128xf32>
    %152 = vector.broadcast %151 : vector<1x128xf32> to vector<128x128xf32>
    %153 = arith.addf %150, %152 : vector<128x128xf32>
    %c0_84 = arith.constant 0 : index
    %c0_85 = arith.constant 0 : index
    %c0_86 = arith.constant 0 : index
    %154 = vector.load %arg7[%c0_84, %c0_85, %c0_86] : memref<1x128x128xf32, #tpu.memory_space<vmem>>, vector<1x128x128xf32>
    %155 = vector.shape_cast %154 : vector<1x128x128xf32> to vector<128x128xf32>
    %156 = vector.shape_cast %153 : vector<128x128xf32> to vector<1x128x128xf32>
    tpu.vector_store %arg7[%c0_84, %c0_85, %c0_86], %156 {strides = array<i32>} : memref<1x128x128xf32, #tpu.memory_space<vmem>>, vector<1x128x128xf32>,
    return
  }
  func.func @transform_0(%arg0: i32, %arg1: i32) -> (i32, i32, i32) {
    %c0_i32 = arith.constant 0 : i32
    %c0_i32_0 = arith.constant 0 : i32
    %c0_i32_1 = arith.constant 0 : i32
    return %arg0, %c0_i32, %c0_i32_0 : i32, i32, i32
  }
  func.func @transform_1(%arg0: i32, %arg1: i32) -> (i32, i32) {
    %c0_i32 = arith.constant 0 : i32
    %c0_i32_0 = arith.constant 0 : i32
    %c0_i32_1 = arith.constant 0 : i32
    return %c0_i32, %c0_i32_0 : i32, i32
  }
  func.func @transform_2(%arg0: i32, %arg1: i32) -> (i32, i32) {
    %c0_i32 = arith.constant 0 : i32
    %c0_i32_0 = arith.constant 0 : i32
    %c0_i32_1 = arith.constant 0 : i32
    return %c0_i32, %c0_i32_0 : i32, i32
  }
  func.func @transform_3(%arg0: i32, %arg1: i32) -> (i32, i32) {
    %c0_i32 = arith.constant 0 : i32
    %c0_i32_0 = arith.constant 0 : i32
    %c0_i32_1 = arith.constant 0 : i32
    return %c0_i32, %c0_i32_0 : i32, i32
  }
  func.func @transform_4(%arg0: i32, %arg1: i32) -> (i32, i32) {
    %c0_i32 = arith.constant 0 : i32
    %c0_i32_0 = arith.constant 0 : i32
    %c0_i32_1 = arith.constant 0 : i32
    return %c0_i32, %c0_i32_0 : i32, i32
  }
  func.func @transform_5(%arg0: i32, %arg1: i32) -> (i32, i32, i32) {
    %c0_i32 = arith.constant 0 : i32
    %c0_i32_0 = arith.constant 0 : i32
    return %arg0, %arg1, %c0_i32 : i32, i32, i32
  }
}

</mosaic_0001>

<bundles_post_ra>
// kernel: tpu_custom_call.1
= control target key start
LH: loop header
LB: loop body
LE: loop exit
PB: predicated region body
PF: predicated region fallthrough
CT: control target
= control target key end

     0   :  { %10 = vsyncpa [#allocation6], 0  ;;  %s9930_s0 = inlined_call_operand.hbm [shape: bf16[2,128,128], index: 0, kind: input, shape index: {}]   ;;  %s9931_s1 = inlined_call_operand.hbm [shape: bf16[128,128], index: 1, kind: input, shape index: {}]   ;;  %s9932_s2 = inlined_call_operand.hbm [shape: bf16[128,256], index: 2, kind: input, shape index: {}]   ;;  %s9933_s3 = inlined_call_operand.hbm [shape: bf16[128,128], index: 3, kind: input, shape index: {}]   ;;  %s9934_s4 = inlined_call_operand.hbm [shape: f32[1,128], index: 4, kind: input, shape index: {}]   ;;  %s9935_s5 = inlined_call_operand.hbm [shape: f32[2,128,128], index: 5, kind: output, shape index: {}]  }
   0x1   :  { %12 = vsyncpa [#allocation6 + $0x1], 0 }
   0x2   :  { %13 = vsyncpa [#allocation9], 0 }
   0x3   :  { %14 = vsyncpa [#allocation12], 0 }
   0x4   :  { %15 = vsyncpa [#allocation7], 0 }
   0x5   :  { %17 = vsyncpa [#allocation7 + $0x1], 0  ;;  %s7005_s18 = smov 0   ;;  %s7007_s19 = smov 0  }
   0x6   :  { %s7009_s20 = smov 0   ;;  %s7011_s21 = smov 0  }
   0x7   :  { %s7013_s22 = smov 0   ;;  %s7015_s23 = smov 0  }
   0x8 LB: > { %10109 = sst [smem:[#allocation19_spill]] %s6933_s18  ;;  %s5202_s24 = sadd.s32 4294967295, %s6953_s23   ;;  %s6953_s23 = sphi %s7015_s23, %s23_s23   ;;  %s6949_s22 = sphi %s7013_s22, %s10657_s22   ;;  %s6945_s21 = sphi %s7011_s21, %s10656_s21   ;;  %s6941_s20 = sphi %s7009_s20, %s10655_s20   ;;  %s6937_s19 = sphi %s7007_s19, %s10654_s19   ;;  %s6933_s18 = sphi %s7005_s18, %s10653_s18  }
   0x9   : > { %s5203_s25 = sadd.s32 4294967294, %s6953_s23   ;;  %p55_p0 = scmp.ne.s32.totalorder %s6937_s19, %s6933_s18 }
   0xa   : > { %p7039_p1 = scmp.eq.s32.totalorder %s5202_s24, 0  ;;  %p7043_p2 = scmp.eq.s32.totalorder %s5202_s24, 1 }
   0xb   : > { %p171_p3 = scmp.eq.s32.totalorder %s5203_s25, 1  ;;  %p5204_p5 = scmp.ge.s32.totalorder %s6953_s23, 1 }
   0xc   : > { %s10110_s26 = scalar_select %p7039_p1, 1, 0 }
   0xd   : > { %s10111_s27 = scalar_select %p7043_p2, 1, 0 }
   0xe   : > { %p7049_p4 = por %p7039_p1, %p55_p0  ;;  %p7054_p6 = por %p171_p3, %p55_p0 }
   0xf   : > { %p178_p7 = scmp.lt.s32.totalorder %s6953_s23, 3  ;;  %s6955_s6 = smov [#allocation8]  }
  0x10   : > { %s10112_s28 = scalar_select %p7049_p4, 1, 0 }
  0x11   : > { %s10113_s29 = scalar_select %p7054_p6, 1, 0 }
  0x12   : > { %p7059_p8 = pnand %p5204_p5, %p178_p7  ;;  %s190_s7 = sshll.u32 %s6955_s6, 4  ;;  %s7063_s7 = int_to_ptr.vmem [resolvable:$true] %s190_s7 }
  0x13   : > { %10114 = sst [smem:[#allocation20_spill]] %s10113_s29  ;;  %s6956_s9 = smov [#allocation11]  }
  0x14   : > { %s10115_s30 = scalar_select %p7059_p8, 1, 0 }
  0x15   : > { %p6056_p9 = pneg %p7059_p8  ;;  %s216_s10 = sshll.u32 %s6956_s9, 4  ;;  %s7074_s10 = int_to_ptr.vmem [resolvable:$true] %s216_s10 }
  0x16   : > { %s6957_s11 = smov [#allocation10]   ;;  %s6721_s15 = scalar_lea.hbm %s9931_s1, 1024 }
  0x17   : > { %p7070_p11 = pnand %p6056_p9, %p7039_p1  ;;  %s7076_s12 = sshll.u32 %s6957_s11, 4  ;;  %s204_s12 = int_to_ptr.vmem [resolvable:$true] %s7076_s12 }
  0x18   : > { %p6722_p12 = scmp.ne.s32.totalorder %s9931_s1, %s6721_s15  ;;  %p6728_p5 = scmp.lt.u32.totalorder %s6721_s15, %s9931_s1 }
  0x19   : > { %p7086_p13 = pneg %p7070_p11 }
  0x1b   : > { %p6724_p0 = pnand %p7086_p13, %p6722_p12 }
  0x1d   : > { %p6725_p3 = pneg %p6724_p0 }
  0x1f   : > { %p6730_p7 = pnand %p6728_p5, %p6725_p3 }
  0x21   : > { %6733 = shalt.err (!%p6730_p7)
}
  0x22   : > { %s6734_s9 = scalar_lea.vmem %s7063_s7, 1024  ;;  %p6742_p1 = scmp.lt.s32.totalorder %s7063_s7, %s7063_s7 }
  0x23   : > { %p6735_p9 = scmp.ne.s32.totalorder %s7063_s7, %s6734_s9  ;;  %p6743_p4 = scmp.lt.s32.totalorder %s6734_s9, %s6734_s9 }
  0x25   : > { %p6737_p10 = pnand %p6735_p9, %p7086_p13  ;;  %p6744_p12 = por %p6743_p4, %p6742_p1 }
  0x27   : > { %p6738_p6 = pneg %p6737_p10 }
  0x29   : > { %p6745_p0 = pnand %p6744_p12, %p6738_p6 }
  0x2b   : > { %6748 = shalt.err (!%p6745_p0)
}
  0x2c   : > { %s9942_s11 = smov 64   ;;  %s9943_s13 = smov 4  }
  0x2d   : > { %6059 = dma.hbm_to_vmem [thread:$0]  (!%p7070_p11), %s9931_s1, 1024, %s7063_s7, [#allocation9], %s9942_s11, %s9942_s11, %s9943_s13  }
  0x2e   : > { %s6749_s25 = scalar_lea.hbm %s9933_s3, 1024 }
  0x2f   : > { %p6750_p1 = scmp.ne.s32.totalorder %s9933_s3, %s6749_s25  ;;  %p6756_p10 = scmp.lt.u32.totalorder %s6749_s25, %s9933_s3 }
  0x31   : > { %p6752_p4 = pnand %p6750_p1, %p7086_p13 }
  0x33   : > { %p6753_p6 = pneg %p6752_p4 }
  0x35   : > { %p6758_p3 = pnand %p6756_p10, %p6753_p6 }
  0x37   : > { %6761 = shalt.err (!%p6758_p3)
}
  0x38   : > { %s6762_s7 = scalar_lea.vmem %s7074_s10, 1024  ;;  %p6770_p12 = scmp.lt.s32.totalorder %s7074_s10, %s7074_s10 }
  0x39   : > { %p6763_p5 = scmp.ne.s32.totalorder %s7074_s10, %s6762_s7  ;;  %p6771_p0 = scmp.lt.s32.totalorder %s6762_s7, %s6762_s7 }
  0x3b   : > { %p6765_p7 = pnand %p6763_p5, %p7086_p13  ;;  %p6772_p1 = por %p6771_p0, %p6770_p12 }
  0x3d   : > { %p6766_p9 = pneg %p6765_p7 }
  0x3f   : > { %p6773_p4 = pnand %p6772_p1, %p6766_p9 }
  0x41   : > { %6776 = shalt.err (!%p6773_p4)
}
  0x42   : > { %6065 = dma.hbm_to_vmem [thread:$0]  (!%p7070_p11), %s9933_s3, 1024, %s7074_s10, [#allocation12], %s9942_s11, %s9942_s11, %s9943_s13  }
  0x43   : > { %s6777_s16 = scalar_lea.hbm %s9932_s2, 2048 }
  0x44   : > { %p6778_p6 = scmp.ne.s32.totalorder %s9932_s2, %s6777_s16  ;;  %p6784_p5 = scmp.lt.u32.totalorder %s6777_s16, %s9932_s2 }
  0x46   : > { %p6780_p10 = pnand %p6778_p6, %p7086_p13 }
  0x48   : > { %p6781_p3 = pneg %p6780_p10 }
  0x4a   : > { %p6786_p7 = pnand %p6784_p5, %p6781_p3 }
  0x4c   : > { %6789 = shalt.err (!%p6786_p7)
}
  0x4d   : > { %s6790_s7 = scalar_lea.vmem %s204_s12, 2048  ;;  %p6798_p1 = scmp.lt.s32.totalorder %s204_s12, %s204_s12 }
  0x4e   : > { %p6791_p9 = scmp.ne.s32.totalorder %s204_s12, %s6790_s7  ;;  %p6799_p4 = scmp.lt.s32.totalorder %s6790_s7, %s6790_s7 }
  0x50   : > { %p6793_p12 = pnand %p6791_p9, %p7086_p13  ;;  %p6800_p8 = por %p6799_p4, %p6798_p1 }
  0x52   : > { %p6794_p0 = pneg %p6793_p12 }
  0x54   : > { %p6801_p2 = pnand %p6800_p8, %p6794_p0 }
  0x56   : > { %6804 = shalt.err (!%p6801_p2)
}
  0x57   : > { %s6960_s10 = smov 128   ;;  %s6961_s18 = smov 8  }
  0x58   : > { %6062 = dma.hbm_to_vmem [thread:$0]  (!%p7070_p11), %s9932_s2, 2048, %s204_s12, [#allocation9], %s6960_s10, %s6960_s10, %s6961_s18  }
  0x59   : > { %s6962_s15 = smov [#allocation13]   ;;  %s6805_s6 = scalar_lea.hbm %s9934_s4, 16 }
  0x5a   : > { %s230_s16 = sshll.u32 %s6962_s15, 4  ;;  %p6806_p2 = scmp.ne.s32.totalorder %s9934_s4, %s6805_s6  ;;  %s231_s16 = int_to_ptr.vmem [resolvable:$true] %s230_s16 }
  0x5b   : > { %p6812_p10 = scmp.lt.u32.totalorder %s6805_s6, %s9934_s4 }
  0x5c   : > { %p6808_p8 = pnand %p6806_p2, %p7086_p13 }
  0x5e   : > { %p6809_p6 = pneg %p6808_p8 }
  0x60   : > { %p6814_p3 = pnand %p6812_p10, %p6809_p6 }
  0x62   : > { %6817 = shalt.err (!%p6814_p3)
}
  0x63   : > { %s6818_s12 = scalar_lea.vmem %s231_s16, 16  ;;  %s6825_s10 = scalar_lea.vmem %s231_s16, 32 }
  0x64   : > { %p6819_p5 = scmp.ne.s32.totalorder %s231_s16, %s6818_s12  ;;  %p6826_p12 = scmp.lt.s32.totalorder %s231_s16, %s231_s16 }
  0x65   : > { %p6827_p0 = scmp.lt.s32.totalorder %s6825_s10, %s6818_s12 }
  0x66   : > { %p6821_p7 = pnand %p6819_p5, %p7086_p13 }
  0x67   : > { %p6828_p1 = por %p6827_p0, %p6826_p12 }
  0x68   : > { %p6822_p9 = pneg %p6821_p7 }
  0x6a   : > { %p6829_p4 = pnand %p6828_p1, %p6822_p9 }
  0x6c   : > { %6832 = shalt.err (!%p6829_p4)
}
  0x6d   : > { %6068 = dma.hbm_to_vmem [thread:$0]  (!%p7070_p11), %s9934_s4, 16, %s231_s16, [#allocation12]  }
  0x6e   : > { %s35_s24 = sadd.s32 1, %s6949_s22  ;;  %s42_s11 = sadd.s32 1, %s6941_s20 }
  0x6f   : > { %p37_p13 = scmp.ge.s32.totalorder %s35_s24, 2  ;;  %p49_p2 = scmp.ne.s32.totalorder %s6941_s20, %s6937_s19 }
  0x70   : > { %p50_p8 = scmp.eq.s32.totalorder %s6953_s23, 0  ;;  %p6081_p6 = scmp.lt.s32.totalorder %s6953_s23, 2 }
  0x71   : > { %s10659_s24 = smov (%p37_p13, %s35_s24), 0  ;;  %p10118_p3 = scmp.ne.s32.totalorder %s10111_s27, 0 }
  0x72   : > { %p51_p10 = por %p50_p8, %p49_p2  ;;  %s39_s13 = ssub.s32 %s6949_s22, %s10659_s24 }
  0x73   : > { %p7183_p5 = por %p10118_p3, %p49_p2  ;;  %s241_s14 = sand.u32 1, %s6941_s20  }
  0x74   : > { %p40_p7 = scmp.eq.s32.totalorder %s39_s13, 0  ;;  %s5210_s15 = sshll.u32 %s241_s14, 6 }
  0x75   : > { %s5338_s16 = sshll.u32 %s6949_s22, 10  ;;  %s245_s27 = scalar_lea.vmem [#allocation5], %s5210_s15 }
  0x76   : > { %s7192_s17 = scalar_select %p40_p7, %s6941_s20, %s42_s11  }
  0x77   : > { %s7197_s9 = scalar_lea.hbm %s9930_s0, %s5338_s16  ;;  %s252_s7 = sshll.u32 %s245_s27, 4  ;;  %s7205_s7 = int_to_ptr.vmem [resolvable:$true] %s252_s7 }
  0x78   : > { %p7201_p11 = pnand %p6081_p6, %p51_p10  ;;  %s7207_s10 = scalar_lea.sflag [#allocation6], %s241_s14 }
  0x79   : > { %s6833_s18 = scalar_lea.hbm %s7197_s9, 1024  ;;  %s6838_s13 = scalar_lea.hbm %s9930_s0, 2048 }
  0x7a   : > { %p6834_p9 = scmp.ne.s32.totalorder %s7197_s9, %s6833_s18  ;;  %p6835_p12 = pneg %p7201_p11 }
  0x7b   : > { %p6839_p4 = scmp.lt.u32.totalorder %s7197_s9, %s9930_s0  ;;  %p6840_p13 = scmp.lt.u32.totalorder %s6838_s13, %s6833_s18 }
  0x7c   : > { %p6836_p0 = pnand %p6835_p12, %p6834_p9  ;;  %p6842_p8 = scmp.lt.u32.totalorder %s6833_s18, %s7197_s9 }
  0x7d   : > { %p6841_p2 = por %p6840_p13, %p6839_p4 }
  0x7e   : > { %p6837_p1 = pneg %p6836_p0 }
  0x7f   : > { %p6843_p6 = por %p6842_p8, %p6841_p2 }
  0x81   : > { %p6844_p10 = pnand %p6843_p6, %p6837_p1 }
  0x83   : > { %6847 = shalt.err (!%p6844_p10)
}
  0x84   : > { %s6848_s14 = scalar_lea.vmem %s7205_s7, 1024  ;;  %s6963_s25 = smov [#allocation5]  }
  0x85   : > { %p6849_p3 = scmp.ne.s32.totalorder %s7205_s7, %s6848_s14  ;;  %s6853_s6 = sshll.u32 %s6963_s25, 4  ;;  %s6854_s6 = int_to_ptr.vmem [resolvable:$false] %s6853_s6 }
  0x86   : > { %s6855_s27 = scalar_lea.vmem %s6854_s6, 2048  ;;  %p6856_p0 = scmp.lt.s32.totalorder %s7205_s7, %s6854_s6 }
  0x87   : > { %p6851_p7 = pnand %p6849_p3, %p6835_p12  ;;  %p6857_p4 = scmp.lt.s32.totalorder %s6855_s27, %s6848_s14 }
  0x89   : > { %p6852_p9 = pneg %p6851_p7  ;;  %p6858_p13 = por %p6857_p4, %p6856_p0 }
  0x8b   : > { %p6859_p2 = pnand %p6858_p13, %p6852_p9 }
  0x8d   : > { %6862 = shalt.err (!%p6859_p2)
}
  0x8e   : > { %s10121_s18 = smov 4   ;;  %s10122_s29 = smov 64  }
  0x8f   : > { %6072 = dma.hbm_to_vmem [thread:$0]  (!%p7201_p11), %s7197_s9, 1024, %s7205_s7, %s7207_s10, %s10122_s29, %s10122_s29, %s10121_s18  }
  0x90   : > { %p10123_p12 = scmp.ne.s32.totalorder %s10115_s30, 0 }
  0x92   : > { %264 = sbr.rel (%p10123_p12) target bundleno = 3043 (0xbe3), region = 40 }
  0x99   : > { %s7241_s11 = sand.u32 1, %s6937_s19   ;;  %p10124_p1 = scmp.ne.s32.totalorder %s10112_s28, 0 }
  0x9a   : > { %s5214_s13 = sshll.u32 %s7241_s11, 6  ;;  %s267_s15 = scalar_lea.sflag [#allocation6], %s7241_s11 }
  0x9b   : > { %s7245_s16 = scalar_lea.vmem [#allocation5], %s5214_s13 }
  0x9c   : > { %6916 = dma.done.wait (%p10124_p1), %s267_s15, 1024  }
  0x9d   : > { %6918 = vsyncadd (%p10124_p1), %s267_s15, 4294966272  ;;  %p10125_p11 = scmp.ne.s32.totalorder %s10110_s26, 0 }
  0x9f   : > { %6920 = dma.done.wait (%p10125_p11), [#allocation9], 3072  }
  0xa0   : > { %6922 = vsyncadd (%p10125_p11), [#allocation9], 4294964224 }
  0xa1   : > { %6924 = dma.done.wait (%p10125_p11), [#allocation12], 1040  }
  0xa2   : > { %6926 = vsyncadd (%p10125_p11), [#allocation12], 4294966256  ;;  %v6964_v0 = vmov 0   ;;  %v6153_v1 = vld [vmem:[#allocation8] sm:$0xff]   ;;  %v6154_v2 = vld [vmem:[#allocation8 + $0x8] sm:$0xff]   ;;  %vm895_vm0 = vcmask 130048  }
  0xa3   : > { %511 = vmatprep.mubr.bf16.mxu0 %v6964_v0  ;;  %5572 = vmatprep.subr.bf16.mxu1 %v6153_v1  ;;  %v6155_v3 = vld [vmem:[#allocation8 + $0x10] sm:$0xff]   ;;  %v6159_v4 = vld [vmem:[#allocation10 + $0x4] ss:$8 sps:$4 sm:$0xff]   ;;  %v6161_v5 = vld [vmem:[#allocation10] ss:$8 sps:$4 sm:$0xff]   ;;  %s6965_s26 = smov 96  }
  0xa4   : > { %5573 = vmatpush3.bf16.msra.mxu1 %v6153_v1  ;;  %v6156_v6 = vld [vmem:[#allocation8 + $0x18] sm:$0xff]   ;;  %479 = vmatprep.subr.bf16.mxu0 %v6159_v4  ;;  %v6167_v9 = vld [vmem:[#allocation10 + $0x24] ss:$8 sps:$4 sm:$0xff]   ;;  %v6170_v12 = vld [vmem:[#allocation10 + $0x20] ss:$8 sps:$4 sm:$0xff]   ;;  %s6966_s28 = smov 112  }
  0xa5   : > { %5574 = vmatprep.subr.bf16.mxu1 %v6154_v2  ;;  %480 = vmatpush1.bf16.msra.mxu0 %v6161_v5  ;;  %v6163_v7 = vld [vmem:[#allocation10 + $0x14] ss:$8 sps:$4 sm:$0xff]   ;;  %v6165_v8 = vld [vmem:[#allocation10 + $0x10] ss:$8 sps:$4 sm:$0xff]   ;;  %v6157_v10 = vld [vmem:[#allocation8 + $0x20] sm:$0xff]   ;;  %s6967_s30 = smov 80  }
  0xa6   : > { %481 = vmatprep.subr.bf16.mxu0 %v6163_v7  ;;  %v6169_v11 = vld [vmem:[%s7245_s16] sm:$0xff]   ;;  %v6172_v13 = vld [vmem:[#allocation10 + $0x34] ss:$8 sps:$4 sm:$0xff]   ;;  %v6158_v14 = vld [vmem:[#allocation8 + $0x28] sm:$0xff]   ;;  %s6968_s9 = smov 48   ;;  %s6969_s7 = smov 64  }
  0xa7   : > { %5588 = vmatprep.mubr.bf16.mxu1 %v6169_v11  ;;  %v6174_v15 = vld [vmem:[#allocation10 + $0x30] ss:$8 sps:$4 sm:$0xff]   ;;  %v6175_v16 = vld [vmem:[#allocation10 + $0x44] ss:$8 sps:$4 sm:$0xff]   ;;  %v6177_v18 = vld [vmem:[#allocation10 + $0x40] ss:$8 sps:$4 sm:$0xff]  }
  0xa8   : > { %5575 = vmatpush3.bf16.msra.mxu1 %v6154_v2  ;;  %v6162_v17 = vld [vmem:[#allocation8 + $0x30] sm:$0xff]   ;;  %v6166_v20 = vld [vmem:[#allocation8 + $0x38] sm:$0xff]   ;;  %v6181_v22 = vld [vmem:[#allocation10 + $0x64] ss:$8 sps:$4 sm:$0xff]   ;;  %s6970_s12 = smov 32   ;;  %s6971_s10 = smov 16  }
  0xa9   : > { %5576 = vmatprep.subr.bf16.mxu1 %v6155_v3  ;;  %482 = vmatpush1.bf16.msra.mxu0 %v6165_v8  ;;  %v6178_v19 = vld [vmem:[#allocation10 + $0x54] ss:$8 sps:$4 sm:$0xff]   ;;  %v6180_v21 = vld [vmem:[#allocation10 + $0x50] ss:$8 sps:$4 sm:$0xff]   ;;  %v6171_v23 = vld [vmem:[%s7245_s16 + $0x8] sm:$0xff]   ;;  %vm1789_vm1 = vcmask 261248  }
  0xaa   : > { %483 = vmatprep.subr.bf16.mxu0 %v6167_v9  ;;  %v6183_v24 = vld [vmem:[#allocation10 + $0x60] ss:$8 sps:$4 sm:$0xff]   ;;  %v6184_v25 = vld [vmem:[#allocation10 + $0x74] ss:$8 sps:$4 sm:$0xff]   ;;  %v6186_v27 = vld [vmem:[#allocation10 + $0x70] ss:$8 sps:$4 sm:$0xff]  }
  0xab   : > { %v6188_v26 = vld [vmem:[%s7245_s16 + $0x10] sm:$0xff]   ;;  %v6187_v28 = vld [vmem:[%s7245_s16] sm:$0xff]   ;;  %v6189_v29 = vld [vmem:[%s7245_s16 + $0x18] sm:$0xff]   ;;  %vm2297_vm2 = vcmask 392448   ;;  %vm2805_vm3 = vcmask 523648   ;;  %vm3313_vm4 = vcmask 654848  }
  0xac   : > { %5577 = vmatpush3.bf16.msra.mxu1 %v6155_v3  ;;  %v6191_v30 = vld [vmem:[%s7245_s16 + $0x20] sm:$0xff]   ;;  %v6190_v31 = vld [vmem:[%s7245_s16 + $0x8] sm:$0xff]   ;;  %v6194_v33 = vld [vmem:[%s7245_s16 + $0x30] sm:$0xff]   ;;  %vm3821_vm5 = vcmask 786048   ;;  %vm4329_vm6 = vcmask 917248   ;;  %vm4837_vm7 = vcmask 1048448  }
  0xad   : > { %5578 = vmatprep.subr.bf16.mxu1 %v6156_v6  ;;  %484 = vmatpush1.bf16.msra.mxu0 %v6170_v12  ;;  %v6192_v32 = vld [vmem:[%s7245_s16 + $0x28] sm:$0xff]   ;;  %v6193_v34 = vld [vmem:[%s7245_s16 + $0x10] sm:$0xff]   ;;  %v6195_v35 = vld [vmem:[%s7245_s16 + $0x38] sm:$0xff]   ;;  %s5219_s14 = sshll.u32 %s7241_s11, 7  ;;  %s5339_s6 = sshll.u32 %s6945_s21, 11 }
  0xae   : > { %485 = vmatprep.subr.bf16.mxu0 %v6172_v13  ;;  %v6196_v36 = vld [vmem:[%s7245_s16 + $0x18] sm:$0xff]   ;;  %v6197_v37 = vld [vmem:[%s7245_s16 + $0x20] sm:$0xff]   ;;  %v6198_v38 = vld [vmem:[%s7245_s16 + $0x28] sm:$0xff]   ;;  %s9856_s25 = scalar_lea.vmem [#allocation14], %s5219_s14  ;;  %s9876_s13 = scalar_lea.hbm %s9935_s5, %s5339_s6 }
  0xaf   : > { %v6199_v39 = vld [vmem:[%s7245_s16 + $0x30] sm:$0xff]   ;;  %v6200_v40 = vld [vmem:[%s7245_s16 + $0x38] sm:$0xff]   ;;  %s5078_s27 = sshll.u32 %s9856_s25, 4  ;;  %s5063_s21 = scalar_lea.sflag [#allocation7], %s7241_s11  ;;  %s9878_s27 = int_to_ptr.vmem [resolvable:$true] %s5078_s27 }
  0xb0   : > { %5579 = vmatpush3.bf16.msra.mxu1 %v6156_v6  ;;  %s6863_s15 = scalar_lea.vmem %s9878_s27, 2048  ;;  %s6972_s16 = smov [#allocation14]  }
  0xb1   : > { %5580 = vmatprep.subr.bf16.mxu1 %v6157_v10  ;;  %486 = vmatpush1.bf16.msra.mxu0 %v6174_v15  ;;  %p6864_p8 = scmp.ne.s32.totalorder %s9878_s27, %s6863_s15 }
  0xb2   : > { %487 = vmatprep.subr.bf16.mxu0 %v6175_v16 }
  0xb3   : > { %p6865_p6 = pnand %p6864_p8, %p7183_p5 }
  0xb4   : > { %5581 = vmatpush3.bf16.msra.mxu1 %v6157_v10 }
  0xb5   : > { %5582 = vmatprep.subr.bf16.mxu1 %v6158_v14  ;;  %488 = vmatpush1.bf16.msra.mxu0 %v6177_v18  ;;  %p6866_p10 = pneg %p6865_p6 }
  0xb6   : > { %489 = vmatprep.subr.bf16.mxu0 %v6178_v19 }
  0xb8   : > { %5583 = vmatpush3.bf16.msra.mxu1 %v6158_v14 }
  0xb9   : > { %5584 = vmatprep.subr.bf16.mxu1 %v6162_v17  ;;  %490 = vmatpush1.bf16.msra.mxu0 %v6180_v21 }
  0xba   : > { %491 = vmatprep.subr.bf16.mxu0 %v6181_v22 }
  0xbc   : > { %5585 = vmatpush3.bf16.msra.mxu1 %v6162_v17 }
  0xbd   : > { %5586 = vmatprep.subr.bf16.mxu1 %v6166_v20  ;;  %492 = vmatpush1.bf16.msra.mxu0 %v6183_v24 }
  0xbe   : > { %493 = vmatprep.subr.bf16.mxu0 %v6184_v25 }
  0xc0   : > { %5587 = vmatpush3.bf16.msra.mxu1 %v6166_v20 }
  0xc1   : > { %494 = vmatpush1.bf16.msra.mxu0 %v6186_v27 }
  0xc3   : > { %5589 = vmatmul.mubr.bf16.vlgmr.msra.gmra.mrb[0].mxu1 %v6171_v23 }
  0xc4   : > { %5592 = vmatprep.mubr.bf16.mxu1 %v6188_v26  ;;  %512 = vmatmul.mubr.bf16.vlgmr.msra.gmra.mrb[0].mxu0 %v6187_v28 }
  0xc5   : > { %521 = vmatprep.mubr.bf16.mxu0 %v6964_v0 }
  0xcb   : > { %5593 = vmatmul.mubr.bf16.gmra.mrb[4].mxu1 %v6189_v29 }
  0xcc   : > { %5596 = vmatprep.mubr.bf16.mxu1 %v6191_v30  ;;  %522 = vmatmul.mubr.bf16.gmra.mrb[4].mxu0 %v6190_v31 }
  0xcd   : > { %531 = vmatprep.mubr.bf16.mxu0 %v6964_v0 }
  0xd3   : > { %5597 = vmatmul.mubr.bf16.gmra.mrb[8].mxu1 %v6192_v32 }
  0xd4   : > { %5600 = vmatprep.mubr.bf16.mxu1 %v6194_v33  ;;  %532 = vmatmul.mubr.bf16.gmra.mrb[8].mxu0 %v6193_v34 }
  0xd5   : > { %541 = vmatprep.mubr.bf16.mxu0 %v6964_v0 }
  0xdb   : > { %5601 = vmatmul.mubr.bf16.gmra.mrb[12].mxu1 %v6195_v35 }
  0xdc   : > { %542 = vmatmul.mubr.bf16.gmra.mrb[12].mxu0 %v6196_v36 }
  0xdd   : > { %551 = vmatprep.mubr.bf16.mxu0 %v6964_v0 }
  0xe4   : > { %552 = vmatmul.mubr.bf16.gmra.mrb[16].mxu0 %v6197_v37 }
  0xe5   : > { %561 = vmatprep.mubr.bf16.mxu0 %v6964_v0 }
  0xec   : > { %562 = vmatmul.mubr.bf16.gmra.mrb[20].mxu0 %v6198_v38 }
  0xed   : > { %571 = vmatprep.mubr.bf16.mxu0 %v6964_v0 }
  0xf4   : > { %572 = vmatmul.mubr.bf16.gmra.mrb[24].mxu0 %v6199_v39 }
  0xf5   : > { %581 = vmatprep.mubr.bf16.mxu0 %v6964_v0 }
  0xfc   : > { %582 = vmatmul.mubr.bf16.gmra.mrb[28].mxu0 %v6200_v40 }
 0x196   : > { %v5590_v41 = vpop.f32.mrb[0].mxu1 }
 0x197   : > { %v823_v42 = vpop.f32.mrb[1].mxu1  ;;  %v7293_v47 = vpop.f32.mrb[0].mxu0 }
 0x198   : > { %v5591_v43 = vpop.f32.mrb[2].mxu1  ;;  %v515_v48 = vpop.f32.mrb[1].mxu0 }
 0x199   : > { %v7283_v44 = vpack.c.bf16 %v5591_v43, %v5590_v41  ;;  %v826_v45 = vpop.f32.mrb[3].mxu1  ;;  %v7295_v49 = vpop.f32.mrb[2].mxu0 }
 0x19a   : > { %v7285_v46 = vpack.c.bf16 %v826_v45, %v823_v42  ;;  %v519_v51 = vpop.f32.mrb[3].mxu0 }
 0x19b   : > { %1809 = vrot.lane.b32.xlu0 %v7283_v44, %s6965_s26  ;;  %1301 = vrot.lane.b32.xlu1 %v7283_v44, %s6966_s28  ;;  %v7301_v53 = vpack.c.bf16 %v519_v51, %v515_v48 }
 0x19c   : > { %5606 = vmatprep.mubr.msk.bf16.mxu1 %vm895_vm0, %v7285_v46 }
 0x19d   : > { %10126 = vst [vmem:[#allocation21_spill] sm:$0xff] %v7301_v53  ;;  %5622 = vmatprep.subr.bf16.mxu0 %v7301_v53 }
 0x19e   : > { %v5594_v50 = vpop.f32.mrb[4].mxu1  ;;  %5623 = vmatpush3.bf16.msra.mxu0 %v7301_v53 }
 0x19f   : > { %2317 = vrot.lane.b32.xlu0 %v7283_v44, %s6967_s30  ;;  %3333 = vrot.lane.b32.xlu1 %v7283_v44, %s6968_s9  ;;  %v839_v52 = vpop.f32.mrb[5].mxu1  ;;  %v7313_v58 = vpop.f32.mrb[4].mxu0 }
 0x1a0   : > { %v5595_v54 = vpop.f32.mrb[6].mxu1  ;;  %v525_v59 = vpop.f32.mrb[5].mxu0 }
 0x1a1   : > { %v7303_v55 = vpack.c.bf16 %v5595_v54, %v5594_v50  ;;  %v842_v56 = vpop.f32.mrb[7].mxu1  ;;  %v7315_v60 = vpop.f32.mrb[6].mxu0 }
 0x1a2   : > { %v7306_v57 = vpack.c.bf16 %v842_v56, %v839_v52  ;;  %v529_v62 = vpop.f32.mrb[7].mxu0 }
 0x1a3   : > { %2825 = vrot.lane.b32.xlu0 %v7283_v44, %s6969_s7  ;;  %3841 = vrot.lane.b32.xlu1 %v7283_v44, %s6970_s12  ;;  %v7321_v0 = vpack.c.bf16 %v529_v62, %v525_v59 }
 0x1a5   : > { %10127 = vst [vmem:[#allocation22_spill] sm:$0xff] %v7321_v0  ;;  %5624 = vmatprep.subr.bf16.mxu0 %v7321_v0 }
 0x1a6   : > { %v5598_v61 = vpop.f32.mrb[8].mxu1  ;;  %5625 = vmatpush3.bf16.msra.mxu0 %v7321_v0 }
 0x1a7   : > { %4349 = vrot.lane.b32.xlu0 %v7283_v44, %s6971_s10  ;;  %1299 = vrot.lane.b32.xlu1 %v7285_v46, %s6966_s28  ;;  %v855_v63 = vpop.f32.mrb[9].mxu1  ;;  %v7332_v5 = vpop.f32.mrb[8].mxu0 }
 0x1a8   : > { %v5599_v1 = vpop.f32.mrb[10].mxu1  ;;  %v535_v6 = vpop.f32.mrb[9].mxu0 }
 0x1a9   : > { %v7323_v2 = vpack.c.bf16 %v5599_v1, %v5598_v61  ;;  %v858_v3 = vpop.f32.mrb[11].mxu1  ;;  %v7335_v7 = vpop.f32.mrb[10].mxu0 }
 0x1aa   : > { %v7325_v4 = vpack.c.bf16 %v858_v3, %v855_v63  ;;  %v539_v9 = vpop.f32.mrb[11].mxu0 }
 0x1ab   : > { %1807 = vrot.lane.b32.xlu0 %v7285_v46, %s6965_s26  ;;  %3331 = vrot.lane.b32.xlu1 %v7285_v46, %s6968_s9  ;;  %v7341_v11 = vpack.c.bf16 %v539_v9, %v535_v6 }
 0x1ad   : > { %10128 = vst [vmem:[#allocation23_spill] sm:$0xff] %v7341_v11  ;;  %5626 = vmatprep.subr.bf16.mxu0 %v7341_v11 }
 0x1ae   : > { %v5602_v8 = vpop.f32.mrb[12].mxu1  ;;  %5627 = vmatpush3.bf16.msra.mxu0 %v7341_v11 }
 0x1af   : > { %2315 = vrot.lane.b32.xlu0 %v7285_v46, %s6967_s30  ;;  %3839 = vrot.lane.b32.xlu1 %v7285_v46, %s6970_s12  ;;  %v871_v10 = vpop.f32.mrb[13].mxu1  ;;  %v7352_v16 = vpop.f32.mrb[12].mxu0 }
 0x1b0   : > { %v5603_v12 = vpop.f32.mrb[14].mxu1  ;;  %v545_v17 = vpop.f32.mrb[13].mxu0 }
 0x1b1   : > { %v7343_v13 = vpack.c.bf16 %v5603_v12, %v5602_v8  ;;  %v874_v14 = vpop.f32.mrb[15].mxu1  ;;  %v7355_v18 = vpop.f32.mrb[14].mxu0 }
 0x1b2   : > { %v7345_v15 = vpack.c.bf16 %v874_v14, %v871_v10  ;;  %v549_v19 = vpop.f32.mrb[15].mxu0 }
 0x1b3   : > { %2823 = vrot.lane.b32.xlu0 %v7285_v46, %s6969_s7  ;;  %1588 = vrot.lane.b32.xlu1 %v7301_v53, %s6966_s28  ;;  %v7361_v20 = vpack.c.bf16 %v549_v19, %v545_v17 }
 0x1b5   : > { %10129 = vst [vmem:[#allocation24_spill] sm:$0xff] %v7361_v20  ;;  %5628 = vmatprep.subr.bf16.mxu0 %v7361_v20 }
 0x1b6   : > { %5629 = vmatpush3.bf16.msra.mxu0 %v7361_v20 }
 0x1b7   : > { %4347 = vrot.lane.b32.xlu0 %v7285_v46, %s6971_s10  ;;  %1305 = vrot.lane.b32.xlu1 %v7303_v55, %s6966_s28  ;;  %v7368_v21 = vpop.f32.mrb[16].mxu0 }
 0x1b8   : > { %v555_v22 = vpop.f32.mrb[17].mxu0 }
 0x1b9   : > { %v7371_v23 = vpop.f32.mrb[18].mxu0 }
 0x1ba   : > { %v559_v24 = vpop.f32.mrb[19].mxu0 }
 0x1bb   : > { %2096 = vrot.lane.b32.xlu0 %v7301_v53, %s6965_s26  ;;  %2829 = vrot.lane.b32.xlu1 %v7303_v55, %s6969_s7  ;;  %v7377_v25 = vpack.c.bf16 %v559_v24, %v555_v22 }
 0x1bd   : > { %10130 = vst [vmem:[#allocation25_spill] sm:$0xff] %v7377_v25  ;;  %5630 = vmatprep.subr.bf16.mxu0 %v7377_v25 }
 0x1be   : > { %5631 = vmatpush3.bf16.msra.mxu0 %v7377_v25 }
 0x1bf   : > { %1813 = vrot.lane.b32.xlu0 %v7303_v55, %s6965_s26  ;;  %3337 = vrot.lane.b32.xlu1 %v7303_v55, %s6968_s9  ;;  %v7384_v26 = vpop.f32.mrb[20].mxu0 }
 0x1c0   : > { %v565_v27 = vpop.f32.mrb[21].mxu0 }
 0x1c1   : > { %v7387_v28 = vpop.f32.mrb[22].mxu0 }
 0x1c2   : > { %v569_v29 = vpop.f32.mrb[23].mxu0 }
 0x1c3   : > { %2321 = vrot.lane.b32.xlu0 %v7303_v55, %s6967_s30  ;;  %3335 = vrot.lane.b32.xlu1 %v7306_v57, %s6968_s9  ;;  %v7393_v30 = vpack.c.bf16 %v569_v29, %v565_v27 }
 0x1c5   : > { %10131 = vst [vmem:[#allocation26_spill] sm:$0xff] %v7393_v30  ;;  %5632 = vmatprep.subr.bf16.mxu0 %v7393_v30 }
 0x1c6   : > { %5633 = vmatpush3.bf16.msra.mxu0 %v7393_v30 }
 0x1c7   : > { %3845 = vrot.lane.b32.xlu0 %v7303_v55, %s6970_s12  ;;  %3843 = vrot.lane.b32.xlu1 %v7306_v57, %s6970_s12  ;;  %v7400_v31 = vpop.f32.mrb[24].mxu0 }
 0x1c8   : > { %v575_v32 = vpop.f32.mrb[25].mxu0 }
 0x1c9   : > { %v7403_v33 = vpop.f32.mrb[26].mxu0 }
 0x1ca   : > { %v579_v34 = vpop.f32.mrb[27].mxu0 }
 0x1cb   : > { %4353 = vrot.lane.b32.xlu0 %v7303_v55, %s6971_s10  ;;  %2098 = vrot.lane.b32.xlu1 %v7321_v0, %s6965_s26  ;;  %v7409_v35 = vpack.c.bf16 %v579_v34, %v575_v32 }
 0x1cd   : > { %10132 = vst [vmem:[#allocation27_spill] sm:$0xff] %v7409_v35  ;;  %5634 = vmatprep.subr.bf16.mxu0 %v7409_v35 }
 0x1ce   : > { %5635 = vmatpush3.bf16.msra.mxu0 %v7409_v35 }
 0x1cf   : > { %1303 = vrot.lane.b32.xlu0 %v7306_v57, %s6966_s28  ;;  %1309 = vrot.lane.b32.xlu1 %v7323_v2, %s6966_s28  ;;  %v7416_v36 = vpop.f32.mrb[28].mxu0 }
 0x1d0   : > { %v585_v37 = vpop.f32.mrb[29].mxu0 }
 0x1d1   : > { %v7419_v38 = vpop.f32.mrb[30].mxu0 }
 0x1d2   : > { %v589_v39 = vpop.f32.mrb[31].mxu0 }
 0x1d3   : > { %1811 = vrot.lane.b32.xlu0 %v7306_v57, %s6965_s26  ;;  %1817 = vrot.lane.b32.xlu1 %v7323_v2, %s6965_s26  ;;  %v7425_v40 = vpack.c.bf16 %v589_v39, %v585_v37 }
 0x1d5   : > { %10133 = vst [vmem:[#allocation28_spill] sm:$0xff] %v7425_v40  ;;  %5636 = vmatprep.subr.bf16.mxu0 %v7425_v40 }
 0x1d6   : > { %5637 = vmatpush3.bf16.msra.mxu0 %v7425_v40 }
 0x1d7   : > { %2319 = vrot.lane.b32.xlu0 %v7306_v57, %s6967_s30  ;;  %3341 = vrot.lane.b32.xlu1 %v7323_v2, %s6968_s9 }
 0x1db   : > { %2827 = vrot.lane.b32.xlu0 %v7306_v57, %s6969_s7  ;;  %4357 = vrot.lane.b32.xlu1 %v7323_v2, %s6971_s10 }
 0x1df   : > { %4351 = vrot.lane.b32.xlu0 %v7306_v57, %s6971_s10  ;;  %1307 = vrot.lane.b32.xlu1 %v7325_v4, %s6966_s28 }
 0x1e3   : > { %1590 = vrot.lane.b32.xlu0 %v7321_v0, %s6966_s28  ;;  %1592 = vrot.lane.b32.xlu1 %v7341_v11, %s6966_s28 }
 0x1e7   : > { %2325 = vrot.lane.b32.xlu0 %v7323_v2, %s6967_s30  ;;  %2837 = vrot.lane.b32.xlu1 %v7343_v13, %s6969_s7 }
 0x1eb   : > { %2833 = vrot.lane.b32.xlu0 %v7323_v2, %s6969_s7  ;;  %3345 = vrot.lane.b32.xlu1 %v7343_v13, %s6968_s9 }
 0x1ef   : > { %3849 = vrot.lane.b32.xlu0 %v7323_v2, %s6970_s12  ;;  %2835 = vrot.lane.b32.xlu1 %v7345_v15, %s6969_s7 }
 0x1f3   : > { %1815 = vrot.lane.b32.xlu0 %v7325_v4, %s6965_s26  ;;  %3343 = vrot.lane.b32.xlu1 %v7345_v15, %s6968_s9 }
 0x1f7   : > { %2323 = vrot.lane.b32.xlu0 %v7325_v4, %s6967_s30  ;;  %1594 = vrot.lane.b32.xlu1 %v7361_v20, %s6966_s28 }
 0x1fb   : > { %2831 = vrot.lane.b32.xlu0 %v7325_v4, %s6969_s7  ;;  %2104 = vrot.lane.b32.xlu1 %v7377_v25, %s6965_s26 }
 0x1ff   : > { %3339 = vrot.lane.b32.xlu0 %v7325_v4, %s6968_s9  ;;  %1598 = vrot.lane.b32.xlu1 %v7393_v30, %s6966_s28 }
 0x203   : > { %3847 = vrot.lane.b32.xlu0 %v7325_v4, %s6970_s12  ;;  %1600 = vrot.lane.b32.xlu1 %v7409_v35, %s6966_s28 }
 0x207   : > { %4355 = vrot.lane.b32.xlu0 %v7325_v4, %s6971_s10  ;;  %2108 = vrot.lane.b32.xlu1 %v7409_v35, %s6965_s26 }
 0x20b   : > { %2100 = vrot.lane.b32.xlu0 %v7341_v11, %s6965_s26  ;;  %1602 = vrot.lane.b32.xlu1 %v7425_v40, %s6966_s28 }
 0x20d   : > { %v7481_v41 = vpop.permute.xlu0 %1809  ;;  %v7483_v42 = vpop.permute.xlu1 %1301 }
 0x20f   : > { %1313 = vrot.lane.b32.xlu0 %v7343_v13, %s6966_s28  ;;  %2604 = vrot.lane.b32.xlu1 %v7301_v53, %s6967_s30 }
 0x211   : > { %v7489_v43 = vpop.permute.xlu0 %2317  ;;  %v7491_v45 = vpop.permute.xlu1 %3333 }
 0x213   : > { %1821 = vrot.lane.b32.xlu0 %v7343_v13, %s6965_s26  ;;  %2608 = vrot.lane.b32.xlu1 %v7341_v11, %s6967_s30 }
 0x215   : > { %v7497_v46 = vpop.permute.xlu0 %2825  ;;  %v7499_v48 = vpop.permute.xlu1 %3841 }
 0x217   : > { %2329 = vrot.lane.b32.xlu0 %v7343_v13, %s6967_s30 }
 0x219   : > { %v7503_v50 = vpop.permute.xlu0 %4349  ;;  %v7505_v51 = vpop.permute.xlu1 %1299 }
 0x21b   : > { %3853 = vrot.lane.b32.xlu0 %v7343_v13, %s6970_s12 }
 0x21d   : > { %v7509_v52 = vpop.permute.xlu0 %1807  ;;  %v7511_v54 = vpop.permute.xlu1 %3331 }
 0x21f   : > { %4361 = vrot.lane.b32.xlu0 %v7343_v13, %s6971_s10 }
 0x221   : > { %v7515_v56 = vpop.permute.xlu0 %2315  ;;  %v7517_v59 = vpop.permute.xlu1 %3839 }
 0x223   : > { %1311 = vrot.lane.b32.xlu0 %v7345_v15, %s6966_s28 }
 0x225   : > { %v7521_v61 = vpop.permute.xlu0 %2823  ;;  %v7523_v62 = vpop.permute.xlu1 %1588 }
 0x226   : > { %5672 = vmatprep.subr.bf16.mxu0 %v7523_v62 }
 0x227   : > { %1819 = vrot.lane.b32.xlu0 %v7345_v15, %s6965_s26 }
 0x229   : > { %v7528_v63 = vpop.permute.xlu0 %4347 }
 0x22b   : > { %2327 = vrot.lane.b32.xlu0 %v7345_v15, %s6967_s30 }
 0x22d   : > { %v7532_v1 = vpop.permute.xlu0 %2096 }
 0x22e   : > { %10134 = vst [vmem:[#allocation29_spill] sm:$0xff] %v7532_v1 }
 0x22f   : > { %3851 = vrot.lane.b32.xlu0 %v7345_v15, %s6970_s12 }
 0x231   : > { %v7536_v3 = vpop.permute.xlu0 %1813 }
 0x233   : > { %4359 = vrot.lane.b32.xlu0 %v7345_v15, %s6971_s10 }
 0x235   : > { %v7540_v6 = vpop.permute.xlu0 %2321 }
 0x237   : > { %2102 = vrot.lane.b32.xlu0 %v7361_v20, %s6965_s26 }
 0x239   : > { %v7544_v8 = vpop.permute.xlu0 %3845 }
 0x23b   : > { %1596 = vrot.lane.b32.xlu0 %v7377_v25, %s6966_s28 }
 0x23d   : > { %v7548_v9 = vpop.permute.xlu0 %4353 }
 0x241   : > { %v7550_v10 = vpop.permute.xlu0 %1303 }
 0x245   : > { %v7552_v12 = vpop.permute.xlu0 %1811 }
 0x249   : > { %v7554_v14 = vpop.permute.xlu0 %2319 }
 0x24d   : > { %v7556_v17 = vpop.permute.xlu0 %2827 }
 0x251   : > { %v7558_v19 = vpop.permute.xlu0 %4351 }
 0x255   : > { %v7560_v22 = vpop.permute.xlu0 %1590 }
 0x259   : > { %v7562_v24 = vpop.permute.xlu0 %2325  ;;  %592 = vxpose.xlu0.b32.start [1/16] %v7293_v47, 128 }
 0x25d   : > { %v7565_v27 = vpop.permute.xlu0 %2833  ;;  %593 = vxpose.xlu0.b32.cont [2/16] %v7295_v49, 128 }
 0x261   : > { %594 = vxpose.xlu0.b32.cont [3/16] %v7313_v58, 128  ;;  %v7569_v29 = vpop.permute.xlu0 %3849 }
 0x265   : > { %595 = vxpose.xlu0.b32.cont [4/16] %v7315_v60, 128  ;;  %v7572_v32 = vpop.permute.xlu0 %1815 }
 0x269   : > { %596 = vxpose.xlu0.b32.cont [5/16] %v7332_v5, 128  ;;  %v7576_v34 = vpop.permute.xlu0 %2323 }
 0x26d   : > { %597 = vxpose.xlu0.b32.cont [6/16] %v7335_v7, 128  ;;  %v7579_v47 = vpop.permute.xlu0 %2831 }
 0x271   : > { %598 = vxpose.xlu0.b32.cont [7/16] %v7352_v16, 128  ;;  %v7583_v49 = vpop.permute.xlu0 %3339 }
 0x275   : > { %599 = vxpose.xlu0.b32.cont [8/16] %v7355_v18, 128  ;;  %v7586_v58 = vpop.permute.xlu0 %3847 }
 0x279   : > { %600 = vxpose.xlu0.b32.cont [9/16] %v7368_v21, 128  ;;  %v7590_v60 = vpop.permute.xlu0 %4355 }
 0x27d   : > { %601 = vxpose.xlu0.b32.cont [10/16] %v7371_v23, 128  ;;  %v7593_v5 = vpop.permute.xlu0 %2100 }
 0x27e   : > { %10135 = vst [vmem:[#allocation30_spill] sm:$0xff] %v7593_v5 }
 0x281   : > { %602 = vxpose.xlu0.b32.cont [11/16] %v7384_v26, 128  ;;  %v1314_v7 = vpop.permute.xlu0 %1313 }
 0x285   : > { %603 = vxpose.xlu0.b32.cont [12/16] %v7387_v28, 128  ;;  %v7598_v16 = vpop.permute.xlu0 %1821 }
 0x289   : > { %604 = vxpose.xlu0.b32.cont [13/16] %v7400_v31, 128  ;;  %v7600_v18 = vpop.permute.xlu0 %2329 }
 0x28d   : > { %605 = vxpose.xlu0.b32.cont [14/16] %v7403_v33, 128  ;;  %v7602_v21 = vpop.permute.xlu0 %3853 }
 0x291   : > { %606 = vxpose.xlu0.b32.cont [15/16] %v7416_v36, 128  ;;  %v7604_v23 = vpop.permute.xlu0 %4361 }
 0x295   : > { %607 = vxpose.xlu0.b32.end [16/16] %v7419_v38, 128  ;;  %v1312_v26 = vpop.permute.xlu0 %1311  ;;  %v1306_v38 = vpop.permute.xlu1 %1305 }
 0x299   : > { %v7606_v28 = vpop.permute.xlu0 %1819  ;;  %v7626_v11 = vpop.permute.xlu1 %2829 }
 0x29d   : > { %v7608_v31 = vpop.permute.xlu0 %2327  ;;  %v7628_v35 = vpop.permute.xlu1 %3337 }
 0x2a1   : > { %v7614_v33 = vpop.permute.xlu0 %3851  ;;  %v7630_v5 = vpop.permute.xlu1 %3335 }
 0x2a5   : > { %v7618_v36 = vpop.permute.xlu0 %4359  ;;  %v7636_v25 = vpop.permute.xlu1 %3843 }
 0x2a9   : > { %v7622_v37 = vpop.permute.xlu0 %2102 }
 0x2aa   : > { %10136 = vst [vmem:[#allocation31_spill] sm:$0xff] %v7622_v37 }
 0x2ad   : > { %v7624_v39 = vpop.permute.xlu0 %1596 }
 0x2be   : > { %2106 = vrot.lane.b32.xlu0 %v7393_v30, %s6965_s26 }
 0x2c2   : > { %2110 = vrot.lane.b32.xlu0 %v7425_v40, %s6965_s26 }
 0x2c6   : > { %2606 = vrot.lane.b32.xlu0 %v7321_v0, %s6967_s30 }
 0x2ca   : > { %2610 = vrot.lane.b32.xlu0 %v7361_v20, %s6967_s30 }
 0x2d9   : > { %v608_v53 = vpop.trf.xlu0 }
 0x2dd   : > { %v609_v40 = vpop.trf.xlu0 }
 0x2de   : > { %v624_v30 = vpack.c.bf16 %v609_v40, %v608_v53 }
 0x2e0   : > { %5604 = vmatprep.subr.bf16.mxu1 %v624_v30 }
 0x2e1   : > { %5605 = vmatpush3.bf16.msra.mxu1 %v624_v30  ;;  %v610_v0 = vpop.trf.xlu0  ;;  %v7642_v30 = vpop.permute.xlu1 %2098 }
 0x2e4   : > { %5607 = vmatmul.mubr.msk.bf16.vlgmr.msra.gmra.mrb[16].mxu1 %vm895_vm0, %v7283_v44 }
 0x2e5   : > { %5610 = vmatprep.mubr.msk.bf16.mxu1 %vm895_vm0, %v7306_v57  ;;  %v611_v20 = vpop.trf.xlu0  ;;  %v1310_v40 = vpop.permute.xlu1 %1309 }
 0x2e6   : > { %v625_v37 = vpack.c.bf16 %v611_v20, %v610_v0 }
 0x2e8   : > { %5654 = vmatprep.subr.bf16.mxu1 %v625_v37 }
 0x2e9   : > { %v612_v1 = vpop.trf.xlu0  ;;  %5655 = vmatpush3.bf16.msra.mxu1 %v625_v37  ;;  %v1818_v57 = vpop.permute.xlu1 %1817 }
 0x2ec   : > { %5611 = vmatmul.mubr.msk.bf16.gmra.mrb[20].mxu1 %vm895_vm0, %v7303_v55 }
 0x2ed   : > { %5614 = vmatprep.mubr.msk.bf16.mxu1 %vm895_vm0, %v7325_v4  ;;  %v613_v53 = vpop.trf.xlu0  ;;  %v7652_v55 = vpop.permute.xlu1 %3341 }
 0x2ee   : > { %v626_v44 = vpack.c.bf16 %v613_v53, %v612_v1 }
 0x2f0   : > { %5704 = vmatprep.subr.bf16.mxu1 %v626_v44 }
 0x2f1   : > { %v614_v0 = vpop.trf.xlu0 }
 0x2f4   : > { %5615 = vmatmul.mubr.msk.bf16.gmra.mrb[24].mxu1 %vm895_vm0, %v7323_v2  ;;  %v7658_v2 = vpop.permute.xlu1 %4357 }
 0x2f5   : > { %5618 = vmatprep.mubr.msk.bf16.mxu1 %vm895_vm0, %v7345_v15  ;;  %v615_v4 = vpop.trf.xlu0 }
 0x2f6   : > { %v627_v20 = vpack.c.bf16 %v615_v4, %v614_v0 }
 0x2f8   : > { %v1308_v15 = vpop.permute.xlu1 %1307 }
 0x2fc   : > { %5619 = vmatmul.mubr.msk.bf16.gmra.mrb[28].mxu1 %vm895_vm0, %v7343_v13  ;;  %v616_v13 = vpop.trf.xlu0 }
 0x2fd   : > { %5656 = vmatprep.mubr.msk.bf16.mxu1 %vm895_vm0, %v7505_v51 }
 0x304   : > { %5657 = vmatmul.mubr.msk.bf16.vlgmr.msra.gmra.mrb[32].mxu1 %vm895_vm0, %v7483_v42  ;;  %v617_v42 = vpop.trf.xlu0 }
 0x305   : > { %5660 = vmatprep.mubr.msk.bf16.mxu1 %vm895_vm0, %v7550_v10  ;;  %5705 = vmatpush3.bf16.msra.mxu1 %v626_v44  ;;  %v628_v51 = vpack.c.bf16 %v617_v42, %v616_v13 }
 0x306   : > { %5754 = vmatprep.subr.bf16.mxu1 %v627_v20 }
 0x30c   : > { %5661 = vmatmul.mubr.msk.bf16.gmra.mrb[36].mxu1 %vm895_vm0, %v1306_v38 }
 0x30d   : > { %5664 = vmatprep.mubr.msk.bf16.mxu1 %vm895_vm0, %v1308_v15 }
 0x314   : > { %5665 = vmatmul.mubr.msk.bf16.gmra.mrb[40].mxu1 %vm895_vm0, %v1310_v40 }
 0x315   : > { %5668 = vmatprep.mubr.msk.bf16.mxu1 %vm895_vm0, %v1312_v26 }
 0x31c   : > { %5669 = vmatmul.mubr.msk.bf16.gmra.mrb[44].mxu1 %vm895_vm0, %v1314_v7 }
 0x31d   : > { %5706 = vmatprep.mubr.msk.bf16.mxu1 %vm895_vm0, %v7509_v52  ;;  %v618_v52 = vpop.trf.xlu0 }
 0x324   : > { %5707 = vmatmul.mubr.msk.bf16.vlgmr.msra.gmra.mrb[48].mxu1 %vm895_vm0, %v7481_v41  ;;  %v619_v41 = vpop.trf.xlu0 }
 0x325   : > { %5710 = vmatprep.mubr.msk.bf16.mxu1 %vm895_vm0, %v7552_v12  ;;  %5755 = vmatpush3.bf16.msra.mxu1 %v627_v20  ;;  %v629_v1 = vpack.c.bf16 %v619_v41, %v618_v52 }
 0x326   : > { %5804 = vmatprep.subr.bf16.mxu1 %v628_v51 }
 0x32c   : > { %5711 = vmatmul.mubr.msk.bf16.gmra.mrb[52].mxu1 %vm895_vm0, %v7536_v3  ;;  %v7698_v3 = vpop.permute.xlu1 %1592 }
 0x32d   : > { %5714 = vmatprep.mubr.msk.bf16.mxu1 %vm895_vm0, %v7572_v32 }
 0x330   : > { %v2838_v10 = vpop.permute.xlu1 %2837 }
 0x334   : > { %5715 = vmatmul.mubr.msk.bf16.gmra.mrb[56].mxu1 %vm895_vm0, %v1818_v57 }
 0x335   : > { %5718 = vmatprep.mubr.msk.bf16.mxu1 %vm895_vm0, %v7606_v28 }
 0x33c   : > { %5719 = vmatmul.mubr.msk.bf16.gmra.mrb[60].mxu1 %vm895_vm0, %v7598_v16 }
 0x33d   : > { %5756 = vmatprep.mubr.msk.bf16.mxu1 %vm895_vm0, %v7515_v56  ;;  %v620_v56 = vpop.trf.xlu0 }
 0x344   : > { %5757 = vmatmul.mubr.msk.bf16.vlgmr.msra.gmra.mrb[64].mxu1 %vm895_vm0, %v7489_v43  ;;  %v621_v43 = vpop.trf.xlu0 }
 0x345   : > { %5760 = vmatprep.mubr.msk.bf16.mxu1 %vm895_vm0, %v7554_v14  ;;  %5805 = vmatpush3.bf16.msra.mxu1 %v628_v51 }
 0x346   : > { %5854 = vmatprep.subr.bf16.mxu1 %v629_v1 }
 0x34c   : > { %5761 = vmatmul.mubr.msk.bf16.gmra.mrb[68].mxu1 %vm895_vm0, %v7540_v6  ;;  %v630_v6 = vpack.c.bf16 %v621_v43, %v620_v56 }
 0x34d   : > { %5764 = vmatprep.mubr.msk.bf16.mxu1 %vm895_vm0, %v7576_v34 }
 0x354   : > { %5765 = vmatmul.mubr.msk.bf16.gmra.mrb[72].mxu1 %vm895_vm0, %v7562_v24 }
 0x355   : > { %5768 = vmatprep.mubr.msk.bf16.mxu1 %vm895_vm0, %v7608_v31 }
 0x35c   : > { %5769 = vmatmul.mubr.msk.bf16.gmra.mrb[76].mxu1 %vm895_vm0, %v7600_v18 }
 0x35d   : > { %5806 = vmatprep.mubr.msk.bf16.mxu1 %vm895_vm0, %v7521_v61  ;;  %v3346_v61 = vpop.permute.xlu1 %3345 }
 0x361   : > { %v2836_v12 = vpop.permute.xlu1 %2835 }
 0x364   : > { %5807 = vmatmul.mubr.msk.bf16.vlgmr.msra.gmra.mrb[80].mxu1 %vm895_vm0, %v7497_v46  ;;  %v622_v46 = vpop.trf.xlu0 }
 0x365   : > { %5810 = vmatprep.mubr.msk.bf16.mxu1 %vm895_vm0, %v7556_v17  ;;  %5855 = vmatpush3.bf16.msra.mxu1 %v629_v1 }
 0x366   : > { %5904 = vmatprep.subr.bf16.mxu1 %v630_v6 }
 0x368   : > { %v623_v14 = vpop.trf.xlu0 }
 0x369   : > { %v631_v17 = vpack.c.bf16 %v623_v14, %v622_v46 }
 0x36c   : > { %5811 = vmatmul.mubr.msk.bf16.gmra.mrb[84].mxu1 %vm895_vm0, %v7626_v11  ;;  %v3344_v11 = vpop.permute.xlu1 %3343 }
 0x36d   : > { %5814 = vmatprep.mubr.msk.bf16.mxu1 %vm895_vm0, %v7579_v47 }
 0x370   : > { %v7893_v1 = vpop.permute.xlu1 %1594 }
 0x374   : > { %5815 = vmatmul.mubr.msk.bf16.gmra.mrb[88].mxu1 %vm895_vm0, %v7565_v27 }
 0x375   : > { %5818 = vmatprep.mubr.msk.bf16.mxu1 %vm895_vm0, %v2836_v12 }
 0x37c   : > { %5819 = vmatmul.mubr.msk.bf16.gmra.mrb[92].mxu1 %vm895_vm0, %v2838_v10 }
 0x37d   : > { %5856 = vmatprep.mubr.msk.bf16.mxu1 %vm895_vm0, %v7511_v54 }
 0x384   : > { %5857 = vmatmul.mubr.msk.bf16.vlgmr.msra.gmra.mrb[96].mxu1 %vm895_vm0, %v7491_v45 }
 0x385   : > { %5860 = vmatprep.mubr.msk.bf16.mxu1 %vm895_vm0, %v7630_v5  ;;  %5905 = vmatpush3.bf16.msra.mxu1 %v630_v6 }
 0x386   : > { %5954 = vmatprep.subr.bf16.mxu1 %v631_v17 }
 0x38c   : > { %5861 = vmatmul.mubr.msk.bf16.gmra.mrb[100].mxu1 %vm895_vm0, %v7628_v35 }
 0x38d   : > { %5864 = vmatprep.mubr.msk.bf16.mxu1 %vm895_vm0, %v7583_v49 }
 0x394   : > { %5865 = vmatmul.mubr.msk.bf16.gmra.mrb[104].mxu1 %vm895_vm0, %v7652_v55 }
 0x395   : > { %5868 = vmatprep.mubr.msk.bf16.mxu1 %vm895_vm0, %v3344_v11 }
 0x39c   : > { %5869 = vmatmul.mubr.msk.bf16.gmra.mrb[108].mxu1 %vm895_vm0, %v3346_v61  ;;  %v7905_v61 = vpop.permute.xlu1 %2104 }
 0x39d   : > { %5906 = vmatprep.mubr.msk.bf16.mxu1 %vm895_vm0, %v7517_v59 }
 0x3a0   : > { %v7919_v11 = vpop.permute.xlu1 %1598 }
 0x3a4   : > { %5907 = vmatmul.mubr.msk.bf16.vlgmr.msra.gmra.mrb[112].mxu1 %vm895_vm0, %v7499_v48 }
 0x3a5   : > { %5910 = vmatprep.mubr.msk.bf16.mxu1 %vm895_vm0, %v7636_v25  ;;  %5955 = vmatpush3.bf16.msra.mxu1 %v631_v17 }
 0x3ac   : > { %5911 = vmatmul.mubr.msk.bf16.gmra.mrb[116].mxu1 %vm895_vm0, %v7544_v8 }
 0x3ad   : > { %5914 = vmatprep.mubr.msk.bf16.mxu1 %vm895_vm0, %v7586_v58 }
 0x3b4   : > { %5915 = vmatmul.mubr.msk.bf16.gmra.mrb[120].mxu1 %vm895_vm0, %v7569_v29 }
 0x3b5   : > { %5918 = vmatprep.mubr.msk.bf16.mxu1 %vm895_vm0, %v7614_v33 }
 0x3b7   : > { %v7740_v35 = vpop.f32.mrb[16].mxu1 }
 0x3b8   : > { %v7742_v45 = vpop.f32.mrb[17].mxu1  ;;  %1021 = vmax.xlane.f32.xlu1 %v7740_v35 }
 0x3b9   : > { %v7745_v25 = vpop.f32.mrb[18].mxu1 }
 0x3ba   : > { %v7747_v48 = vpop.f32.mrb[19].mxu1 }
 0x3bc   : > { %5919 = vmatmul.mubr.msk.bf16.gmra.mrb[124].mxu1 %vm895_vm0, %v7602_v21  ;;  %1017 = vmax.xlane.f32.xlu1 %v7742_v45 }
 0x3bd   : > { %5956 = vmatprep.mubr.msk.bf16.mxu1 %vm895_vm0, %v7528_v63 }
 0x3bf   : > { %v7754_v54 = vpop.f32.mrb[20].mxu1 }
 0x3c0   : > { %v7756_v59 = vpop.f32.mrb[21].mxu1  ;;  %1023 = vmax.xlane.f32.xlu1 %v7745_v25 }
 0x3c1   : > { %v7759_v8 = vpop.f32.mrb[22].mxu1 }
 0x3c2   : > { %v7761_v24 = vpop.f32.mrb[23].mxu1 }
 0x3c4   : > { %5957 = vmatmul.mubr.msk.bf16.vlgmr.msra.gmra.mrb[128].mxu1 %vm895_vm0, %v7503_v50  ;;  %1019 = vmax.xlane.f32.xlu1 %v7747_v48 }
 0x3c5   : > { %5960 = vmatprep.mubr.msk.bf16.mxu1 %vm895_vm0, %v7558_v19 }
 0x3c7   : > { %v7768_v27 = vpop.f32.mrb[24].mxu1 }
 0x3c8   : > { %v7770_v63 = vpop.f32.mrb[25].mxu1  ;;  %1029 = vmax.xlane.f32.xlu1 %v7754_v54 }
 0x3c9   : > { %v7773_v29 = vpop.f32.mrb[26].mxu1 }
 0x3ca   : > { %v7775_v32 = vpop.f32.mrb[27].mxu1 }
 0x3cc   : > { %5961 = vmatmul.mubr.msk.bf16.gmra.mrb[132].mxu1 %vm895_vm0, %v7548_v9  ;;  %1025 = vmax.xlane.f32.xlu1 %v7756_v59 }
 0x3cd   : > { %5964 = vmatprep.mubr.msk.bf16.mxu1 %vm895_vm0, %v7590_v60 }
 0x3cf   : > { %v7782_v50 = vpop.f32.mrb[28].mxu1 }
 0x3d0   : > { %v7784_v19 = vpop.f32.mrb[29].mxu1  ;;  %1031 = vmax.xlane.f32.xlu1 %v7759_v8 }
 0x3d1   : > { %v7787_v34 = vpop.f32.mrb[30].mxu1 }
 0x3d2   : > { %v7789_v47 = vpop.f32.mrb[31].mxu1 }
 0x3d4   : > { %5965 = vmatmul.mubr.msk.bf16.gmra.mrb[136].mxu1 %vm895_vm0, %v7658_v2  ;;  %1027 = vmax.xlane.f32.xlu1 %v7761_v24 }
 0x3d5   : > { %5968 = vmatprep.mubr.msk.bf16.mxu1 %vm895_vm0, %v7618_v36 }
 0x3d7   : > { %v7796_v9 = vpop.f32.mrb[32].mxu1 }
 0x3d8   : > { %v7798_v49 = vpop.f32.mrb[33].mxu1  ;;  %1440 = vmax.xlane.f32.xlu0 %v7796_v9  ;;  %1037 = vmax.xlane.f32.xlu1 %v7768_v27 }
 0x3d9   : > { %v7802_v58 = vpop.f32.mrb[34].mxu1 }
 0x3da   : > { %v7804_v60 = vpop.f32.mrb[35].mxu1 }
 0x3dc   : > { %5969 = vmatmul.mubr.msk.bf16.gmra.mrb[140].mxu1 %vm895_vm0, %v7604_v23  ;;  %1436 = vmax.xlane.f32.xlu0 %v7798_v49 }
 0x3dd   : > { %1033 = vmax.xlane.f32.xlu1 %v7770_v63 }
 0x3df   : > { %v7810_v5 = vpop.f32.mrb[36].mxu1 }
 0x3e0   : > { %v7812_v7 = vpop.f32.mrb[37].mxu1  ;;  %1448 = vmax.xlane.f32.xlu0 %v7810_v5 }
 0x3e1   : > { %1039 = vmax.xlane.f32.xlu1 %v7773_v29  ;;  %v7816_v16 = vpop.f32.mrb[38].mxu1 }
 0x3e2   : > { %v7818_v18 = vpop.f32.mrb[39].mxu1 }
 0x3e4   : > { %1444 = vmax.xlane.f32.xlu0 %v7812_v7 }
 0x3e5   : > { %1035 = vmax.xlane.f32.xlu1 %v7775_v32 }
 0x3e7   : > { %v7822_v21 = vpop.f32.mrb[40].mxu1 }
 0x3e8   : > { %v7824_v23 = vpop.f32.mrb[41].mxu1  ;;  %1456 = vmax.xlane.f32.xlu0 %v7822_v21 }
 0x3e9   : > { %1045 = vmax.xlane.f32.xlu1 %v7782_v50  ;;  %v7828_v26 = vpop.f32.mrb[42].mxu1 }
 0x3ea   : > { %v7830_v28 = vpop.f32.mrb[43].mxu1 }
 0x3ec   : > { %1452 = vmax.xlane.f32.xlu0 %v7824_v23 }
 0x3ed   : > { %1041 = vmax.xlane.f32.xlu1 %v7784_v19 }
 0x3ef   : > { %v7834_v31 = vpop.f32.mrb[44].mxu1 }
 0x3f0   : > { %v7836_v33 = vpop.f32.mrb[45].mxu1  ;;  %1464 = vmax.xlane.f32.xlu0 %v7834_v31 }
 0x3f1   : > { %1047 = vmax.xlane.f32.xlu1 %v7787_v34  ;;  %v7840_v36 = vpop.f32.mrb[46].mxu1 }
 0x3f2   : > { %v7842_v37 = vpop.f32.mrb[47].mxu1 }
 0x3f4   : > { %1460 = vmax.xlane.f32.xlu0 %v7836_v33 }
 0x3f5   : > { %1043 = vmax.xlane.f32.xlu1 %v7789_v47 }
 0x3f7   : > { %v7846_v38 = vpop.f32.mrb[48].mxu1 }
 0x3f8   : > { %v7848_v53 = vpop.f32.mrb[49].mxu1  ;;  %1466 = vmax.xlane.f32.xlu0 %v7840_v36 }
 0x3f9   : > { %1442 = vmax.xlane.f32.xlu1 %v7802_v58  ;;  %v7852_v44 = vpop.f32.mrb[50].mxu1 }
 0x3fa   : > { %v7854_v40 = vpop.f32.mrb[51].mxu1 }
 0x3fc   : > { %1946 = vmax.xlane.f32.xlu0 %v7854_v40 }
 0x3fd   : > { %1438 = vmax.xlane.f32.xlu1 %v7804_v60 }
 0x3ff   : > { %v7858_v57 = vpop.f32.mrb[52].mxu1 }
 0x400   : > { %10137 = vst [vmem:[#allocation32_spill] sm:$0xff] %v7858_v57  ;;  %v7860_v0 = vpop.f32.mrb[53].mxu1 }
 0x401   : > { %10138 = vst [vmem:[#allocation33_spill] sm:$0xff] %v7860_v0  ;;  %1450 = vmax.xlane.f32.xlu1 %v7816_v16  ;;  %v7863_v55 = vpop.f32.mrb[54].mxu1  ;;  %1952 = vmax.xlane.f32.xlu0 %v7860_v0 }
 0x402   : > { %10139 = vst [vmem:[#allocation34_spill] sm:$0xff] %v7863_v55  ;;  %v7866_v4 = vpop.f32.mrb[55].mxu1 }
 0x403   : > { %10140 = vst [vmem:[#allocation35_spill] sm:$0xff] %v7866_v4 }
 0x405   : > { %1446 = vmax.xlane.f32.xlu1 %v7818_v18 }
 0x407   : > { %v7869_v20 = vpop.f32.mrb[56].mxu1 }
 0x408   : > { %10141 = vst [vmem:[#allocation36_spill] sm:$0xff] %v7869_v20  ;;  %v7871_v2 = vpop.f32.mrb[57].mxu1 }
 0x409   : > { %10142 = vst [vmem:[#allocation37_spill] sm:$0xff] %v7871_v2  ;;  %1458 = vmax.xlane.f32.xlu1 %v7828_v26  ;;  %v7874_v15 = vpop.f32.mrb[58].mxu1 }
 0x40a   : > { %10143 = vst [vmem:[#allocation38_spill] sm:$0xff] %v7874_v15  ;;  %v7876_v13 = vpop.f32.mrb[59].mxu1  ;;  %1966 = vmax.xlane.f32.xlu0 %v7874_v15 }
 0x40b   : > { %10144 = vst [vmem:[#allocation39_spill] sm:$0xff] %v7876_v13 }
 0x40d   : > { %1454 = vmax.xlane.f32.xlu1 %v7830_v28 }
 0x40e   : > { %1962 = vmax.xlane.f32.xlu0 %v7876_v13 }
 0x40f   : > { %v7881_v42 = vpop.f32.mrb[60].mxu1 }
 0x410   : > { %10145 = vst [vmem:[#allocation40_spill] sm:$0xff] %v7881_v42  ;;  %v7883_v51 = vpop.f32.mrb[61].mxu1 }
 0x411   : > { %10146 = vst [vmem:[#allocation41_spill] sm:$0xff] %v7883_v51  ;;  %1462 = vmax.xlane.f32.xlu1 %v7842_v37  ;;  %v7886_v52 = vpop.f32.mrb[62].mxu1 }
 0x412   : > { %10147 = vst [vmem:[#allocation42_spill] sm:$0xff] %v7886_v52  ;;  %v7888_v41 = vpop.f32.mrb[63].mxu1  ;;  %1974 = vmax.xlane.f32.xlu0 %v7886_v52  ;;  %v7927_v52 = vpop.permute.xlu1 %1600 }
 0x413   : > { %10148 = vst [vmem:[#allocation43_spill] sm:$0xff] %v7888_v41 }
 0x415   : > { %1948 = vmax.xlane.f32.xlu1 %v7846_v38 }
 0x416   : > { %1970 = vmax.xlane.f32.xlu0 %v7888_v41 }
 0x417   : > { %v7895_v56 = vpop.f32.mrb[64].mxu1 }
 0x418   : > { %10149 = vst [vmem:[#allocation44_spill] sm:$0xff] %v7895_v56  ;;  %v7897_v43 = vpop.f32.mrb[65].mxu1 }
 0x419   : > { %10150 = vst [vmem:[#allocation45_spill] sm:$0xff] %v7897_v43  ;;  %1944 = vmax.xlane.f32.xlu1 %v7848_v53  ;;  %v7900_v6 = vpop.f32.mrb[66].mxu1 }
 0x41a   : > { %10151 = vst [vmem:[#allocation46_spill] sm:$0xff] %v7900_v6  ;;  %v7902_v10 = vpop.f32.mrb[67].mxu1  ;;  %2458 = vmax.xlane.f32.xlu0 %v7900_v6 }
 0x41b   : > { %10152 = vst [vmem:[#allocation47_spill] sm:$0xff] %v7902_v10 }
 0x41d   : > { %1950 = vmax.xlane.f32.xlu1 %v7852_v44 }
 0x41e   : > { %2454 = vmax.xlane.f32.xlu0 %v7902_v10 }
 0x41f   : > { %v7909_v12 = vpop.f32.mrb[68].mxu1 }
 0x420   : > { %10153 = vst [vmem:[#allocation48_spill] sm:$0xff] %v7909_v12  ;;  %v7911_v46 = vpop.f32.mrb[69].mxu1 }
 0x421   : > { %10154 = vst [vmem:[#allocation49_spill] sm:$0xff] %v7911_v46  ;;  %1956 = vmax.xlane.f32.xlu1 %v7858_v57  ;;  %v7914_v14 = vpop.f32.mrb[70].mxu1 }
 0x422   : > { %10155 = vst [vmem:[#allocation50_spill] sm:$0xff] %v7914_v14  ;;  %v7916_v17 = vpop.f32.mrb[71].mxu1  ;;  %2466 = vmax.xlane.f32.xlu0 %v7914_v14  ;;  %v7935_v14 = vpop.permute.xlu1 %2108 }
 0x423   : > { %10156 = vst [vmem:[#allocation51_spill] sm:$0xff] %v7916_v17 }
 0x425   : > { %1958 = vmax.xlane.f32.xlu1 %v7863_v55 }
 0x426   : > { %2462 = vmax.xlane.f32.xlu0 %v7916_v17  ;;  %v7946_v55 = vpop.permute.xlu1 %1602 }
 0x427   : > { %v7923_v6 = vpop.f32.mrb[72].mxu1 }
 0x428   : > { %10157 = vst [vmem:[#allocation52_spill] sm:$0xff] %v7923_v6  ;;  %v7925_v10 = vpop.f32.mrb[73].mxu1 }
 0x429   : > { %10158 = vst [vmem:[#allocation53_spill] sm:$0xff] %v7925_v10  ;;  %1954 = vmax.xlane.f32.xlu1 %v7866_v4  ;;  %v7930_v41 = vpop.f32.mrb[74].mxu1 }
 0x42a   : > { %v7932_v15 = vpop.f32.mrb[75].mxu1 }
 0x42d   : > { %1964 = vmax.xlane.f32.xlu1 %v7869_v20 }
 0x42f   : > { %v7937_v13 = vpop.f32.mrb[76].mxu1 }
 0x430   : > { %10159 = vst [vmem:[#allocation54_spill] sm:$0xff] %v7937_v13  ;;  %v7939_v57 = vpop.f32.mrb[77].mxu1 }
 0x431   : > { %10160 = vst [vmem:[#allocation55_spill] sm:$0xff] %v7939_v57  ;;  %1960 = vmax.xlane.f32.xlu1 %v7871_v2  ;;  %v7942_v17 = vpop.f32.mrb[78].mxu1  ;;  %v7958_v57 = vpop.permute.xlu1 %2604 }
 0x432   : > { %10161 = vst [vmem:[#allocation56_spill] sm:$0xff] %v7942_v17  ;;  %v7944_v6 = vpop.f32.mrb[79].mxu1 }
 0x433   : > { %10162 = vst [vmem:[#allocation57_spill] sm:$0xff] %v7944_v6 }
 0x435   : > { %1972 = vmax.xlane.f32.xlu1 %v7881_v42  ;;  %v7965_v2 = vpop.permute.xlu1 %2608 }
 0x437   : > { %v7949_v4 = vpop.f32.mrb[80].mxu1 }
 0x438   : > { %10163 = vst [vmem:[#allocation58_spill] sm:$0xff] %v7949_v4  ;;  %v7951_v0 = vpop.f32.mrb[81].mxu1 }
 0x439   : > { %10164 = vst [vmem:[#allocation59_spill] sm:$0xff] %v7951_v0  ;;  %1968 = vmax.xlane.f32.xlu1 %v7883_v51  ;;  %v7954_v20 = vpop.f32.mrb[82].mxu1 }
 0x43a   : > { %10165 = vst [vmem:[#allocation60_spill] sm:$0xff] %v7954_v20  ;;  %v7956_v13 = vpop.f32.mrb[83].mxu1 }
 0x43b   : > { %10166 = vst [vmem:[#allocation61_spill] sm:$0xff] %v7956_v13 }
 0x43d   : > { %2456 = vmax.xlane.f32.xlu1 %v7895_v56 }
 0x43f   : > { %v7961_v17 = vpop.f32.mrb[84].mxu1 }
 0x440   : > { %10167 = vst [vmem:[#allocation62_spill] sm:$0xff] %v7961_v17  ;;  %v7963_v6 = vpop.f32.mrb[85].mxu1 }
 0x441   : > { %10168 = vst [vmem:[#allocation63_spill] sm:$0xff] %v7963_v6  ;;  %2452 = vmax.xlane.f32.xlu1 %v7897_v43  ;;  %v7968_v4 = vpop.f32.mrb[86].mxu1 }
 0x442   : > { %10169 = vst [vmem:[#allocation64_spill] sm:$0xff] %v7968_v4  ;;  %v7970_v0 = vpop.f32.mrb[87].mxu1 }
 0x443   : > { %10170 = vst [vmem:[#allocation65_spill] sm:$0xff] %v7970_v0 }
 0x445   : > { %2464 = vmax.xlane.f32.xlu1 %v7909_v12  ;;  %v1022_v20 = vpop.xlane.xlu1 %1021 }
 0x446   : > { %v1051_v13 = vsub.f32 %v7740_v35, %v1022_v20 }
 0x447   : > { %v7974_v51 = vpop.f32.mrb[88].mxu1 }
 0x448   : > { %10171 = vst [vmem:[#allocation66_spill] sm:$0xff] %v7974_v51  ;;  %v1069_v56 = vmul.f32 1.442695, %v1051_v13  ;;  %v7976_v42 = vpop.f32.mrb[89].mxu1 }
 0x449   : > { %10172 = vst [vmem:[#allocation67_spill] sm:$0xff] %v7976_v42  ;;  %2460 = vmax.xlane.f32.xlu1 %v7911_v46  ;;  %v7979_v17 = vpop.f32.mrb[90].mxu1  ;;  %v1018_v6 = vpop.xlane.xlu1 %1017 }
 0x44a   : > { %10173 = vst [vmem:[#allocation68_spill] sm:$0xff] %v7979_v17  ;;  %6209 = vpow2.f32 %v1069_v56  ;;  %v1049_v4 = vsub.f32 %v7742_v45, %v1018_v6  ;;  %v7982_v43 = vpop.f32.mrb[91].mxu1  ;;  %v7992_v56 = vpop.permute.xlu0 %2106 }
 0x44b   : > { %10174 = vst [vmem:[#allocation69_spill] sm:$0xff] %v7982_v43 }
 0x44c   : > { %v1065_v0 = vmul.f32 1.442695, %v1049_v4 }
 0x44d   : > { %2468 = vmax.xlane.f32.xlu1 %v7925_v10  ;;  %v1024_v12 = vpop.xlane.xlu1 %1023 }
 0x44e   : > { %6211 = vpow2.f32 %v1065_v0  ;;  %v1052_v35 = vsub.f32 %v7745_v25, %v1024_v12 }
 0x44f   : > { %v7986_v20 = vpop.f32.mrb[92].mxu1 }
 0x450   : > { %10175 = vst [vmem:[#allocation70_spill] sm:$0xff] %v7986_v20  ;;  %v1071_v13 = vmul.f32 1.442695, %v1052_v35  ;;  %v7988_v51 = vpop.f32.mrb[93].mxu1  ;;  %v8000_v20 = vpop.permute.xlu0 %2110 }
 0x451   : > { %10176 = vst [vmem:[#allocation71_spill] sm:$0xff] %v7988_v51  ;;  %v7990_v42 = vpop.f32.mrb[94].mxu1  ;;  %v1020_v17 = vpop.xlane.xlu1 %1019 }
 0x452   : > { %10177 = vst [vmem:[#allocation72_spill] sm:$0xff] %v7990_v42  ;;  %6213 = vpow2.f32 %v1071_v13  ;;  %v1050_v45 = vsub.f32 %v7747_v48, %v1020_v17  ;;  %v7995_v4 = vpop.f32.mrb[95].mxu1 }
 0x453   : > { %10178 = vst [vmem:[#allocation73_spill] sm:$0xff] %v7995_v4 }
 0x454   : > { %v6210_v6 = vpop.eup %6209  ;;  %v1067_v43 = vmul.f32 1.442695, %v1050_v45 }
 0x455   : > { %1101 = vadd.xlane.f32.xlu1 %v6210_v6  ;;  %v1030_v0 = vpop.xlane.xlu1 %1029 }
 0x456   : > { %6215 = vpow2.f32 %v1067_v43  ;;  %v1055_v25 = vsub.f32 %v7754_v54, %v1030_v0 }
 0x457   : > { %v7998_v12 = vpop.f32.mrb[96].mxu1 }
 0x458   : > { %10179 = vst [vmem:[#allocation74_spill] sm:$0xff] %v7998_v12  ;;  %v6212_v35 = vpop.eup %6211  ;;  %v1077_v42 = vmul.f32 1.442695, %v1055_v25  ;;  %v8002_v51 = vpop.f32.mrb[97].mxu1 }
 0x459   : > { %10180 = vst [vmem:[#allocation75_spill] sm:$0xff] %v8002_v51  ;;  %v8004_v13 = vpop.f32.mrb[98].mxu1  ;;  %1097 = vadd.xlane.f32.xlu0 %v6212_v35  ;;  %v1026_v48 = vpop.xlane.xlu1 %1025 }
 0x45a   : > { %10181 = vst [vmem:[#allocation76_spill] sm:$0xff] %v8004_v13  ;;  %6217 = vpow2.f32 %v1077_v42  ;;  %v1053_v17 = vsub.f32 %v7756_v59, %v1026_v48  ;;  %v8007_v45 = vpop.f32.mrb[99].mxu1  ;;  %v8010_v25 = vpop.permute.xlu0 %2606 }
 0x45c   : > { %v6214_v43 = vpop.eup %6213  ;;  %v1073_v4 = vmul.f32 1.442695, %v1053_v17 }
 0x45d   : > { %1103 = vadd.xlane.f32.xlu1 %v6214_v43  ;;  %v1032_v54 = vpop.xlane.xlu1 %1031  ;;  %v1146_v0 = vpack.c.bf16 %v6214_v43, %v6210_v6 }
 0x45e   : > { %6219 = vpow2.f32 %v1073_v4  ;;  %v1056_v12 = vsub.f32 %v7759_v8, %v1032_v54  ;;  %v8021_v43 = vpop.permute.xlu0 %2610 }
 0x45f   : > { %v8012_v51 = vpop.f32.mrb[100].mxu1 }
 0x460   : > { %v6216_v13 = vpop.eup %6215  ;;  %v1079_v10 = vmul.f32 1.442695, %v1056_v12  ;;  %v8014_v46 = vpop.f32.mrb[101].mxu1 }
 0x461   : > { %v8016_v42 = vpop.f32.mrb[102].mxu1  ;;  %1099 = vadd.xlane.f32.xlu1 %v6216_v13  ;;  %v1028_v59 = vpop.xlane.xlu1 %1027  ;;  %v1145_v48 = vpack.c.bf16 %v6216_v13, %v6212_v35 }
 0x462   : > { %6221 = vpow2.f32 %v1079_v10  ;;  %v1054_v17 = vsub.f32 %v7761_v24, %v1028_v59  ;;  %v8019_v6 = vpop.f32.mrb[103].mxu1 }
 0x463   : > { %5638 = vmatprep.mubr.bf16.mxu0 %v1145_v48 }
 0x464   : > { %v6218_v8 = vpop.eup %6217  ;;  %v1075_v4 = vmul.f32 1.442695, %v1054_v17  ;;  %5639 = vmatmul.mubr.bf16.vlgmr.msra.gmra.mrb[32].mxu0 %v1146_v0 }
 0x465   : > { %5673 = vmatpush3.bf16.msra.mxu0 %v7523_v62  ;;  %1109 = vadd.xlane.f32.xlu1 %v6218_v8  ;;  %v1038_v12 = vpop.xlane.xlu1 %1037  ;;  %v8030_v59 = vpop.xlane.xlu0 %1440 }
 0x466   : > { %6223 = vpow2.f32 %v1075_v4  ;;  %v1059_v54 = vsub.f32 %v7768_v27, %v1038_v12  ;;  %5674 = vmatprep.subr.bf16.mxu0 %v7560_v22 }
 0x467   : > { %v8026_v10 = vpop.f32.mrb[104].mxu1 }
 0x468   : > { %10182 = vst [vmem:[#allocation77_spill] sm:$0xff] %v8026_v10  ;;  %v6220_v24 = vpop.eup %6219  ;;  %v1085_v35 = vmul.f32 1.442695, %v1059_v54  ;;  %v8028_v13 = vpop.f32.mrb[105].mxu1 }
 0x469   : > { %5675 = vmatpush3.bf16.msra.mxu0 %v7560_v22  ;;  %v8033_v0 = vpop.f32.mrb[106].mxu1  ;;  %1105 = vadd.xlane.f32.xlu1 %v6220_v24  ;;  %v8041_v22 = vpop.xlane.xlu0 %1436 }
 0x46a   : > { %10183 = vst [vmem:[#allocation78_spill] sm:$0xff] %v8033_v0  ;;  %v1034_v62 = vpop.xlane.xlu1 %1033  ;;  %5676 = vmatprep.subr.bf16.mxu0 %v7698_v3  ;;  %v8036_v48 = vpop.f32.mrb[107].mxu1  ;;  %6225 = vpow2.f32 %v1085_v35 }
 0x46b   : > { %10184 = vst [vmem:[#allocation79_spill] sm:$0xff] %v8036_v48  ;;  %v1057_v27 = vsub.f32 %v7770_v63, %v1034_v62 }
 0x46c   : > { %v6222_v17 = vpop.eup %6221 }
 0x46d   : > { %v1081_v4 = vmul.f32 1.442695, %v1057_v27  ;;  %5677 = vmatpush3.bf16.msra.mxu0 %v7698_v3  ;;  %1111 = vadd.xlane.f32.xlu1 %v6222_v17  ;;  %v1148_v12 = vpack.c.bf16 %v6222_v17, %v6218_v8 }
 0x46e   : > { %v1040_v54 = vpop.xlane.xlu1 %1039  ;;  %5678 = vmatprep.subr.bf16.mxu0 %v7893_v1 }
 0x46f   : > { %6227 = vpow2.f32 %v1081_v4  ;;  %v1060_v10 = vsub.f32 %v7773_v29, %v1040_v54  ;;  %v8044_v0 = vpop.f32.mrb[108].mxu1  ;;  %v8055_v4 = vpop.xlane.xlu0 %1448 }
 0x470   : > { %v6224_v48 = vpop.eup %6223  ;;  %v8046_v35 = vpop.f32.mrb[109].mxu1 }
 0x471   : > { %v1087_v63 = vmul.f32 1.442695, %v1060_v10  ;;  %5679 = vmatpush3.bf16.msra.mxu0 %v7893_v1  ;;  %v8049_v62 = vpop.f32.mrb[110].mxu1  ;;  %1107 = vadd.xlane.f32.xlu1 %v6224_v48  ;;  %v1147_v3 = vpack.c.bf16 %v6224_v48, %v6220_v24 }
 0x472   : > { %v1036_v8 = vpop.xlane.xlu1 %1035  ;;  %5680 = vmatprep.subr.bf16.mxu0 %v7624_v39  ;;  %v8052_v27 = vpop.f32.mrb[111].mxu1 }
 0x473   : > { %6229 = vpow2.f32 %v1087_v63  ;;  %v1058_v29 = vsub.f32 %v7775_v32, %v1036_v8  ;;  %5642 = vmatprep.mubr.bf16.mxu0 %v1147_v3  ;;  %v8070_v8 = vpop.xlane.xlu0 %1444 }
 0x474   : > { %5643 = vmatmul.mubr.bf16.gmra.mrb[36].mxu0 %v1148_v12  ;;  %v6226_v17 = vpop.eup %6225 }
 0x475   : > { %v1083_v10 = vmul.f32 1.442695, %v1058_v29  ;;  %5681 = vmatpush3.bf16.msra.mxu0 %v7624_v39  ;;  %1117 = vadd.xlane.f32.xlu1 %v6226_v17 }
 0x476   : > { %v1046_v1 = vpop.xlane.xlu1 %1045  ;;  %5682 = vmatprep.subr.bf16.mxu0 %v7919_v11 }
 0x477   : > { %6231 = vpow2.f32 %v1083_v10  ;;  %v1063_v24 = vsub.f32 %v7782_v50, %v1046_v1  ;;  %v8060_v48 = vpop.f32.mrb[112].mxu1 }
 0x478   : > { %10185 = vst [vmem:[#allocation80_spill] sm:$0xff] %v8060_v48  ;;  %v8062_v54 = vpop.f32.mrb[113].mxu1 }
 0x479   : > { %10186 = vst [vmem:[#allocation81_spill] sm:$0xff] %v8062_v54  ;;  %v6228_v32 = vpop.eup %6227  ;;  %v1093_v63 = vmul.f32 1.442695, %v1063_v24  ;;  %5683 = vmatpush3.bf16.msra.mxu0 %v7919_v11  ;;  %v8065_v12 = vpop.f32.mrb[114].mxu1 }
 0x47a   : > { %10187 = vst [vmem:[#allocation82_spill] sm:$0xff] %v8065_v12  ;;  %1113 = vadd.xlane.f32.xlu1 %v6228_v32  ;;  %v1042_v3 = vpop.xlane.xlu1 %1041  ;;  %5684 = vmatprep.subr.bf16.mxu0 %v7927_v52  ;;  %v8068_v39 = vpop.f32.mrb[115].mxu1 }
 0x47b   : > { %10188 = vst [vmem:[#allocation83_spill] sm:$0xff] %v8068_v39  ;;  %6233 = vpow2.f32 %v1093_v63  ;;  %v1061_v50 = vsub.f32 %v7784_v19, %v1042_v3  ;;  %v8080_v63 = vpop.xlane.xlu0 %1456 }
 0x47d   : > { %v6230_v29 = vpop.eup %6229  ;;  %v1089_v10 = vmul.f32 1.442695, %v1061_v50  ;;  %5685 = vmatpush3.bf16.msra.mxu0 %v7927_v52  ;;  %v10192_v50 = vld [vmem:[#allocation29_spill] sm:$0xff] }
 0x47e   : > { %1119 = vadd.xlane.f32.xlu0 %v6230_v29  ;;  %v1048_v1 = vpop.xlane.xlu1 %1047  ;;  %5686 = vmatprep.subr.bf16.mxu0 %v7946_v55  ;;  %v1150_v11 = vpack.c.bf16 %v6230_v29, %v6226_v17 }
 0x47f   : > { %6235 = vpow2.f32 %v1089_v10  ;;  %v1064_v24 = vsub.f32 %v7787_v34, %v1048_v1  ;;  %v8076_v48 = vpop.f32.mrb[116].mxu1  ;;  %v1468_v1 = vsub.f32 %v7798_v49, %v8041_v22 }
 0x480   : > { %10189 = vst [vmem:[#allocation84_spill] sm:$0xff] %v8076_v48  ;;  %v8078_v12 = vpop.f32.mrb[117].mxu1  ;;  %v1453_v48 = vpop.xlane.xlu0 %1452 }
 0x481   : > { %10190 = vst [vmem:[#allocation85_spill] sm:$0xff] %v8078_v12  ;;  %v6232_v39 = vpop.eup %6231  ;;  %v1095_v19 = vmul.f32 1.442695, %v1064_v24  ;;  %5687 = vmatpush3.bf16.msra.mxu0 %v7946_v55  ;;  %v8083_v3 = vpop.f32.mrb[118].mxu1 }
 0x482   : > { %10191 = vst [vmem:[#allocation86_spill] sm:$0xff] %v8083_v3  ;;  %1115 = vadd.xlane.f32.xlu0 %v6232_v39  ;;  %v1044_v52 = vpop.xlane.xlu1 %1043  ;;  %5722 = vmatprep.subr.bf16.mxu0 %v10192_v50  ;;  %v8086_v17 = vpop.f32.mrb[119].mxu1  ;;  %v1149_v29 = vpack.c.bf16 %v6232_v39, %v6228_v32  ;;  %v1470_v32 = vsub.f32 %v7796_v9, %v8030_v59 }
 0x483   : > { %10193 = vst [vmem:[#allocation29_spill] sm:$0xff] %v8086_v17  ;;  %6237 = vpow2.f32 %v1095_v19  ;;  %v1062_v34 = vsub.f32 %v7789_v47, %v1044_v52  ;;  %v1484_v19 = vmul.f32 1.442695, %v1468_v1 }
 0x484   : > { %5646 = vmatprep.mubr.bf16.mxu0 %v1149_v29  ;;  %v8105_v9 = vpop.xlane.xlu0 %1464 }
 0x485   : > { %v6234_v10 = vpop.eup %6233  ;;  %v1091_v24 = vmul.f32 1.442695, %v1062_v34  ;;  %5647 = vmatmul.mubr.bf16.gmra.mrb[40].mxu0 %v1150_v11  ;;  %v1488_v34 = vmul.f32 1.442695, %v1470_v32 }
 0x486   : > { %1125 = vadd.xlane.f32.xlu0 %v6234_v10  ;;  %v1443_v55 = vpop.xlane.xlu1 %1442 }
 0x487   : > { %6239 = vpow2.f32 %v1091_v24  ;;  %v1471_v3 = vsub.f32 %v7802_v58, %v1443_v55  ;;  %v8092_v12 = vpop.f32.mrb[120].mxu1  ;;  %v1472_v24 = vsub.f32 %v7812_v7, %v8070_v8 }
 0x488   : > { %10194 = vst [vmem:[#allocation87_spill] sm:$0xff] %v8092_v12  ;;  %v8096_v39 = vpop.f32.mrb[121].mxu1  ;;  %6241 = vpow2.f32 %v1484_v19 }
 0x489   : > { %10195 = vst [vmem:[#allocation88_spill] sm:$0xff] %v8096_v39  ;;  %v6236_v47 = vpop.eup %6235  ;;  %v8098_v52 = vpop.f32.mrb[122].mxu1  ;;  %v1490_v49 = vmul.f32 1.442695, %v1471_v3  ;;  %v1492_v7 = vmul.f32 1.442695, %v1472_v24 }
 0x48a   : > { %10196 = vst [vmem:[#allocation89_spill] sm:$0xff] %v8098_v52  ;;  %1121 = vadd.xlane.f32.xlu1 %v6236_v47  ;;  %v1439_v22 = vpop.xlane.xlu1 %1438  ;;  %v8100_v11 = vpop.f32.mrb[123].mxu1 }
 0x48b   : > { %10197 = vst [vmem:[#allocation90_spill] sm:$0xff] %v8100_v11  ;;  %v1469_v29 = vsub.f32 %v7804_v60, %v1439_v22  ;;  %6243 = vpow2.f32 %v1490_v49  ;;  %v1474_v60 = vsub.f32 %v7810_v5, %v8055_v4  ;;  %v1476_v5 = vsub.f32 %v7824_v23, %v1453_v48 }
 0x48d   : > { %v6238_v58 = vpop.eup %6237  ;;  %v1486_v59 = vmul.f32 1.442695, %v1469_v29 }
 0x48e   : > { %1127 = vadd.xlane.f32.xlu0 %v6238_v58  ;;  %v1451_v1 = vpop.xlane.xlu1 %1450  ;;  %v1152_v55 = vpack.c.bf16 %v6238_v58, %v6234_v10  ;;  %v1461_v58 = vpop.xlane.xlu0 %1460 }
 0x48f   : > { %6245 = vpow2.f32 %v1486_v59  ;;  %v1475_v3 = vsub.f32 %v7816_v16, %v1451_v1  ;;  %v8108_v12 = vpop.f32.mrb[124].mxu1  ;;  %v1496_v59 = vmul.f32 1.442695, %v1474_v60 }
 0x490   : > { %10198 = vst [vmem:[#allocation91_spill] sm:$0xff] %v8108_v12  ;;  %6247 = vpow2.f32 %v1488_v34  ;;  %v8112_v32 = vpop.f32.mrb[125].mxu1 }
 0x491   : > { %10199 = vst [vmem:[#allocation92_spill] sm:$0xff] %v8112_v32  ;;  %v6240_v19 = vpop.eup %6239  ;;  %v8114_v8 = vpop.f32.mrb[126].mxu1  ;;  %v1498_v22 = vmul.f32 1.442695, %v1475_v3  ;;  %6249 = vpow2.f32 %v1492_v7 }
 0x492   : > { %10200 = vst [vmem:[#allocation93_spill] sm:$0xff] %v8114_v8  ;;  %1123 = vadd.xlane.f32.xlu0 %v6240_v19  ;;  %v1447_v49 = vpop.xlane.xlu1 %1446  ;;  %v8116_v29 = vpop.f32.mrb[127].mxu1  ;;  %v1151_v10 = vpack.c.bf16 %v6240_v19, %v6236_v47 }
 0x493   : > { %10201 = vst [vmem:[#allocation94_spill] sm:$0xff] %v8116_v29  ;;  %v1473_v16 = vsub.f32 %v7818_v18, %v1447_v49  ;;  %6251 = vpow2.f32 %v1498_v22  ;;  %v8121_v24 = vpop.eup %6241  ;;  %v1478_v18 = vsub.f32 %v7822_v21, %v8080_v63  ;;  %v1467_v60 = vpop.xlane.xlu0 %1466 }
 0x494   : > { %5650 = vmatprep.mubr.bf16.mxu0 %v1151_v10  ;;  %10202 = vst [vmem:[#allocation95_spill] sm:$0xff] %v8121_v24 }
 0x495   : > { %v1494_v4 = vmul.f32 1.442695, %v1473_v16  ;;  %5651 = vmatmul.mubr.bf16.gmra.mrb[44].mxu0 %v1152_v55  ;;  %v8126_v3 = vpop.eup %6243  ;;  %v1500_v55 = vmul.f32 1.442695, %v1476_v5  ;;  %v10210_v16 = vld [vmem:[#allocation25_spill] sm:$0xff] }
 0x496   : > { %2470 = vmax.xlane.f32.xlu0 %v7932_v15  ;;  %v1459_v34 = vpop.xlane.xlu1 %1458  ;;  %10204 = vst [vmem:[#allocation97_spill] sm:$0xff] %v8126_v3  ;;  %v1504_v5 = vmul.f32 1.442695, %v1478_v18 }
 0x497   : > { %6253 = vpow2.f32 %v1494_v4  ;;  %v1479_v1 = vsub.f32 %v7828_v26, %v1459_v34  ;;  %v8124_v47 = vpop.f32.mrb[128].mxu1  ;;  %v1480_v26 = vsub.f32 %v7836_v33, %v1461_v58  ;;  %v1483_v4 = vsub.f32 %v7840_v36, %v1467_v60 }
 0x498   : > { %10203 = vst [vmem:[#allocation96_spill] sm:$0xff] %v8124_v47  ;;  %6255 = vpow2.f32 %v1496_v59  ;;  %v8130_v23 = vpop.f32.mrb[129].mxu1  ;;  %v1482_v36 = vsub.f32 %v7834_v31, %v8105_v9  ;;  %v10219_v9 = vld [vmem:[#allocation30_spill] sm:$0xff] }
 0x499   : > { %10205 = vst [vmem:[#allocation98_spill] sm:$0xff] %v8130_v23  ;;  %v8132_v48 = vpop.eup %6245  ;;  %v8134_v19 = vpop.f32.mrb[130].mxu1  ;;  %v1506_v22 = vmul.f32 1.442695, %v1479_v1  ;;  %6257 = vpow2.f32 %v1500_v55  ;;  %v1508_v58 = vmul.f32 1.442695, %v1480_v26 }
 0x49a   : > { %10206 = vst [vmem:[#allocation99_spill] sm:$0xff] %v8132_v48  ;;  %10207 = vst [vmem:[#allocation100_spill] sm:$0xff] %v8134_v19  ;;  %v8136_v7 = vpop.eup %6247  ;;  %2474 = vmax.xlane.f32.xlu0 %v7930_v41  ;;  %v1455_v49 = vpop.xlane.xlu1 %1454  ;;  %v1564_v21 = vpack.c.bf16 %v8132_v48, %v8121_v24  ;;  %v10283_v23 = vld [vmem:[#allocation63_spill] sm:$0xff] }
 0x49b   : > { %10208 = vst [vmem:[#allocation101_spill] sm:$0xff] %v8136_v7  ;;  %v8140_v10 = vpop.f32.mrb[131].mxu1  ;;  %v1477_v63 = vsub.f32 %v7830_v28, %v1455_v49  ;;  %2612 = vrot.lane.b32.xlu1 %v10210_v16, %s6967_s30  ;;  %v1565_v59 = vpack.c.bf16 %v8126_v3, %v8136_v7  ;;  %6259 = vpow2.f32 %v1506_v22  ;;  %v8151_v1 = vpop.eup %6249 }
 0x49c   : > { %10209 = vst [vmem:[#allocation102_spill] sm:$0xff] %v8140_v10  ;;  %5688 = vmatprep.mubr.bf16.mxu0 %v1564_v21  ;;  %10211 = vst [vmem:[#allocation25_spill] sm:$0xff] %v8151_v1  ;;  %v1947_v28 = vpop.xlane.xlu0 %1946  ;;  %v10282_v10 = vld [vmem:[#allocation58_spill] sm:$0xff] }
 0x49d   : > { %v1502_v33 = vmul.f32 1.442695, %v1477_v63  ;;  %5689 = vmatmul.mubr.bf16.vlgmr.msra.gmra.mrb[48].mxu0 %v1565_v59  ;;  %v8157_v55 = vpop.eup %6251  ;;  %v1977_v63 = vsub.f32 %v7854_v40, %v1947_v28 }
 0x49e   : > { %5723 = vmatpush3.bf16.msra.mxu0 %v10192_v50  ;;  %v1463_v34 = vpop.xlane.xlu1 %1462  ;;  %10213 = vst [vmem:[#allocation104_spill] sm:$0xff] %v8157_v55 }
 0x49f   : > { %6261 = vpow2.f32 %v1502_v33  ;;  %v1481_v49 = vsub.f32 %v7842_v37, %v1463_v34  ;;  %5724 = vmatprep.subr.bf16.mxu0 %v7642_v30  ;;  %v8155_v18 = vpop.f32.mrb[132].mxu1  ;;  %v1514_v37 = vmul.f32 1.442695, %v1483_v4  ;;  %v1512_v34 = vmul.f32 1.442695, %v1482_v36 }
 0x4a0   : > { %10212 = vst [vmem:[#allocation103_spill] sm:$0xff] %v8155_v18  ;;  %6263 = vpow2.f32 %v1504_v5  ;;  %v8161_v60 = vpop.f32.mrb[133].mxu1  ;;  %v1994_v40 = vmul.f32 1.442695, %v1977_v63 }
 0x4a1   : > { %10214 = vst [vmem:[#allocation105_spill] sm:$0xff] %v8161_v60  ;;  %v8163_v50 = vpop.eup %6253  ;;  %v1510_v26 = vmul.f32 1.442695, %v1481_v49  ;;  %v8165_v22 = vpop.f32.mrb[134].mxu1  ;;  %6265 = vpow2.f32 %v1508_v58 }
 0x4a2   : > { %10215 = vst [vmem:[#allocation106_spill] sm:$0xff] %v8163_v50  ;;  %10216 = vst [vmem:[#allocation107_spill] sm:$0xff] %v8165_v22  ;;  %v8167_v21 = vpop.eup %6255  ;;  %5725 = vmatpush3.bf16.msra.mxu0 %v7642_v30  ;;  %v1949_v59 = vpop.xlane.xlu1 %1948  ;;  %v1566_v31 = vpack.c.bf16 %v8163_v50, %v8151_v1  ;;  %v10241_v50 = vld [vmem:[#allocation32_spill] sm:$0xff] }
 0x4a3   : > { %10217 = vst [vmem:[#allocation108_spill] sm:$0xff] %v8167_v21  ;;  %v8171_v5 = vpop.f32.mrb[135].mxu1  ;;  %6267 = vpow2.f32 %v1510_v26  ;;  %5726 = vmatprep.subr.bf16.mxu0 %v10219_v9  ;;  %v1567_v33 = vpack.c.bf16 %v8157_v55, %v8167_v21  ;;  %v1953_v58 = vpop.xlane.xlu0 %1952  ;;  %v1978_v30 = vsub.f32 %v7846_v38, %v1949_v59  ;;  %v10221_v26 = vld [vmem:[#allocation31_spill] sm:$0xff] }
 0x4a4   : > { %10218 = vst [vmem:[#allocation109_spill] sm:$0xff] %v8171_v5  ;;  %5692 = vmatprep.mubr.bf16.mxu0 %v1566_v31  ;;  %6269 = vpow2.f32 %v1514_v37  ;;  %v8180_v28 = vpop.eup %6257  ;;  %v10281_v5 = vld [vmem:[#allocation22_spill] sm:$0xff] }
 0x4a5   : > { %5693 = vmatmul.mubr.bf16.gmra.mrb[52].mxu0 %v1567_v33  ;;  %10220 = vst [vmem:[#allocation30_spill] sm:$0xff] %v8180_v28  ;;  %v8186_v21 = vpop.eup %6259  ;;  %6271 = vpow2.f32 %v1512_v34 }
 0x4a6   : > { %5727 = vmatpush3.bf16.msra.mxu0 %v10219_v9  ;;  %v1945_v4 = vpop.xlane.xlu1 %1944  ;;  %10223 = vst [vmem:[#allocation110_spill] sm:$0xff] %v8186_v21  ;;  %6273 = vpow2.f32 %v1994_v40 }
 0x4a7   : > { %v1976_v49 = vsub.f32 %v7848_v53, %v1945_v4  ;;  %5728 = vmatprep.subr.bf16.mxu0 %v10221_v26  ;;  %v8184_v1 = vpop.f32.mrb[136].mxu1  ;;  %v8192_v63 = vpop.xlane.xlu0 %1966  ;;  %v1996_v53 = vmul.f32 1.442695, %v1978_v30 }
 0x4a8   : > { %10222 = vst [vmem:[#allocation31_spill] sm:$0xff] %v8184_v1  ;;  %v8188_v36 = vpop.f32.mrb[137].mxu1 }
 0x4a9   : > { %10224 = vst [vmem:[#allocation111_spill] sm:$0xff] %v8188_v36  ;;  %v8190_v37 = vpop.eup %6261  ;;  %v1992_v38 = vmul.f32 1.442695, %v1976_v49  ;;  %v8194_v59 = vpop.f32.mrb[138].mxu1 }
 0x4aa   : > { %10225 = vst [vmem:[#allocation112_spill] sm:$0xff] %v8190_v37  ;;  %10226 = vst [vmem:[#allocation113_spill] sm:$0xff] %v8194_v59  ;;  %v8196_v31 = vpop.eup %6263  ;;  %5729 = vmatpush3.bf16.msra.mxu0 %v10221_v26  ;;  %v1951_v9 = vpop.xlane.xlu1 %1950  ;;  %v1568_v34 = vpack.c.bf16 %v8190_v37, %v8180_v28 }
 0x4ab   : > { %10227 = vst [vmem:[#allocation114_spill] sm:$0xff] %v8196_v31  ;;  %v8199_v33 = vpop.f32.mrb[139].mxu1  ;;  %6275 = vpow2.f32 %v1992_v38  ;;  %v1979_v4 = vsub.f32 %v7852_v44, %v1951_v9  ;;  %5730 = vmatprep.subr.bf16.mxu0 %v7905_v61  ;;  %v1569_v49 = vpack.c.bf16 %v8186_v21, %v8196_v31  ;;  %v8207_v55 = vpop.eup %6265 }
 0x4ac   : > { %10228 = vst [vmem:[#allocation115_spill] sm:$0xff] %v8199_v33  ;;  %10229 = vst [vmem:[#allocation116_spill] sm:$0xff] %v8207_v55  ;;  %5696 = vmatprep.mubr.bf16.mxu0 %v1568_v34  ;;  %6277 = vpow2.f32 %v1996_v53  ;;  %v1963_v44 = vpop.xlane.xlu0 %1962  ;;  %v10233_v34 = vld [vmem:[#allocation26_spill] sm:$0xff]  ;;  %v10235_v53 = vld [vmem:[#allocation33_spill] sm:$0xff] }
 0x4ad   : > { %v8209_v40 = vpop.eup %6267  ;;  %v1998_v30 = vmul.f32 1.442695, %v1979_v4  ;;  %5697 = vmatmul.mubr.bf16.gmra.mrb[56].mxu0 %v1569_v49 }
 0x4ae   : > { %10230 = vst [vmem:[#allocation117_spill] sm:$0xff] %v8209_v40  ;;  %5731 = vmatpush3.bf16.msra.mxu0 %v7905_v61  ;;  %v1957_v26 = vpop.xlane.xlu1 %1956  ;;  %v1570_v38 = vpack.c.bf16 %v8209_v40, %v8207_v55  ;;  %v8217_v31 = vpop.eup %6269  ;;  %v1980_v61 = vsub.f32 %v10235_v53, %v1953_v58  ;;  %v10239_v40 = vld [vmem:[#allocation34_spill] sm:$0xff] }
 0x4af   : > { %6279 = vpow2.f32 %v1998_v30  ;;  %5732 = vmatprep.subr.bf16.mxu0 %v7992_v56  ;;  %v8215_v9 = vpop.f32.mrb[140].mxu1  ;;  %10232 = vst [vmem:[#allocation119_spill] sm:$0xff] %v8217_v31  ;;  %v8226_v28 = vpop.eup %6271  ;;  %v1982_v58 = vsub.f32 %v10241_v50, %v1957_v26  ;;  %v10246_v26 = vld [vmem:[#allocation39_spill] sm:$0xff] }
 0x4b0   : > { %10231 = vst [vmem:[#allocation118_spill] sm:$0xff] %v8215_v9  ;;  %2614 = vrot.lane.b32.xlu0 %v10233_v34, %s6967_s30  ;;  %5700 = vmatprep.mubr.bf16.mxu0 %v1570_v38  ;;  %v8221_v4 = vpop.f32.mrb[141].mxu1  ;;  %10237 = vst [vmem:[#allocation120_spill] sm:$0xff] %v8226_v28  ;;  %v1571_v38 = vpack.c.bf16 %v8217_v31, %v8226_v28  ;;  %v8235_v37 = vpop.eup %6273  ;;  %v2000_v48 = vmul.f32 1.442695, %v1980_v61  ;;  %v1985_v61 = vsub.f32 %v10246_v26, %v1963_v44  ;;  %v10249_v44 = vld [vmem:[#allocation37_spill] sm:$0xff] }
 0x4b1   : > { %10234 = vst [vmem:[#allocation26_spill] sm:$0xff] %v8221_v4  ;;  %v8224_v49 = vpop.f32.mrb[142].mxu1  ;;  %10240 = vst [vmem:[#allocation34_spill] sm:$0xff] %v8235_v37  ;;  %v1975_v3 = vpop.xlane.xlu0 %1974  ;;  %v2004_v31 = vmul.f32 1.442695, %v1982_v58  ;;  %v10248_v58 = vld [vmem:[#allocation38_spill] sm:$0xff] }
 0x4b2   : > { %10236 = vst [vmem:[#allocation33_spill] sm:$0xff] %v8224_v49  ;;  %5733 = vmatpush3.bf16.msra.mxu0 %v7992_v56  ;;  %v1959_v30 = vpop.xlane.xlu1 %1958  ;;  %v8229_v55 = vpop.f32.mrb[143].mxu1  ;;  %6281 = vpow2.f32 %v2000_v48  ;;  %v2010_v48 = vmul.f32 1.442695, %v1985_v61  ;;  %v10250_v26 = vld [vmem:[#allocation52_spill] sm:$0xff] }
 0x4b3   : > { %10238 = vst [vmem:[#allocation121_spill] sm:$0xff] %v8229_v55  ;;  %v1983_v21 = vsub.f32 %v10239_v40, %v1959_v30  ;;  %5734 = vmatprep.subr.bf16.mxu0 %v7935_v14  ;;  %v10243_v30 = vld [vmem:[#allocation35_spill] sm:$0xff]  ;;  %v10279_v9 = vld [vmem:[#allocation60_spill] sm:$0xff]  ;;  %v10280_v55 = vld [vmem:[#allocation21_spill] sm:$0xff] }
 0x4b5   : > { %v8238_v53 = vpop.eup %6275  ;;  %5701 = vmatmul.mubr.bf16.gmra.mrb[60].mxu0 %v1571_v38  ;;  %v2006_v56 = vmul.f32 1.442695, %v1983_v21 }
 0x4b6   : > { %10242 = vst [vmem:[#allocation32_spill] sm:$0xff] %v8238_v53  ;;  %5735 = vmatpush3.bf16.msra.mxu0 %v7935_v14  ;;  %v1955_v7 = vpop.xlane.xlu1 %1954  ;;  %v2072_v40 = vpack.c.bf16 %v8235_v37, %v8238_v53  ;;  %v8245_v28 = vpop.eup %6277 }
 0x4b7   : > { %v1981_v24 = vsub.f32 %v10243_v30, %v1955_v7  ;;  %5736 = vmatprep.subr.bf16.mxu0 %v8000_v20  ;;  %10244 = vst [vmem:[#allocation35_spill] sm:$0xff] %v8245_v28  ;;  %6283 = vpow2.f32 %v2006_v56  ;;  %v1971_v7 = vpop.xlane.xlu0 %1970  ;;  %v10247_v30 = vld [vmem:[#allocation36_spill] sm:$0xff] }
 0x4b8   : > { %5738 = vmatprep.mubr.bf16.mxu0 %v2072_v40  ;;  %v1987_v40 = vsub.f32 %v10248_v58, %v8192_v63 }
 0x4b9   : > { %v8247_v50 = vpop.eup %6279  ;;  %v2002_v21 = vmul.f32 1.442695, %v1981_v24 }
 0x4ba   : > { %10245 = vst [vmem:[#allocation122_spill] sm:$0xff] %v8247_v50  ;;  %5737 = vmatpush3.bf16.msra.mxu0 %v8000_v20  ;;  %v1965_v14 = vpop.xlane.xlu1 %1964  ;;  %v2073_v38 = vpack.c.bf16 %v8247_v50, %v8245_v28 }
 0x4bb   : > { %6285 = vpow2.f32 %v2002_v21  ;;  %v1986_v37 = vsub.f32 %v10247_v30, %v1965_v14  ;;  %5772 = vmatprep.subr.bf16.mxu0 %v7958_v57  ;;  %v2014_v21 = vmul.f32 1.442695, %v1987_v40  ;;  %v10251_v14 = vld [vmem:[#allocation43_spill] sm:$0xff]  ;;  %v8262_v50 = vpop.xlane.xlu0 %2458 }
 0x4bc   : > { %6287 = vpow2.f32 %v2004_v31  ;;  %v1989_v30 = vsub.f32 %v10251_v14, %v1971_v7  ;;  %v8265_v31 = vpop.eup %6281  ;;  %v10256_v7 = vld [vmem:[#allocation42_spill] sm:$0xff] }
 0x4bd   : > { %5739 = vmatmul.mubr.bf16.vlgmr.msra.gmra.mrb[64].mxu0 %v2073_v38  ;;  %v2012_v24 = vmul.f32 1.442695, %v1986_v37  ;;  %6289 = vpow2.f32 %v2010_v48  ;;  %10252 = vst [vmem:[#allocation39_spill] sm:$0xff] %v8265_v31  ;;  %v10254_v38 = vld [vmem:[#allocation55_spill] sm:$0xff]  ;;  %v1991_v40 = vsub.f32 %v10256_v7, %v1975_v3 }
 0x4be   : > { %5773 = vmatpush3.bf16.msra.mxu0 %v7958_v57  ;;  %v1961_v20 = vpop.xlane.xlu1 %1960  ;;  %v10253_v57 = vld [vmem:[#allocation40_spill] sm:$0xff] }
 0x4bf   : > { %v1984_v56 = vsub.f32 %v10249_v44, %v1961_v20  ;;  %5774 = vmatprep.subr.bf16.mxu0 %v8010_v25  ;;  %2472 = vmax.xlane.f32.xlu1 %v10250_v26  ;;  %6291 = vpow2.f32 %v2012_v24  ;;  %v2018_v24 = vmul.f32 1.442695, %v1989_v30  ;;  %v2455_v14 = vpop.xlane.xlu0 %2454 }
 0x4c1   : > { %v2008_v63 = vmul.f32 1.442695, %v1984_v56  ;;  %v8270_v58 = vpop.eup %6283 }
 0x4c2   : > { %5775 = vmatpush3.bf16.msra.mxu0 %v8010_v25  ;;  %v1973_v37 = vpop.xlane.xlu1 %1972  ;;  %10255 = vst [vmem:[#allocation36_spill] sm:$0xff] %v8270_v58 }
 0x4c3   : > { %6293 = vpow2.f32 %v2008_v63  ;;  %v1990_v61 = vsub.f32 %v10253_v57, %v1973_v37  ;;  %5776 = vmatprep.subr.bf16.mxu0 %v7965_v2  ;;  %2476 = vmax.xlane.f32.xlu1 %v10254_v38  ;;  %v10259_v63 = vld [vmem:[#allocation41_spill] sm:$0xff]  ;;  %v10260_v57 = vld [vmem:[#allocation47_spill] sm:$0xff] }
 0x4c4   : > { %6295 = vpow2.f32 %v2014_v21  ;;  %v2022_v21 = vmul.f32 1.442695, %v1991_v40 }
 0x4c5   : > { %v8273_v48 = vpop.eup %6285  ;;  %v2020_v25 = vmul.f32 1.442695, %v1990_v61  ;;  %6297 = vpow2.f32 %v2018_v24  ;;  %v2485_v61 = vsub.f32 %v10260_v57, %v2455_v14  ;;  %v10268_v57 = vld [vmem:[#allocation56_spill] sm:$0xff] }
 0x4c6   : > { %10257 = vst [vmem:[#allocation38_spill] sm:$0xff] %v8273_v48  ;;  %v8275_v20 = vpop.eup %6287  ;;  %5777 = vmatpush3.bf16.msra.mxu0 %v7965_v2  ;;  %v1969_v44 = vpop.xlane.xlu1 %1968  ;;  %v2074_v56 = vpack.c.bf16 %v8273_v48, %v8265_v31  ;;  %v10277_v31 = vld [vmem:[#allocation59_spill] sm:$0xff] }
 0x4c7   : > { %10258 = vst [vmem:[#allocation37_spill] sm:$0xff] %v8275_v20  ;;  %v1988_v37 = vsub.f32 %v10259_v63, %v1969_v44  ;;  %5778 = vmatprep.subr.bf16.mxu0 %v8021_v43  ;;  %v2075_v3 = vpack.c.bf16 %v8270_v58, %v8275_v20  ;;  %6299 = vpow2.f32 %v2020_v25  ;;  %v8288_v7 = vpop.eup %6289  ;;  %v2502_v24 = vmul.f32 1.442695, %v2485_v61  ;;  %v10265_v25 = vld [vmem:[#allocation45_spill] sm:$0xff]  ;;  %v8333_v58 = vpop.xlane.xlu0 %2466 }
 0x4c8   : > { %5742 = vmatprep.mubr.bf16.mxu0 %v2074_v56  ;;  %10261 = vst [vmem:[#allocation52_spill] sm:$0xff] %v8288_v7 }
 0x4c9   : > { %v2016_v30 = vmul.f32 1.442695, %v1988_v37  ;;  %5743 = vmatmul.mubr.bf16.gmra.mrb[68].mxu0 %v2075_v3  ;;  %v8290_v44 = vpop.eup %6291 }
 0x4ca   : > { %5779 = vmatpush3.bf16.msra.mxu0 %v8021_v43  ;;  %v8286_v2 = vpop.xlane.xlu1 %2456  ;;  %10262 = vst [vmem:[#allocation43_spill] sm:$0xff] %v8290_v44  ;;  %v10266_v43 = vld [vmem:[#allocation57_spill] sm:$0xff] }
 0x4cb   : > { %6301 = vpow2.f32 %v2016_v30  ;;  %v8335_v28 = vpop.xlane.xlu0 %2462 }
 0x4cc   : > { %6303 = vpow2.f32 %v2022_v21 }
 0x4cd   : > { %v8292_v63 = vpop.eup %6293  ;;  %6305 = vpow2.f32 %v2502_v24 }
 0x4ce   : > { %10263 = vst [vmem:[#allocation40_spill] sm:$0xff] %v8292_v63  ;;  %v8294_v40 = vpop.eup %6295  ;;  %v2453_v56 = vpop.xlane.xlu1 %2452  ;;  %v2076_v14 = vpack.c.bf16 %v8288_v7, %v8292_v63  ;;  %v10270_v63 = vld [vmem:[#allocation27_spill] sm:$0xff] }
 0x4cf   : > { %10264 = vst [vmem:[#allocation55_spill] sm:$0xff] %v8294_v40  ;;  %v2484_v37 = vsub.f32 %v10265_v25, %v2453_v56  ;;  %2478 = vmax.xlane.f32.xlu0 %v10266_v43  ;;  %v2077_v3 = vpack.c.bf16 %v8294_v40, %v8290_v44  ;;  %v8302_v21 = vpop.eup %6297 }
 0x4d0   : > { %5746 = vmatprep.mubr.bf16.mxu0 %v2076_v14  ;;  %10267 = vst [vmem:[#allocation42_spill] sm:$0xff] %v8302_v21 }
 0x4d1   : > { %v2500_v30 = vmul.f32 1.442695, %v2484_v37  ;;  %5747 = vmatmul.mubr.bf16.gmra.mrb[72].mxu0 %v2077_v3  ;;  %v8305_v61 = vpop.eup %6299 }
 0x4d2   : > { %10269 = vst [vmem:[#allocation41_spill] sm:$0xff] %v8305_v61  ;;  %v8313_v7 = vpop.xlane.xlu1 %2464 }
 0x4d3   : > { %6307 = vpow2.f32 %v2500_v30  ;;  %2482 = vmax.xlane.f32.xlu0 %v10268_v57 }
 0x4d4   : > { %2616 = vrot.lane.b32.xlu1 %v10270_v63, %s6967_s30 }
 0x4d5   : > { %v8309_v56 = vpop.eup %6301 }
 0x4d6   : > { %10271 = vst [vmem:[#allocation47_spill] sm:$0xff] %v8309_v56  ;;  %v8311_v25 = vpop.eup %6303  ;;  %v2078_v14 = vpack.c.bf16 %v8302_v21, %v8309_v56  ;;  %v8321_v3 = vpop.xlane.xlu1 %2460  ;;  %v10275_v56 = vld [vmem:[#allocation28_spill] sm:$0xff] }
 0x4d7   : > { %10272 = vst [vmem:[#allocation45_spill] sm:$0xff] %v8311_v25  ;;  %v2079_v24 = vpack.c.bf16 %v8311_v25, %v8305_v61  ;;  %v8319_v37 = vpop.eup %6305 }
 0x4d8   : > { %5750 = vmatprep.mubr.bf16.mxu0 %v2078_v14  ;;  %10273 = vst [vmem:[#allocation57_spill] sm:$0xff] %v8319_v37 }
 0x4d9   : > { %5751 = vmatmul.mubr.bf16.gmra.mrb[76].mxu0 %v2079_v24  ;;  %v10276_v24 = vld [vmem:[#allocation54_spill] sm:$0xff] }
 0x4da   : > { %v8327_v40 = vpop.xlane.xlu1 %2468 }
 0x4dd   : > { %v8323_v30 = vpop.eup %6307 }
 0x4de   : > { %10274 = vst [vmem:[#allocation56_spill] sm:$0xff] %v8323_v30  ;;  %v2580_v44 = vpack.c.bf16 %v8319_v37, %v8323_v30  ;;  %v10278_v37 = vld [vmem:[#allocation61_spill] sm:$0xff] }
 0x4e0   : > { %5788 = vmatprep.mubr.bf16.mxu0 %v2580_v44 }
 0x4e2   : > { %v1102_v20 = vpop.xlane.xlu1 %1101 }
 0x4e3   : > { %6309 = vrcp.f32 %v1102_v20 }
 0x4e6   : > { %v1098_v44 = vpop.xlane.xlu0 %1097 }
 0x4e7   : > { %6311 = vrcp.f32 %v1098_v44 }
 0x4e9   : > { %2618 = vrot.lane.b32.xlu0 %v10275_v56, %s6967_s30 }
 0x4ea   : > { %v1104_v21 = vpop.xlane.xlu1 %1103 }
 0x4eb   : > { %6313 = vrcp.f32 %v1104_v21 }
 0x4ee   : > { %v1100_v61 = vpop.xlane.xlu1 %1099 }
 0x4ef   : > { %6315 = vrcp.f32 %v1100_v61 }
 0x4f2   : > { %v1110_v14 = vpop.xlane.xlu1 %1109 }
 0x4f3   : > { %6317 = vrcp.f32 %v1110_v14 }
 0x4f6   : > { %v1106_v25 = vpop.xlane.xlu1 %1105 }
 0x4f7   : > { %6319 = vrcp.f32 %v1106_v25 }
 0x4f8   : > { %2480 = vmax.xlane.f32.xlu1 %v10276_v24 }
 0x4fa   : > { %v1112_v48 = vpop.xlane.xlu1 %1111 }
 0x4fb   : > { %6321 = vrcp.f32 %v1112_v48 }
 0x4fc   : > { %2960 = vmax.xlane.f32.xlu1 %v10277_v31 }
 0x4fe   : > { %v1108_v30 = vpop.xlane.xlu1 %1107 }
 0x4ff   : > { %6323 = vrcp.f32 %v1108_v30 }
 0x502   : > { %v8341_v49 = vpop.xlane.xlu1 %1117 }
 0x503   : > { %6325 = vrcp.f32 %v8341_v49 }
 0x507   : > { %v1114_v1 = vpop.xlane.xlu1 %1113 }
 0x508   : > { %2962 = vmax.xlane.f32.xlu0 %v10278_v37  ;;  %6327 = vrcp.f32 %v1114_v1 }
 0x50b   : > { %v8338_v53 = vpop.xlane.xlu0 %1119 }
 0x50c   : > { %2966 = vmax.xlane.f32.xlu0 %v10279_v9  ;;  %6329 = vrcp.f32 %v8338_v53 }
 0x50d   : > { %3112 = vrot.lane.b32.xlu1 %v10280_v55, %s6969_s7 }
 0x50f   : > { %v8345_v4 = vpop.xlane.xlu0 %1115 }
 0x510   : > { %6331 = vrcp.f32 %v8345_v4 }
 0x513   : > { %v8347_v59 = vpop.xlane.xlu0 %1125 }
 0x517   : > { %v8349_v33 = vpop.xlane.xlu1 %1121 }
 0x51b   : > { %v8351_v36 = vpop.xlane.xlu0 %1127  ;;  %v2613_v18 = vpop.permute.xlu1 %2612 }
 0x51c   : > { %5780 = vmatprep.subr.bf16.mxu0 %v2613_v18 }
 0x51d   : > { %5781 = vmatpush3.bf16.msra.mxu0 %v2613_v18  ;;  %v6310_v18 = vpop.eup %6309 }
 0x51e   : > { %v6312_v8 = vpop.eup %6311 }
 0x51f   : > { %v8353_v22 = vpop.xlane.xlu0 %1123  ;;  %v6314_v52 = vpop.eup %6313 }
 0x520   : > { %v6316_v17 = vpop.eup %6315 }
 0x522   : > { %3114 = vrot.lane.b32.xlu0 %v10281_v5, %s6969_s7 }
 0x523   : > { %v8357_v60 = vpop.xlane.xlu0 %2470 }
 0x527   : > { %v8359_v47 = vpop.xlane.xlu0 %2474 }
 0x52b   : > { %v2615_v19 = vpop.permute.xlu0 %2614 }
 0x52c   : > { %5782 = vmatprep.subr.bf16.mxu0 %v2615_v19 }
 0x52d   : > { %5783 = vmatpush3.bf16.msra.mxu0 %v2615_v19 }
 0x531   : > { %2964 = vmax.xlane.f32.xlu1 %v10282_v10 }
 0x535   : > { %2968 = vmax.xlane.f32.xlu1 %v10283_v23 }
 0x537   : > { %v5640_v12 = vpop.f32.mrb[32].mxu0 }
 0x538   : > { %v1260_v29 = vmul.f32 %v6310_v18, %v5640_v12  ;;  %v1195_v32 = vpop.f32.mrb[33].mxu0  ;;  %v10284_v12 = vld [vmem:[#allocation65_spill] sm:$0xff] }
 0x539   : > { %v1258_v11 = vmul.f32 %v6312_v8, %v1195_v32  ;;  %v5641_v39 = vpop.f32.mrb[34].mxu0  ;;  %v10285_v32 = vld [vmem:[#allocation64_spill] sm:$0xff]  ;;  %v10286_v8 = vld [vmem:[#allocation23_spill] sm:$0xff] }
 0x53a   : > { %1276 = vst.msk [vmem:[#allocation4 + $0x10] sm:$0xff] %vm895_vm0, %v1260_v29  ;;  %v1261_v20 = vmul.f32 %v6314_v52, %v5641_v39  ;;  %v1198_v19 = vpop.f32.mrb[35].mxu0  ;;  %v6318_v39 = vpop.eup %6317 }
 0x53b   : > { %1274 = vst.msk [vmem:[#allocation4] sm:$0xff] %vm895_vm0, %v1258_v11  ;;  %v1259_v21 = vmul.f32 %v6316_v17, %v1198_v19  ;;  %v6320_v29 = vpop.eup %6319 }
 0x53c   : > { %1277 = vst.msk [vmem:[#allocation4 + $0x18] sm:$0xff] %vm895_vm0, %v1261_v20  ;;  %v6322_v61 = vpop.eup %6321 }
 0x53d   : > { %1275 = vst.msk [vmem:[#allocation4 + $0x8] sm:$0xff] %vm895_vm0, %v1259_v21  ;;  %v6324_v18 = vpop.eup %6323  ;;  %v10287_v21 = vld [vmem:[#allocation44_spill] sm:$0xff] }
 0x541   : > { %2970 = vmax.xlane.f32.xlu0 %v10284_v12 }
 0x545   : > { %2974 = vmax.xlane.f32.xlu0 %v10285_v32 }
 0x546   : > { %3116 = vrot.lane.b32.xlu1 %v10286_v8, %s6969_s7 }
 0x547   : > { %v5644_v52 = vpop.f32.mrb[36].mxu0 }
 0x548   : > { %v1264_v11 = vmul.f32 %v6318_v39, %v5644_v52  ;;  %v1211_v17 = vpop.f32.mrb[37].mxu0  ;;  %v2486_v39 = vsub.f32 %v10287_v21, %v8286_v2  ;;  %v10288_v52 = vld [vmem:[#allocation49_spill] sm:$0xff] }
 0x549   : > { %v1262_v44 = vmul.f32 %v6320_v29, %v1211_v17  ;;  %v5645_v14 = vpop.f32.mrb[38].mxu0  ;;  %v2488_v29 = vsub.f32 %v10288_v52, %v8321_v3  ;;  %v10291_v3 = vld [vmem:[#allocation48_spill] sm:$0xff] }
 0x54a   : > { %1280 = vst.msk [vmem:[#allocation4 + $0x30] sm:$0xff] %vm895_vm0, %v1264_v11  ;;  %v1265_v48 = vmul.f32 %v6322_v61, %v5645_v14  ;;  %v1214_v25 = vpop.f32.mrb[39].mxu0  ;;  %v10289_v11 = vld [vmem:[#allocation46_spill] sm:$0xff]  ;;  %v2504_v1 = vmul.f32 1.442695, %v2486_v39  ;;  %v6326_v14 = vpop.eup %6325 }
 0x54b   : > { %1278 = vst.msk [vmem:[#allocation4 + $0x20] sm:$0xff] %vm895_vm0, %v1262_v44  ;;  %v1263_v30 = vmul.f32 %v6324_v18, %v1214_v25  ;;  %v2487_v17 = vsub.f32 %v10289_v11, %v8262_v50  ;;  %v10290_v44 = vld [vmem:[#allocation51_spill] sm:$0xff]  ;;  %v2508_v53 = vmul.f32 1.442695, %v2488_v29  ;;  %v2490_v50 = vsub.f32 %v10291_v3, %v8313_v7  ;;  %v10292_v29 = vld [vmem:[#allocation24_spill] sm:$0xff] }
 0x54c   : > { %1281 = vst.msk [vmem:[#allocation4 + $0x38] sm:$0xff] %vm895_vm0, %v1265_v48  ;;  %v8374_v20 = vpop.xlane.xlu1 %2472  ;;  %v2489_v49 = vsub.f32 %v10290_v44, %v8335_v28  ;;  %v6328_v48 = vpop.eup %6327  ;;  %6333 = vpow2.f32 %v2504_v1  ;;  %v2493_v28 = vsub.f32 %v7932_v15, %v8357_v60  ;;  %v10294_v1 = vld [vmem:[#allocation53_spill] sm:$0xff] }
 0x54d   : > { %1279 = vst.msk [vmem:[#allocation4 + $0x28] sm:$0xff] %vm895_vm0, %v1263_v30  ;;  %v2506_v18 = vmul.f32 1.442695, %v2487_v17  ;;  %v6330_v21 = vpop.eup %6329  ;;  %6335 = vpow2.f32 %v2508_v53  ;;  %v2492_v53 = vsub.f32 %v10294_v1, %v8327_v40  ;;  %v2512_v15 = vmul.f32 1.442695, %v2490_v50 }
 0x54e   : > { %v2510_v25 = vmul.f32 1.442695, %v2489_v49  ;;  %v6332_v54 = vpop.eup %6331  ;;  %v2518_v60 = vmul.f32 1.442695, %v2493_v28  ;;  %v2494_v40 = vsub.f32 %v10250_v26, %v8374_v20 }
 0x54f   : > { %6337 = vpow2.f32 %v2506_v18 }
 0x550   : > { %v8379_v19 = vpop.xlane.xlu1 %2476  ;;  %6339 = vpow2.f32 %v2510_v25  ;;  %v2520_v26 = vmul.f32 1.442695, %v2494_v40 }
 0x551   : > { %6341 = vrcp.f32 %v8347_v59 }
 0x552   : > { %6343 = vrcp.f32 %v8349_v33  ;;  %v2495_v33 = vsub.f32 %v7930_v41, %v8359_v47 }
 0x553   : > { %6345 = vrcp.f32 %v8351_v36 }
 0x554   : > { %v2617_v61 = vpop.permute.xlu1 %2616  ;;  %6347 = vrcp.f32 %v8353_v22  ;;  %v2496_v22 = vsub.f32 %v10254_v38, %v8379_v19  ;;  %v2522_v41 = vmul.f32 1.442695, %v2495_v33 }
 0x555   : > { %5784 = vmatprep.subr.bf16.mxu0 %v2617_v61  ;;  %6349 = vpow2.f32 %v2512_v15 }
 0x556   : > { %5785 = vmatpush3.bf16.msra.mxu0 %v2617_v61  ;;  %v10293_v61 = vld [vmem:[#allocation50_spill] sm:$0xff]  ;;  %6351 = vpow2.f32 %v2518_v60  ;;  %v8413_v18 = vpop.eup %6333  ;;  %v2524_v3 = vmul.f32 1.442695, %v2496_v22 }
 0x557   : > { %v2491_v44 = vsub.f32 %v10293_v61, %v8333_v58  ;;  %v8417_v36 = vpop.eup %6335 }
 0x558   : > { %v5648_v4 = vpop.f32.mrb[40].mxu0  ;;  %10295 = vst [vmem:[#allocation27_spill] sm:$0xff] %v8417_v36 }
 0x559   : > { %v1268_v2 = vmul.f32 %v6326_v14, %v5648_v4  ;;  %v1227_v30 = vpop.f32.mrb[41].mxu0  ;;  %v2514_v14 = vmul.f32 1.442695, %v2491_v44 }
 0x55a   : > { %v1266_v52 = vmul.f32 %v6328_v48, %v1227_v30  ;;  %v5649_v11 = vpop.f32.mrb[42].mxu0  ;;  %v8421_v48 = vpop.eup %6337 }
 0x55b   : > { %1284 = vst.msk [vmem:[#allocation4 + $0x50] sm:$0xff] %vm895_vm0, %v1268_v2  ;;  %v1269_v39 = vmul.f32 %v6330_v21, %v5649_v11  ;;  %3118 = vrot.lane.b32.xlu0 %v10292_v29, %s6969_s7  ;;  %v1230_v17 = vpop.f32.mrb[43].mxu0  ;;  %6353 = vpow2.f32 %v2514_v14  ;;  %v8423_v20 = vpop.eup %6339  ;;  %v2581_v25 = vpack.c.bf16 %v8421_v48, %v8413_v18  ;;  %v10296_v11 = vld [vmem:[#allocation62_spill] sm:$0xff] }
 0x55c   : > { %1282 = vst.msk [vmem:[#allocation4 + $0x40] sm:$0xff] %vm895_vm0, %v1266_v52  ;;  %v1267_v7 = vmul.f32 %v6332_v54, %v1230_v17  ;;  %v2479_v49 = vpop.xlane.xlu0 %2478  ;;  %v2516_v54 = vmul.f32 1.442695, %v2492_v53  ;;  %v6342_v2 = vpop.eup %6341  ;;  %v2582_v30 = vpack.c.bf16 %v8423_v20, %v8417_v36  ;;  %v10299_v53 = vld [vmem:[#allocation67_spill] sm:$0xff] }
 0x55d   : > { %1285 = vst.msk [vmem:[#allocation4 + $0x58] sm:$0xff] %vm895_vm0, %v1269_v39  ;;  %v2497_v59 = vsub.f32 %v10266_v43, %v2479_v49  ;;  %v6344_v21 = vpop.eup %6343 }
 0x55e   : > { %1283 = vst.msk [vmem:[#allocation4 + $0x48] sm:$0xff] %vm895_vm0, %v1267_v7  ;;  %6355 = vpow2.f32 %v2516_v54  ;;  %v6346_v50 = vpop.eup %6345 }
 0x55f   : > { %v2526_v43 = vmul.f32 1.442695, %v2497_v59  ;;  %6357 = vpow2.f32 %v2520_v26  ;;  %v6348_v39 = vpop.eup %6347 }
 0x560   : > { %v8407_v58 = vpop.xlane.xlu0 %2482  ;;  %v8431_v44 = vpop.eup %6349 }
 0x561   : > { %6359 = vpow2.f32 %v2526_v43  ;;  %10297 = vst [vmem:[#allocation28_spill] sm:$0xff] %v8431_v44  ;;  %v8434_v49 = vpop.eup %6351 }
 0x562   : > { %6361 = vpow2.f32 %v2522_v41  ;;  %10298 = vst [vmem:[#allocation54_spill] sm:$0xff] %v8434_v49 }
 0x563   : > { %6363 = vpow2.f32 %v2524_v3 }
 0x564   : > { %v2619_v4 = vpop.permute.xlu0 %2618 }
 0x565   : > { %5786 = vmatprep.subr.bf16.mxu0 %v2619_v4  ;;  %v8437_v1 = vpop.eup %6353 }
 0x566   : > { %5787 = vmatpush3.bf16.msra.mxu0 %v2619_v4  ;;  %v2583_v60 = vpack.c.bf16 %v8437_v1, %v8431_v44 }
 0x568   : > { %v5652_v47 = vpop.f32.mrb[44].mxu0  ;;  %v8441_v15 = vpop.eup %6355 }
 0x569   : > { %v1272_v38 = vmul.f32 %v6342_v2, %v5652_v47  ;;  %v1243_v19 = vpop.f32.mrb[45].mxu0  ;;  %5789 = vmatmul.mubr.bf16.vlgmr.msra.gmra.mrb[80].mxu0 %v2581_v25  ;;  %10300 = vst [vmem:[#allocation59_spill] sm:$0xff] %v8441_v15  ;;  %v2584_v54 = vpack.c.bf16 %v8434_v49, %v8441_v15  ;;  %v8455_v4 = vpop.eup %6357 }
 0x56a   : > { %v1270_v52 = vmul.f32 %v6344_v21, %v1243_v19  ;;  %2972 = vmax.xlane.f32.xlu1 %v10296_v11  ;;  %v5653_v28 = vpop.f32.mrb[46].mxu0  ;;  %5792 = vmatprep.mubr.bf16.mxu0 %v2582_v30  ;;  %10305 = vst [vmem:[#allocation58_spill] sm:$0xff] %v8455_v4  ;;  %v10311_v30 = vld [vmem:[#allocation69_spill] sm:$0xff] }
 0x56b   : > { %1288 = vst.msk [vmem:[#allocation4 + $0x70] sm:$0xff] %vm895_vm0, %v1272_v38  ;;  %v1273_v17 = vmul.f32 %v6346_v50, %v5653_v28  ;;  %v1246_v61 = vpop.f32.mrb[47].mxu0  ;;  %v8457_v22 = vpop.eup %6359  ;;  %v10314_v38 = vld [vmem:[#allocation68_spill] sm:$0xff]  ;;  %v2499_v50 = vsub.f32 %v10268_v57, %v8407_v58 }
 0x56c   : > { %1286 = vst.msk [vmem:[#allocation4 + $0x60] sm:$0xff] %vm895_vm0, %v1270_v52  ;;  %v1271_v7 = vmul.f32 %v6348_v39, %v1246_v61  ;;  %10306 = vst [vmem:[#allocation63_spill] sm:$0xff] %v8457_v22  ;;  %v8459_v26 = vpop.eup %6361 }
 0x56d   : > { %1289 = vst.msk [vmem:[#allocation4 + $0x78] sm:$0xff] %vm895_vm0, %v1273_v17  ;;  %10307 = vst [vmem:[#allocation65_spill] sm:$0xff] %v8459_v26  ;;  %v8461_v43 = vpop.eup %6363  ;;  %v2585_v25 = vpack.c.bf16 %v8459_v26, %v8455_v4  ;;  %v2530_v17 = vmul.f32 1.442695, %v2499_v50 }
 0x56e   : > { %1287 = vst.msk [vmem:[#allocation4 + $0x68] sm:$0xff] %vm895_vm0, %v1271_v7  ;;  %2976 = vmax.xlane.f32.xlu1 %v10299_v53  ;;  %10308 = vst [vmem:[#allocation64_spill] sm:$0xff] %v8461_v43  ;;  %v2586_v41 = vpack.c.bf16 %v8457_v22, %v8461_v43 }
 0x56f   : > { %6365 = vpow2.f32 %v2530_v17 }
 0x570   : > { %v8445_v14 = vpop.f32.mrb[48].mxu0 }
 0x571   : > { %10301 = vst [vmem:[#allocation61_spill] sm:$0xff] %v8445_v14  ;;  %v8449_v40 = vpop.f32.mrb[49].mxu0  ;;  %5793 = vmatmul.mubr.bf16.gmra.mrb[84].mxu0 %v2583_v60 }
 0x572   : > { %10302 = vst [vmem:[#allocation60_spill] sm:$0xff] %v8449_v40  ;;  %v8451_v59 = vpop.f32.mrb[50].mxu0  ;;  %5796 = vmatprep.mubr.bf16.mxu0 %v2584_v54 }
 0x573   : > { %10303 = vst [vmem:[#allocation21_spill] sm:$0xff] %v8451_v59  ;;  %v8453_v33 = vpop.f32.mrb[51].mxu0 }
 0x574   : > { %10304 = vst [vmem:[#allocation22_spill] sm:$0xff] %v8453_v33 }
 0x578   : > { %v8465_v2 = vpop.f32.mrb[52].mxu0 }
 0x579   : > { %10309 = vst [vmem:[#allocation23_spill] sm:$0xff] %v8465_v2  ;;  %v8469_v47 = vpop.f32.mrb[53].mxu0  ;;  %5797 = vmatmul.mubr.bf16.gmra.mrb[88].mxu0 %v2585_v25  ;;  %v8505_v17 = vpop.eup %6365 }
 0x57a   : > { %10310 = vst [vmem:[#allocation44_spill] sm:$0xff] %v8469_v47  ;;  %2978 = vmax.xlane.f32.xlu0 %v10311_v30  ;;  %v8472_v21 = vpop.f32.mrb[54].mxu0  ;;  %5800 = vmatprep.mubr.bf16.mxu0 %v2586_v41  ;;  %10326 = vst [vmem:[#allocation125_spill] sm:$0xff] %v8505_v17 }
 0x57b   : > { %10312 = vst [vmem:[#allocation49_spill] sm:$0xff] %v8472_v21  ;;  %v8474_v3 = vpop.f32.mrb[55].mxu0 }
 0x57c   : > { %10313 = vst [vmem:[#allocation46_spill] sm:$0xff] %v8474_v3 }
 0x57e   : > { %2982 = vmax.xlane.f32.xlu0 %v10314_v38 }
 0x57f   : > { %3120 = vrot.lane.b32.xlu1 %v10210_v16, %s6969_s7 }
 0x580   : > { %v8479_v19 = vpop.f32.mrb[56].mxu0 }
 0x581   : > { %10315 = vst [vmem:[#allocation51_spill] sm:$0xff] %v8479_v19  ;;  %v8483_v52 = vpop.f32.mrb[57].mxu0 }
 0x582   : > { %10316 = vst [vmem:[#allocation48_spill] sm:$0xff] %v8483_v52  ;;  %v8485_v28 = vpop.f32.mrb[58].mxu0 }
 0x583   : > { %10317 = vst [vmem:[#allocation24_spill] sm:$0xff] %v8485_v28  ;;  %v8487_v39 = vpop.f32.mrb[59].mxu0 }
 0x584   : > { %10318 = vst [vmem:[#allocation50_spill] sm:$0xff] %v8487_v39 }
 0x585   : > { %v2481_v61 = vpop.xlane.xlu1 %2480 }
 0x586   : > { %v2498_v7 = vsub.f32 %v10276_v24, %v2481_v61 }
 0x588   : > { %v2528_v60 = vmul.f32 1.442695, %v2498_v7  ;;  %v8490_v54 = vpop.f32.mrb[60].mxu0 }
 0x589   : > { %10319 = vst [vmem:[#allocation53_spill] sm:$0xff] %v8490_v54  ;;  %v2961_v25 = vpop.xlane.xlu1 %2960  ;;  %v8492_v41 = vpop.f32.mrb[61].mxu0 }
 0x58a   : > { %10320 = vst [vmem:[#allocation62_spill] sm:$0xff] %v8492_v41  ;;  %6367 = vpow2.f32 %v2528_v60  ;;  %v8494_v19 = vpop.f32.mrb[62].mxu0  ;;  %v2992_v50 = vsub.f32 %v10277_v31, %v2961_v25 }
 0x58b   : > { %10321 = vst [vmem:[#allocation67_spill] sm:$0xff] %v8494_v19  ;;  %v8496_v57 = vpop.f32.mrb[63].mxu0 }
 0x58c   : > { %10322 = vst [vmem:[#allocation69_spill] sm:$0xff] %v8496_v57  ;;  %v3008_v19 = vmul.f32 1.442695, %v2992_v50 }
 0x58d   : > { %v3113_v58 = vpop.permute.xlu1 %3112 }
 0x58e   : > { %5822 = vmatprep.subr.bf16.mxu0 %v3113_v58  ;;  %6369 = vpow2.f32 %v3008_v19 }
 0x58f   : > { %5823 = vmatpush3.bf16.msra.mxu0 %v3113_v58 }
 0x590   : > { %v8498_v28 = vpop.f32.mrb[64].mxu0 }
 0x591   : > { %10323 = vst [vmem:[#allocation68_spill] sm:$0xff] %v8498_v28  ;;  %v8501_v24 = vpop.f32.mrb[65].mxu0  ;;  %v10348_v28 = vld [vmem:[#allocation74_spill] sm:$0xff] }
 0x592   : > { %10324 = vst [vmem:[#allocation123_spill] sm:$0xff] %v8501_v24  ;;  %v8503_v61 = vpop.f32.mrb[66].mxu0 }
 0x593   : > { %10325 = vst [vmem:[#allocation124_spill] sm:$0xff] %v8503_v61  ;;  %v8507_v7 = vpop.f32.mrb[67].mxu0 }
 0x594   : > { %10327 = vst [vmem:[#allocation126_spill] sm:$0xff] %v8507_v7  ;;  %v8509_v60 = vpop.eup %6367  ;;  %3122 = vrot.lane.b32.xlu0 %v10233_v34, %s6969_s7 }
 0x595   : > { %10328 = vst [vmem:[#allocation127_spill] sm:$0xff] %v8509_v60  ;;  %v2963_v54 = vpop.xlane.xlu0 %2962  ;;  %v2587_v58 = vpack.c.bf16 %v8505_v17, %v8509_v60 }
 0x596   : > { %v2993_v31 = vsub.f32 %v10278_v37, %v2963_v54  ;;  %v10333_v37 = vld [vmem:[#allocation66_spill] sm:$0xff] }
 0x597   : > { %5801 = vmatmul.mubr.bf16.gmra.mrb[92].mxu0 %v2587_v58 }
 0x598   : > { %v3010_v25 = vmul.f32 1.442695, %v2993_v31  ;;  %v8526_v2 = vpop.eup %6369 }
 0x599   : > { %v8516_v57 = vpop.xlane.xlu0 %2966 }
 0x59a   : > { %6371 = vpow2.f32 %v3010_v25 }
 0x59c   : > { %v8518_v41 = vpop.f32.mrb[68].mxu0 }
 0x59d   : > { %10329 = vst [vmem:[#allocation128_spill] sm:$0xff] %v8518_v41  ;;  %v3115_v39 = vpop.permute.xlu0 %3114  ;;  %v8520_v52 = vpop.f32.mrb[69].mxu0 }
 0x59e   : > { %10330 = vst [vmem:[#allocation129_spill] sm:$0xff] %v8520_v52  ;;  %v8522_v21 = vpop.f32.mrb[70].mxu0  ;;  %5824 = vmatprep.subr.bf16.mxu0 %v3115_v39 }
 0x59f   : > { %10331 = vst [vmem:[#allocation130_spill] sm:$0xff] %v8522_v21  ;;  %v8524_v50 = vpop.f32.mrb[71].mxu0  ;;  %5825 = vmatpush3.bf16.msra.mxu0 %v3115_v39  ;;  %v10337_v21 = vld [vmem:[#allocation71_spill] sm:$0xff] }
 0x5a0   : > { %10332 = vst [vmem:[#allocation131_spill] sm:$0xff] %v8524_v50 }
 0x5a3   : > { %2980 = vmax.xlane.f32.xlu1 %v10333_v37 }
 0x5a4   : > { %v8529_v54 = vpop.eup %6371  ;;  %v8531_v19 = vpop.f32.mrb[72].mxu0 }
 0x5a5   : > { %10334 = vst [vmem:[#allocation66_spill] sm:$0xff] %v8531_v19  ;;  %v8533_v58 = vpop.f32.mrb[73].mxu0  ;;  %v3088_v31 = vpack.c.bf16 %v8529_v54, %v8526_v2  ;;  %v10343_v19 = vld [vmem:[#allocation73_spill] sm:$0xff] }
 0x5a6   : > { %10335 = vst [vmem:[#allocation132_spill] sm:$0xff] %v8533_v58  ;;  %v8537_v25 = vpop.f32.mrb[74].mxu0  ;;  %v10344_v58 = vld [vmem:[#allocation72_spill] sm:$0xff] }
 0x5a7   : > { %10336 = vst [vmem:[#allocation133_spill] sm:$0xff] %v8537_v25  ;;  %2984 = vmax.xlane.f32.xlu1 %v10337_v21  ;;  %v8540_v41 = vpop.f32.mrb[75].mxu0  ;;  %5838 = vmatprep.mubr.bf16.mxu0 %v3088_v31 }
 0x5a8   : > { %10338 = vst [vmem:[#allocation71_spill] sm:$0xff] %v8540_v41  ;;  %v10347_v41 = vld [vmem:[#allocation76_spill] sm:$0xff] }
 0x5ac   : > { %v8542_v39 = vpop.f32.mrb[76].mxu0 }
 0x5ad   : > { %10339 = vst [vmem:[#allocation134_spill] sm:$0xff] %v8542_v39  ;;  %v8544_v50 = vpop.f32.mrb[77].mxu0 }
 0x5ae   : > { %10340 = vst [vmem:[#allocation135_spill] sm:$0xff] %v8544_v50  ;;  %v8546_v52 = vpop.f32.mrb[78].mxu0  ;;  %v10346_v50 = vld [vmem:[#allocation75_spill] sm:$0xff] }
 0x5af   : > { %10341 = vst [vmem:[#allocation136_spill] sm:$0xff] %v8546_v52  ;;  %v8548_v3 = vpop.f32.mrb[79].mxu0 }
 0x5b0   : > { %10342 = vst [vmem:[#allocation137_spill] sm:$0xff] %v8548_v3  ;;  %v10345_v3 = vld [vmem:[#allocation70_spill] sm:$0xff] }
 0x5b3   : > { %2986 = vmax.xlane.f32.xlu0 %v10343_v19 }
 0x5b7   : > { %2990 = vmax.xlane.f32.xlu0 %v10344_v58 }
 0x5b8   : > { %3124 = vrot.lane.b32.xlu1 %v10270_v63, %s6969_s7 }
 0x5be   : > { %v2965_v25 = vpop.xlane.xlu1 %2964 }
 0x5bf   : > { %v2994_v24 = vsub.f32 %v10282_v10, %v2965_v25 }
 0x5c1   : > { %v3012_v40 = vmul.f32 1.442695, %v2994_v24 }
 0x5c2   : > { %v2969_v47 = vpop.xlane.xlu1 %2968 }
 0x5c3   : > { %v2996_v14 = vsub.f32 %v10283_v23, %v2969_v47  ;;  %6373 = vpow2.f32 %v3012_v40 }
 0x5c5   : > { %v3016_v49 = vmul.f32 1.442695, %v2996_v14 }
 0x5c6   : > { %v3117_v60 = vpop.permute.xlu1 %3116 }
 0x5c7   : > { %5826 = vmatprep.subr.bf16.mxu0 %v3117_v60 }
 0x5c8   : > { %5827 = vmatpush3.bf16.msra.mxu0 %v3117_v60 }
 0x5cd   : > { %3126 = vrot.lane.b32.xlu0 %v10275_v56, %s6969_s7 }
 0x5ce   : > { %v2971_v31 = vpop.xlane.xlu0 %2970 }
 0x5cf   : > { %v2997_v33 = vsub.f32 %v10284_v12, %v2971_v31 }
 0x5d1   : > { %v3018_v4 = vmul.f32 1.442695, %v2997_v33 }
 0x5d2   : > { %v2975_v39 = vpop.xlane.xlu0 %2974 }
 0x5d3   : > { %6375 = vpow2.f32 %v3018_v4 }
 0x5d6   : > { %v3119_v52 = vpop.permute.xlu0 %3118 }
 0x5d7   : > { %5828 = vmatprep.subr.bf16.mxu0 %v3119_v52 }
 0x5d8   : > { %5829 = vmatpush3.bf16.msra.mxu0 %v3119_v52 }
 0x5dc   : > { %2988 = vmax.xlane.f32.xlu1 %v10345_v3 }
 0x5e0   : > { %3468 = vmax.xlane.f32.xlu1 %v10346_v50 }
 0x5ec   : > { %3470 = vmax.xlane.f32.xlu0 %v8007_v45 }
 0x5f0   : > { %3474 = vmax.xlane.f32.xlu0 %v10347_v41 }
 0x5f1   : > { %3620 = vrot.lane.b32.xlu1 %v10280_v55, %s6968_s9 }
 0x5f7   : > { %v2973_v60 = vpop.xlane.xlu1 %2972 }
 0x5f8   : > { %v2998_v10 = vsub.f32 %v10296_v11, %v2973_v60 }
 0x5fa   : > { %v3020_v40 = vmul.f32 1.442695, %v2998_v10 }
 0x5fb   : > { %v2977_v43 = vpop.xlane.xlu1 %2976 }
 0x5fc   : > { %v3000_v14 = vsub.f32 %v10299_v53, %v2977_v43  ;;  %v8601_v53 = vpop.eup %6373 }
 0x5fe   : > { %v3024_v4 = vmul.f32 1.442695, %v3000_v14 }
 0x5ff   : > { %v3121_v17 = vpop.permute.xlu1 %3120 }
 0x600   : > { %5830 = vmatprep.subr.bf16.mxu0 %v3121_v17 }
 0x601   : > { %5831 = vmatpush3.bf16.msra.mxu0 %v3121_v17 }
 0x606   : > { %3622 = vrot.lane.b32.xlu0 %v10281_v5, %s6968_s9 }
 0x607   : > { %v2979_v52 = vpop.xlane.xlu0 %2978 }
 0x60b   : > { %v8564_v22 = vpop.xlane.xlu0 %2982 }
 0x60f   : > { %v3123_v61 = vpop.permute.xlu0 %3122 }
 0x610   : > { %5832 = vmatprep.subr.bf16.mxu0 %v3123_v61 }
 0x611   : > { %5833 = vmatpush3.bf16.msra.mxu0 %v3123_v61  ;;  %v2995_v61 = vsub.f32 %v10279_v9, %v8516_v57  ;;  %v3001_v9 = vsub.f32 %v10311_v30, %v2979_v52 }
 0x613   : > { %v3014_v15 = vmul.f32 1.442695, %v2995_v61  ;;  %v3026_v47 = vmul.f32 1.442695, %v3001_v9 }
 0x615   : > { %3472 = vmax.xlane.f32.xlu1 %v10348_v28  ;;  %6377 = vpow2.f32 %v3014_v15  ;;  %v3003_v15 = vsub.f32 %v10314_v38, %v8564_v22 }
 0x616   : > { %6379 = vpow2.f32 %v3016_v49 }
 0x617   : > { %6381 = vpow2.f32 %v3020_v40  ;;  %v3030_v10 = vmul.f32 1.442695, %v3003_v15 }
 0x618   : > { %6383 = vpow2.f32 %v3026_v47 }
 0x619   : > { %3476 = vmax.xlane.f32.xlu1 %v8014_v46 }
 0x625   : > { %3478 = vmax.xlane.f32.xlu0 %v8019_v6 }
 0x629   : > { %3482 = vmax.xlane.f32.xlu0 %v8016_v42 }
 0x62a   : > { %3624 = vrot.lane.b32.xlu1 %v10286_v8, %s6968_s9 }
 0x630   : > { %v2981_v17 = vpop.xlane.xlu1 %2980 }
 0x631   : > { %v3002_v25 = vsub.f32 %v10333_v37, %v2981_v17 }
 0x633   : > { %v3028_v52 = vmul.f32 1.442695, %v3002_v25 }
 0x634   : > { %v2985_v7 = vpop.xlane.xlu1 %2984 }
 0x635   : > { %v3004_v60 = vsub.f32 %v10337_v21, %v2985_v7 }
 0x637   : > { %v3032_v38 = vmul.f32 1.442695, %v3004_v60 }
 0x638   : > { %v3125_v59 = vpop.permute.xlu1 %3124 }
 0x639   : > { %5834 = vmatprep.subr.bf16.mxu0 %v3125_v59 }
 0x63a   : > { %5835 = vmatpush3.bf16.msra.mxu0 %v3125_v59  ;;  %v2999_v59 = vsub.f32 %v10285_v32, %v2975_v39  ;;  %v8605_v39 = vpop.eup %6375 }
 0x63b   : > { %v8608_v37 = vpop.eup %6377 }
 0x63c   : > { %v8577_v26 = vpop.f32.mrb[80].mxu0  ;;  %v3022_v11 = vmul.f32 1.442695, %v2999_v59  ;;  %v3089_v61 = vpack.c.bf16 %v8608_v37, %v8601_v53 }
 0x63d   : > { %10349 = vst [vmem:[#allocation73_spill] sm:$0xff] %v8577_v26  ;;  %v8579_v44 = vpop.f32.mrb[81].mxu0 }
 0x63e   : > { %10350 = vst [vmem:[#allocation72_spill] sm:$0xff] %v8579_v44  ;;  %v8582_v12 = vpop.f32.mrb[82].mxu0  ;;  %6385 = vpow2.f32 %v3022_v11 }
 0x63f   : > { %10351 = vst [vmem:[#allocation70_spill] sm:$0xff] %v8582_v12  ;;  %3626 = vrot.lane.b32.xlu0 %v10292_v29, %s6968_s9  ;;  %v8587_v23 = vpop.f32.mrb[83].mxu0  ;;  %6387 = vpow2.f32 %v3024_v4 }
 0x640   : > { %10352 = vst [vmem:[#allocation75_spill] sm:$0xff] %v8587_v23  ;;  %v2987_v33 = vpop.xlane.xlu0 %2986  ;;  %6389 = vpow2.f32 %v3028_v52 }
 0x641   : > { %v3005_v32 = vsub.f32 %v10343_v19, %v2987_v33  ;;  %v8610_v19 = vpop.eup %6379 }
 0x642   : > { %10357 = vst [vmem:[#allocation140_spill] sm:$0xff] %v8610_v19  ;;  %v3090_v22 = vpack.c.bf16 %v8605_v39, %v8610_v19  ;;  %v8625_v33 = vpop.eup %6381 }
 0x643   : > { %v3034_v17 = vmul.f32 1.442695, %v3005_v32  ;;  %10362 = vst [vmem:[#allocation145_spill] sm:$0xff] %v8625_v33  ;;  %v8627_v14 = vpop.eup %6383 }
 0x644   : > { %v2991_v57 = vpop.xlane.xlu0 %2990  ;;  %v8591_v24 = vpop.f32.mrb[84].mxu0  ;;  %10363 = vst [vmem:[#allocation146_spill] sm:$0xff] %v8627_v14 }
 0x645   : > { %10353 = vst [vmem:[#allocation76_spill] sm:$0xff] %v8591_v24  ;;  %v8593_v30 = vpop.f32.mrb[85].mxu0  ;;  %6391 = vpow2.f32 %v3034_v17  ;;  %v10369_v17 = vld [vmem:[#allocation79_spill] sm:$0xff] }
 0x646   : > { %10354 = vst [vmem:[#allocation74_spill] sm:$0xff] %v8593_v30  ;;  %v8596_v31 = vpop.f32.mrb[86].mxu0  ;;  %6393 = vpow2.f32 %v3030_v10  ;;  %v3007_v10 = vsub.f32 %v10344_v58, %v2991_v57  ;;  %v10381_v30 = vld [vmem:[#allocation80_spill] sm:$0xff] }
 0x647   : > { %10355 = vst [vmem:[#allocation138_spill] sm:$0xff] %v8596_v31  ;;  %v8599_v49 = vpop.f32.mrb[87].mxu0  ;;  %6395 = vpow2.f32 %v3032_v38 }
 0x648   : > { %10356 = vst [vmem:[#allocation139_spill] sm:$0xff] %v8599_v49  ;;  %v3127_v43 = vpop.permute.xlu0 %3126  ;;  %v8629_v40 = vpop.eup %6385 }
 0x649   : > { %5836 = vmatprep.subr.bf16.mxu0 %v3127_v43  ;;  %v8632_v47 = vpop.eup %6387  ;;  %v3091_v11 = vpack.c.bf16 %v8629_v40, %v8625_v33 }
 0x64a   : > { %5837 = vmatpush3.bf16.msra.mxu0 %v3127_v43  ;;  %10364 = vst [vmem:[#allocation147_spill] sm:$0xff] %v8632_v47  ;;  %v3092_v4 = vpack.c.bf16 %v8627_v14, %v8632_v47  ;;  %v8638_v25 = vpop.eup %6389 }
 0x64b   : > { %10365 = vst [vmem:[#allocation148_spill] sm:$0xff] %v8638_v25 }
 0x64c   : > { %v8614_v9 = vpop.f32.mrb[88].mxu0 }
 0x64d   : > { %10358 = vst [vmem:[#allocation141_spill] sm:$0xff] %v8614_v9  ;;  %v8618_v59 = vpop.f32.mrb[89].mxu0  ;;  %5839 = vmatmul.mubr.bf16.vlgmr.msra.gmra.mrb[96].mxu0 %v3089_v61  ;;  %v10370_v61 = vld [vmem:[#allocation78_spill] sm:$0xff] }
 0x64e   : > { %10359 = vst [vmem:[#allocation142_spill] sm:$0xff] %v8618_v59  ;;  %3480 = vmax.xlane.f32.xlu1 %v8012_v51  ;;  %v8621_v21 = vpop.f32.mrb[90].mxu0  ;;  %5842 = vmatprep.mubr.bf16.mxu0 %v3090_v22  ;;  %v3038_v22 = vmul.f32 1.442695, %v3007_v10 }
 0x64f   : > { %10360 = vst [vmem:[#allocation143_spill] sm:$0xff] %v8621_v21  ;;  %v8623_v7 = vpop.f32.mrb[91].mxu0  ;;  %v8640_v32 = vpop.eup %6391 }
 0x650   : > { %10361 = vst [vmem:[#allocation144_spill] sm:$0xff] %v8623_v7  ;;  %10366 = vst [vmem:[#allocation149_spill] sm:$0xff] %v8640_v32  ;;  %v8642_v15 = vpop.eup %6393  ;;  %6397 = vpow2.f32 %v3038_v22 }
 0x651   : > { %10367 = vst [vmem:[#allocation150_spill] sm:$0xff] %v8642_v15  ;;  %v8644_v43 = vpop.eup %6395  ;;  %v3093_v60 = vpack.c.bf16 %v8642_v15, %v8638_v25 }
 0x652   : > { %3484 = vmax.xlane.f32.xlu1 %v8028_v13  ;;  %10368 = vst [vmem:[#allocation151_spill] sm:$0xff] %v8644_v43  ;;  %v3094_v52 = vpack.c.bf16 %v8640_v32, %v8644_v43  ;;  %v10383_v43 = vld [vmem:[#allocation29_spill] sm:$0xff] }
 0x655   : > { %5843 = vmatmul.mubr.bf16.gmra.mrb[100].mxu0 %v3091_v11 }
 0x656   : > { %5846 = vmatprep.mubr.bf16.mxu0 %v3092_v4 }
 0x65a   : > { %v8665_v57 = vpop.eup %6397 }
 0x65b   : > { %10375 = vst [vmem:[#allocation154_spill] sm:$0xff] %v8665_v57 }
 0x65d   : > { %5847 = vmatmul.mubr.bf16.gmra.mrb[104].mxu0 %v3093_v60 }
 0x65e   : > { %3486 = vmax.xlane.f32.xlu0 %v10369_v17  ;;  %5850 = vmatprep.mubr.bf16.mxu0 %v3094_v52 }
 0x662   : > { %3490 = vmax.xlane.f32.xlu0 %v10370_v61 }
 0x663   : > { %3628 = vrot.lane.b32.xlu1 %v10210_v16, %s6968_s9 }
 0x669   : > { %v2989_v38 = vpop.xlane.xlu1 %2988 }
 0x66a   : > { %v3006_v11 = vsub.f32 %v10345_v3, %v2989_v38  ;;  %v8656_v4 = vpop.f32.mrb[92].mxu0 }
 0x66b   : > { %10371 = vst [vmem:[#allocation79_spill] sm:$0xff] %v8656_v4  ;;  %v8658_v21 = vpop.f32.mrb[93].mxu0 }
 0x66c   : > { %10372 = vst [vmem:[#allocation78_spill] sm:$0xff] %v8658_v21  ;;  %v3036_v9 = vmul.f32 1.442695, %v3006_v11  ;;  %v8660_v60 = vpop.f32.mrb[94].mxu0 }
 0x66d   : > { %10373 = vst [vmem:[#allocation152_spill] sm:$0xff] %v8660_v60  ;;  %v3469_v52 = vpop.xlane.xlu1 %3468  ;;  %v8662_v7 = vpop.f32.mrb[95].mxu0  ;;  %v10377_v60 = vld [vmem:[#allocation77_spill] sm:$0xff] }
 0x66e   : > { %10374 = vst [vmem:[#allocation153_spill] sm:$0xff] %v8662_v7  ;;  %6399 = vpow2.f32 %v3036_v9  ;;  %v3500_v58 = vsub.f32 %v10346_v50, %v3469_v52  ;;  %v10380_v7 = vld [vmem:[#allocation82_spill] sm:$0xff] }
 0x670   : > { %v3516_v10 = vmul.f32 1.442695, %v3500_v58 }
 0x671   : > { %v3621_v59 = vpop.permute.xlu1 %3620 }
 0x672   : > { %5872 = vmatprep.subr.bf16.mxu0 %v3621_v59  ;;  %6401 = vpow2.f32 %v3516_v10 }
 0x673   : > { %5873 = vmatpush3.bf16.msra.mxu0 %v3621_v59 }
 0x678   : > { %v8667_v3 = vpop.eup %6399  ;;  %3630 = vrot.lane.b32.xlu0 %v10233_v34, %s6968_s9 }
 0x679   : > { %10376 = vst [vmem:[#allocation155_spill] sm:$0xff] %v8667_v3  ;;  %v3471_v38 = vpop.xlane.xlu0 %3470  ;;  %v3095_v22 = vpack.c.bf16 %v8665_v57, %v8667_v3  ;;  %v10382_v3 = vld [vmem:[#allocation85_spill] sm:$0xff]  ;;  %v10384_v57 = vld [vmem:[#allocation86_spill] sm:$0xff] }
 0x67a   : > { %v3501_v11 = vsub.f32 %v8007_v45, %v3471_v38 }
 0x67b   : > { %5851 = vmatmul.mubr.bf16.gmra.mrb[108].mxu0 %v3095_v22 }
 0x67c   : > { %v3518_v9 = vmul.f32 1.442695, %v3501_v11  ;;  %v8674_v52 = vpop.eup %6401 }
 0x67d   : > { %v3475_v59 = vpop.xlane.xlu0 %3474 }
 0x67e   : > { %6403 = vpow2.f32 %v3518_v9  ;;  %v3503_v12 = vsub.f32 %v10347_v41, %v3475_v59 }
 0x680   : > { %v3522_v15 = vmul.f32 1.442695, %v3503_v12 }
 0x681   : > { %v3623_v50 = vpop.permute.xlu0 %3622 }
 0x682   : > { %5874 = vmatprep.subr.bf16.mxu0 %v3623_v50 }
 0x683   : > { %5875 = vmatpush3.bf16.msra.mxu0 %v3623_v50  ;;  %v10378_v50 = vld [vmem:[#allocation81_spill] sm:$0xff] }
 0x687   : > { %3488 = vmax.xlane.f32.xlu1 %v10377_v60 }
 0x688   : > { %v8677_v4 = vpop.eup %6403 }
 0x689   : > { %v3596_v58 = vpack.c.bf16 %v8677_v4, %v8674_v52 }
 0x68b   : > { %3492 = vmax.xlane.f32.xlu1 %v8046_v35  ;;  %5888 = vmatprep.mubr.bf16.mxu0 %v3596_v58  ;;  %v10379_v58 = vld [vmem:[#allocation83_spill] sm:$0xff] }
 0x697   : > { %3494 = vmax.xlane.f32.xlu0 %v8052_v27 }
 0x69b   : > { %3498 = vmax.xlane.f32.xlu0 %v8049_v62 }
 0x69c   : > { %3632 = vrot.lane.b32.xlu1 %v10270_v63, %s6968_s9 }
 0x6a2   : > { %v3473_v45 = vpop.xlane.xlu1 %3472 }
 0x6a3   : > { %v3502_v26 = vsub.f32 %v10348_v28, %v3473_v45 }
 0x6a5   : > { %v3520_v25 = vmul.f32 1.442695, %v3502_v26 }
 0x6a6   : > { %v3477_v10 = vpop.xlane.xlu1 %3476 }
 0x6a7   : > { %v3504_v23 = vsub.f32 %v8014_v46, %v3477_v10  ;;  %6405 = vpow2.f32 %v3520_v25 }
 0x6a9   : > { %v3524_v33 = vmul.f32 1.442695, %v3504_v23 }
 0x6aa   : > { %v3625_v38 = vpop.permute.xlu1 %3624 }
 0x6ab   : > { %5876 = vmatprep.subr.bf16.mxu0 %v3625_v38 }
 0x6ac   : > { %5877 = vmatpush3.bf16.msra.mxu0 %v3625_v38 }
 0x6b1   : > { %3634 = vrot.lane.b32.xlu0 %v10275_v56, %s6968_s9 }
 0x6b2   : > { %v3479_v22 = vpop.xlane.xlu0 %3478 }
 0x6b3   : > { %v3505_v44 = vsub.f32 %v8019_v6, %v3479_v22 }
 0x6b5   : > { %v3526_v47 = vmul.f32 1.442695, %v3505_v44 }
 0x6b6   : > { %v3483_v11 = vpop.xlane.xlu0 %3482 }
 0x6b7   : > { %6407 = vpow2.f32 %v3526_v47  ;;  %v3507_v44 = vsub.f32 %v8016_v42, %v3483_v11 }
 0x6b8   : > { %6409 = vpow2.f32 %v3522_v15 }
 0x6b9   : > { %6411 = vpow2.f32 %v3524_v33 }
 0x6ba   : > { %v3627_v9 = vpop.permute.xlu0 %3626 }
 0x6bb   : > { %5878 = vmatprep.subr.bf16.mxu0 %v3627_v9 }
 0x6bc   : > { %5879 = vmatpush3.bf16.msra.mxu0 %v3627_v9 }
 0x6c0   : > { %3496 = vmax.xlane.f32.xlu1 %v8044_v0 }
 0x6c4   : > { %3976 = vmax.xlane.f32.xlu1 %v10378_v50 }
 0x6d0   : > { %3978 = vmax.xlane.f32.xlu0 %v10379_v58 }
 0x6d4   : > { %3982 = vmax.xlane.f32.xlu0 %v10380_v7 }
 0x6d5   : > { %4128 = vrot.lane.b32.xlu1 %v10280_v55, %s6970_s12 }
 0x6db   : > { %v3481_v38 = vpop.xlane.xlu1 %3480 }
 0x6dc   : > { %v3506_v28 = vsub.f32 %v8012_v51, %v3481_v38  ;;  %v3530_v51 = vmul.f32 1.442695, %v3507_v44 }
 0x6de   : > { %v3528_v12 = vmul.f32 1.442695, %v3506_v28 }
 0x6df   : > { %v3485_v21 = vpop.xlane.xlu1 %3484 }
 0x6e0   : > { %v3508_v41 = vsub.f32 %v8028_v13, %v3485_v21  ;;  %6413 = vpow2.f32 %v3528_v12  ;;  %v8732_v13 = vpop.eup %6405 }
 0x6e1   : > { %v8736_v11 = vpop.eup %6407 }
 0x6e2   : > { %v3532_v47 = vmul.f32 1.442695, %v3508_v41  ;;  %10393 = vst [vmem:[#allocation156_spill] sm:$0xff] %v8736_v11 }
 0x6e3   : > { %v3629_v31 = vpop.permute.xlu1 %3628 }
 0x6e4   : > { %5880 = vmatprep.subr.bf16.mxu0 %v3629_v31 }
 0x6e5   : > { %5881 = vmatpush3.bf16.msra.mxu0 %v3629_v31 }
 0x6ea   : > { %4130 = vrot.lane.b32.xlu0 %v10281_v5, %s6970_s12 }
 0x6eb   : > { %v3487_v9 = vpop.xlane.xlu0 %3486 }
 0x6ec   : > { %v3509_v6 = vsub.f32 %v10369_v17, %v3487_v9 }
 0x6ee   : > { %v3534_v23 = vmul.f32 1.442695, %v3509_v6 }
 0x6ef   : > { %v8696_v24 = vpop.xlane.xlu0 %3490 }
 0x6f0   : > { %6415 = vpow2.f32 %v3534_v23  ;;  %v3511_v21 = vsub.f32 %v10370_v61, %v8696_v24 }
 0x6f1   : > { %6417 = vpow2.f32 %v3530_v51  ;;  %v10403_v51 = vld [vmem:[#allocation88_spill] sm:$0xff] }
 0x6f2   : > { %6419 = vpow2.f32 %v3532_v47  ;;  %v3538_v28 = vmul.f32 1.442695, %v3511_v21 }
 0x6f3   : > { %v3631_v49 = vpop.permute.xlu0 %3630 }
 0x6f4   : > { %5882 = vmatprep.subr.bf16.mxu0 %v3631_v49 }
 0x6f5   : > { %5883 = vmatpush3.bf16.msra.mxu0 %v3631_v49 }
 0x6f9   : > { %3980 = vmax.xlane.f32.xlu1 %v10381_v30 }
 0x6fd   : > { %3984 = vmax.xlane.f32.xlu1 %v10382_v3 }
 0x709   : > { %3986 = vmax.xlane.f32.xlu0 %v10383_v43 }
 0x70d   : > { %3990 = vmax.xlane.f32.xlu0 %v10384_v57 }
 0x70e   : > { %4132 = vrot.lane.b32.xlu1 %v10286_v8, %s6970_s12 }
 0x714   : > { %v3489_v31 = vpop.xlane.xlu1 %3488 }
 0x715   : > { %v3510_v10 = vsub.f32 %v10377_v60, %v3489_v31  ;;  %v8739_v60 = vpop.eup %6409 }
 0x717   : > { %v3536_v9 = vmul.f32 1.442695, %v3510_v10 }
 0x718   : > { %v3493_v32 = vpop.xlane.xlu1 %3492 }
 0x719   : > { %v3512_v38 = vsub.f32 %v8046_v35, %v3493_v32  ;;  %6421 = vpow2.f32 %v3536_v9  ;;  %v10397_v35 = vld [vmem:[#allocation84_spill] sm:$0xff] }
 0x71b   : > { %v3540_v61 = vmul.f32 1.442695, %v3512_v38 }
 0x71c   : > { %v3633_v49 = vpop.permute.xlu1 %3632 }
 0x71d   : > { %5884 = vmatprep.subr.bf16.mxu0 %v3633_v49 }
 0x71e   : > { %5885 = vmatpush3.bf16.msra.mxu0 %v3633_v49  ;;  %v3597_v49 = vpack.c.bf16 %v8739_v60, %v8732_v13 }
 0x720   : > { %v8708_v14 = vpop.f32.mrb[96].mxu0 }
 0x721   : > { %10385 = vst [vmem:[#allocation77_spill] sm:$0xff] %v8708_v14  ;;  %v8710_v19 = vpop.f32.mrb[97].mxu0  ;;  %v10424_v14 = vld [vmem:[#allocation100_spill] sm:$0xff] }
 0x722   : > { %10386 = vst [vmem:[#allocation81_spill] sm:$0xff] %v8710_v19  ;;  %v8713_v45 = vpop.f32.mrb[98].mxu0  ;;  %v10426_v19 = vld [vmem:[#allocation105_spill] sm:$0xff] }
 0x723   : > { %10387 = vst [vmem:[#allocation83_spill] sm:$0xff] %v8713_v45  ;;  %4134 = vrot.lane.b32.xlu0 %v10292_v29, %s6970_s12  ;;  %v8718_v46 = vpop.f32.mrb[99].mxu0 }
 0x724   : > { %10388 = vst [vmem:[#allocation82_spill] sm:$0xff] %v8718_v46  ;;  %v3495_v26 = vpop.xlane.xlu0 %3494  ;;  %v10427_v46 = vld [vmem:[#allocation109_spill] sm:$0xff] }
 0x725   : > { %v3513_v42 = vsub.f32 %v8052_v27, %v3495_v26  ;;  %v8741_v27 = vpop.eup %6411 }
 0x726   : > { %10394 = vst [vmem:[#allocation157_spill] sm:$0xff] %v8741_v27  ;;  %v3598_v24 = vpack.c.bf16 %v8736_v11, %v8741_v27  ;;  %v8756_v41 = vpop.eup %6413 }
 0x727   : > { %v3542_v31 = vmul.f32 1.442695, %v3513_v42  ;;  %10400 = vst [vmem:[#allocation161_spill] sm:$0xff] %v8756_v41  ;;  %v8758_v12 = vpop.eup %6415 }
 0x728   : > { %v3499_v25 = vpop.xlane.xlu0 %3498  ;;  %v8722_v59 = vpop.f32.mrb[100].mxu0  ;;  %10401 = vst [vmem:[#allocation162_spill] sm:$0xff] %v8758_v12 }
 0x729   : > { %10389 = vst [vmem:[#allocation80_spill] sm:$0xff] %v8722_v59  ;;  %v8724_v17 = vpop.f32.mrb[101].mxu0  ;;  %6423 = vpow2.f32 %v3542_v31  ;;  %v8760_v23 = vpop.eup %6417 }
 0x72a   : > { %10390 = vst [vmem:[#allocation85_spill] sm:$0xff] %v8724_v17  ;;  %v8727_v22 = vpop.f32.mrb[102].mxu0  ;;  %6425 = vpow2.f32 %v3538_v28  ;;  %10402 = vst [vmem:[#allocation163_spill] sm:$0xff] %v8760_v23  ;;  %v8763_v47 = vpop.eup %6419  ;;  %v3599_v10 = vpack.c.bf16 %v8760_v23, %v8756_v41  ;;  %v10409_v28 = vld [vmem:[#allocation90_spill] sm:$0xff] }
 0x72b   : > { %10391 = vst [vmem:[#allocation29_spill] sm:$0xff] %v8727_v22  ;;  %v8730_v33 = vpop.f32.mrb[103].mxu0  ;;  %6427 = vpow2.f32 %v3540_v61  ;;  %10404 = vst [vmem:[#allocation88_spill] sm:$0xff] %v8763_v47  ;;  %v3600_v42 = vpack.c.bf16 %v8758_v12, %v8763_v47  ;;  %v8769_v21 = vpop.eup %6421  ;;  %v3515_v61 = vsub.f32 %v8049_v62, %v3499_v25  ;;  %v10423_v17 = vld [vmem:[#allocation102_spill] sm:$0xff] }
 0x72c   : > { %10392 = vst [vmem:[#allocation86_spill] sm:$0xff] %v8730_v33  ;;  %v3635_v15 = vpop.permute.xlu0 %3634  ;;  %10405 = vst [vmem:[#allocation164_spill] sm:$0xff] %v8769_v21  ;;  %v10422_v33 = vld [vmem:[#allocation98_spill] sm:$0xff] }
 0x72d   : > { %5886 = vmatprep.subr.bf16.mxu0 %v3635_v15 }
 0x72e   : > { %5887 = vmatpush3.bf16.msra.mxu0 %v3635_v15 }
 0x730   : > { %v8745_v6 = vpop.f32.mrb[104].mxu0 }
 0x731   : > { %10395 = vst [vmem:[#allocation158_spill] sm:$0xff] %v8745_v6  ;;  %v8749_v44 = vpop.f32.mrb[105].mxu0  ;;  %5889 = vmatmul.mubr.bf16.vlgmr.msra.gmra.mrb[112].mxu0 %v3597_v49 }
 0x732   : > { %10396 = vst [vmem:[#allocation159_spill] sm:$0xff] %v8749_v44  ;;  %3988 = vmax.xlane.f32.xlu1 %v10397_v35  ;;  %v8752_v32 = vpop.f32.mrb[106].mxu0  ;;  %5892 = vmatprep.mubr.bf16.mxu0 %v3598_v24  ;;  %v10410_v24 = vld [vmem:[#allocation89_spill] sm:$0xff] }
 0x733   : > { %10398 = vst [vmem:[#allocation84_spill] sm:$0xff] %v8752_v32  ;;  %v8754_v26 = vpop.f32.mrb[107].mxu0  ;;  %v8771_v15 = vpop.eup %6423 }
 0x734   : > { %10399 = vst [vmem:[#allocation160_spill] sm:$0xff] %v8754_v26  ;;  %10406 = vst [vmem:[#allocation165_spill] sm:$0xff] %v8771_v15  ;;  %v8773_v38 = vpop.eup %6425 }
 0x735   : > { %10407 = vst [vmem:[#allocation166_spill] sm:$0xff] %v8773_v38  ;;  %v8775_v9 = vpop.eup %6427  ;;  %v3601_v31 = vpack.c.bf16 %v8773_v38, %v8769_v21 }
 0x736   : > { %3992 = vmax.xlane.f32.xlu1 %v10403_v51  ;;  %10408 = vst [vmem:[#allocation167_spill] sm:$0xff] %v8775_v9  ;;  %v3602_v49 = vpack.c.bf16 %v8771_v15, %v8775_v9  ;;  %v10425_v15 = vld [vmem:[#allocation96_spill] sm:$0xff] }
 0x739   : > { %5893 = vmatmul.mubr.bf16.gmra.mrb[116].mxu0 %v3599_v10  ;;  %v3546_v10 = vmul.f32 1.442695, %v3515_v61 }
 0x73a   : > { %5896 = vmatprep.mubr.bf16.mxu0 %v3600_v42 }
 0x73b   : > { %6429 = vpow2.f32 %v3546_v10 }
 0x741   : > { %5897 = vmatmul.mubr.bf16.gmra.mrb[120].mxu0 %v3601_v31 }
 0x742   : > { %3994 = vmax.xlane.f32.xlu0 %v10409_v28  ;;  %5900 = vmatprep.mubr.bf16.mxu0 %v3602_v49 }
 0x745   : > { %v8796_v25 = vpop.eup %6429 }
 0x746   : > { %3998 = vmax.xlane.f32.xlu0 %v10410_v24  ;;  %10415 = vst [vmem:[#allocation170_spill] sm:$0xff] %v8796_v25 }
 0x747   : > { %4136 = vrot.lane.b32.xlu1 %v10210_v16, %s6970_s12 }
 0x74d   : > { %v3497_v42 = vpop.xlane.xlu1 %3496 }
 0x74e   : > { %v3514_v32 = vsub.f32 %v8044_v0, %v3497_v42  ;;  %v8787_v6 = vpop.f32.mrb[108].mxu0 }
 0x74f   : > { %10411 = vst [vmem:[#allocation90_spill] sm:$0xff] %v8787_v6  ;;  %v8789_v26 = vpop.f32.mrb[109].mxu0 }
 0x750   : > { %10412 = vst [vmem:[#allocation89_spill] sm:$0xff] %v8789_v26  ;;  %v3544_v44 = vmul.f32 1.442695, %v3514_v32  ;;  %v8791_v31 = vpop.f32.mrb[110].mxu0 }
 0x751   : > { %10413 = vst [vmem:[#allocation168_spill] sm:$0xff] %v8791_v31  ;;  %v3977_v49 = vpop.xlane.xlu1 %3976  ;;  %v8793_v22 = vpop.f32.mrb[111].mxu0  ;;  %v10417_v31 = vld [vmem:[#allocation87_spill] sm:$0xff] }
 0x752   : > { %10414 = vst [vmem:[#allocation169_spill] sm:$0xff] %v8793_v22  ;;  %6431 = vpow2.f32 %v3544_v44  ;;  %v4008_v62 = vsub.f32 %v10378_v50, %v3977_v49  ;;  %v10418_v22 = vld [vmem:[#allocation92_spill] sm:$0xff] }
 0x754   : > { %v4024_v32 = vmul.f32 1.442695, %v4008_v62 }
 0x755   : > { %v4129_v59 = vpop.permute.xlu1 %4128 }
 0x756   : > { %5922 = vmatprep.subr.bf16.mxu0 %v4129_v59  ;;  %6433 = vpow2.f32 %v4024_v32  ;;  %v10420_v32 = vld [vmem:[#allocation93_spill] sm:$0xff] }
 0x757   : > { %5923 = vmatpush3.bf16.msra.mxu0 %v4129_v59 }
 0x75c   : > { %v8798_v0 = vpop.eup %6431  ;;  %4138 = vrot.lane.b32.xlu0 %v10233_v34, %s6970_s12 }
 0x75d   : > { %10416 = vst [vmem:[#allocation171_spill] sm:$0xff] %v8798_v0  ;;  %v3979_v61 = vpop.xlane.xlu0 %3978  ;;  %v3603_v10 = vpack.c.bf16 %v8796_v25, %v8798_v0 }
 0x75e   : > { %v4009_v42 = vsub.f32 %v10379_v58, %v3979_v61  ;;  %v10419_v58 = vld [vmem:[#allocation94_spill] sm:$0xff] }
 0x75f   : > { %5901 = vmatmul.mubr.bf16.gmra.mrb[124].mxu0 %v3603_v10 }
 0x760   : > { %v4026_v44 = vmul.f32 1.442695, %v4009_v42  ;;  %v8805_v49 = vpop.eup %6433 }
 0x761   : > { %v3983_v59 = vpop.xlane.xlu0 %3982 }
 0x762   : > { %6435 = vpow2.f32 %v4026_v44  ;;  %v4011_v38 = vsub.f32 %v10380_v7, %v3983_v59 }
 0x764   : > { %v4030_v23 = vmul.f32 1.442695, %v4011_v38 }
 0x765   : > { %v4131_v50 = vpop.permute.xlu0 %4130 }
 0x766   : > { %5924 = vmatprep.subr.bf16.mxu0 %v4131_v50 }
 0x767   : > { %5925 = vmatpush3.bf16.msra.mxu0 %v4131_v50 }
 0x76b   : > { %3996 = vmax.xlane.f32.xlu1 %v10417_v31 }
 0x76c   : > { %v8808_v6 = vpop.eup %6435 }
 0x76d   : > { %v4104_v62 = vpack.c.bf16 %v8808_v6, %v8805_v49 }
 0x76f   : > { %4000 = vmax.xlane.f32.xlu1 %v10418_v22  ;;  %5938 = vmatprep.mubr.bf16.mxu0 %v4104_v62  ;;  %v10421_v62 = vld [vmem:[#allocation91_spill] sm:$0xff] }
 0x77b   : > { %4002 = vmax.xlane.f32.xlu0 %v10419_v58 }
 0x77f   : > { %4006 = vmax.xlane.f32.xlu0 %v10420_v32 }
 0x780   : > { %4140 = vrot.lane.b32.xlu1 %v10270_v63, %s6970_s12 }
 0x786   : > { %v3981_v61 = vpop.xlane.xlu1 %3980 }
 0x78a   : > { %v3985_v10 = vpop.xlane.xlu1 %3984 }
 0x78b   : > { %v4012_v12 = vsub.f32 %v10382_v3, %v3985_v10 }
 0x78d   : > { %v4032_v36 = vmul.f32 1.442695, %v4012_v12 }
 0x78e   : > { %v4133_v42 = vpop.permute.xlu1 %4132 }
 0x78f   : > { %5926 = vmatprep.subr.bf16.mxu0 %v4133_v42 }
 0x790   : > { %5927 = vmatpush3.bf16.msra.mxu0 %v4133_v42 }
 0x795   : > { %4142 = vrot.lane.b32.xlu0 %v10275_v56, %s6970_s12 }
 0x796   : > { %v3987_v44 = vpop.xlane.xlu0 %3986 }
 0x797   : > { %v4013_v47 = vsub.f32 %v10383_v43, %v3987_v44 }
 0x799   : > { %v4034_v27 = vmul.f32 1.442695, %v4013_v47 }
 0x79a   : > { %v3991_v50 = vpop.xlane.xlu0 %3990 }
 0x79b   : > { %v4015_v3 = vsub.f32 %v10384_v57, %v3991_v50 }
 0x79e   : > { %v4135_v26 = vpop.permute.xlu0 %4134 }
 0x79f   : > { %5928 = vmatprep.subr.bf16.mxu0 %v4135_v26 }
 0x7a0   : > { %5929 = vmatpush3.bf16.msra.mxu0 %v4135_v26 }
 0x7a4   : > { %4004 = vmax.xlane.f32.xlu1 %v10421_v62 }
 0x7a8   : > { %4484 = vmax.xlane.f32.xlu1 %v10422_v33 }
 0x7b4   : > { %4486 = vmax.xlane.f32.xlu0 %v10423_v17 }
 0x7b8   : > { %4490 = vmax.xlane.f32.xlu0 %v10424_v14 }
 0x7b9   : > { %4636 = vrot.lane.b32.xlu1 %v10280_v55, %s6971_s10  ;;  %v10428_v55 = vld [vmem:[#allocation107_spill] sm:$0xff] }
 0x7bf   : > { %v3989_v42 = vpop.xlane.xlu1 %3988 }
 0x7c3   : > { %v3993_v45 = vpop.xlane.xlu1 %3992 }
 0x7c4   : > { %v4016_v12 = vsub.f32 %v10403_v51, %v3993_v45 }
 0x7c7   : > { %v4137_v0 = vpop.permute.xlu1 %4136 }
 0x7c8   : > { %5930 = vmatprep.subr.bf16.mxu0 %v4137_v0 }
 0x7c9   : > { %5931 = vmatpush3.bf16.msra.mxu0 %v4137_v0 }
 0x7ce   : > { %4638 = vrot.lane.b32.xlu0 %v10281_v5, %s6971_s10  ;;  %v4010_v5 = vsub.f32 %v10381_v30, %v3981_v61  ;;  %v4014_v30 = vsub.f32 %v10397_v35, %v3989_v42  ;;  %v4038_v35 = vmul.f32 1.442695, %v4015_v3 }
 0x7cf   : > { %v3995_v26 = vpop.xlane.xlu0 %3994 }
 0x7d0   : > { %v4028_v41 = vmul.f32 1.442695, %v4010_v5  ;;  %v4017_v7 = vsub.f32 %v10409_v28, %v3995_v26 }
 0x7d2   : > { %6437 = vpow2.f32 %v4028_v41  ;;  %v4036_v41 = vmul.f32 1.442695, %v4014_v30  ;;  %v4042_v38 = vmul.f32 1.442695, %v4017_v7 }
 0x7d3   : > { %v8827_v9 = vpop.xlane.xlu0 %3998  ;;  %6439 = vpow2.f32 %v4034_v27  ;;  %v4040_v27 = vmul.f32 1.442695, %v4016_v12 }
 0x7d4   : > { %6441 = vpow2.f32 %v4030_v23  ;;  %v4019_v23 = vsub.f32 %v10410_v24, %v8827_v9 }
 0x7d5   : > { %6443 = vpow2.f32 %v4032_v36 }
 0x7d6   : > { %6445 = vpow2.f32 %v4036_v41 }
 0x7d7   : > { %v4139_v25 = vpop.permute.xlu0 %4138  ;;  %6447 = vpow2.f32 %v4042_v38  ;;  %v10436_v38 = vld [vmem:[#allocation111_spill] sm:$0xff] }
 0x7d8   : > { %5932 = vmatprep.subr.bf16.mxu0 %v4139_v25  ;;  %6449 = vpow2.f32 %v4038_v35 }
 0x7d9   : > { %5933 = vmatpush3.bf16.msra.mxu0 %v4139_v25  ;;  %6451 = vpow2.f32 %v4040_v27 }
 0x7dc   : > { %v8863_v45 = vpop.eup %6437 }
 0x7dd   : > { %4488 = vmax.xlane.f32.xlu1 %v10425_v15  ;;  %v8867_v50 = vpop.eup %6439 }
 0x7e1   : > { %4492 = vmax.xlane.f32.xlu1 %v10426_v19 }
 0x7ed   : > { %4494 = vmax.xlane.f32.xlu0 %v10427_v46 }
 0x7f1   : > { %4498 = vmax.xlane.f32.xlu0 %v10428_v55 }
 0x7f2   : > { %4640 = vrot.lane.b32.xlu1 %v10286_v8, %s6971_s10 }
 0x7f8   : > { %v3997_v0 = vpop.xlane.xlu1 %3996 }
 0x7fc   : > { %v4001_v21 = vpop.xlane.xlu1 %4000 }
 0x7fd   : > { %v4020_v42 = vsub.f32 %v10418_v22, %v4001_v21  ;;  %v10433_v22 = vld [vmem:[#allocation103_spill] sm:$0xff] }
 0x7ff   : > { %v4048_v24 = vmul.f32 1.442695, %v4020_v42 }
 0x800   : > { %v4141_v25 = vpop.permute.xlu1 %4140 }
 0x801   : > { %5934 = vmatprep.subr.bf16.mxu0 %v4141_v25 }
 0x802   : > { %5935 = vmatpush3.bf16.msra.mxu0 %v4141_v25  ;;  %v4046_v25 = vmul.f32 1.442695, %v4019_v23 }
 0x804   : > { %v8839_v11 = vpop.f32.mrb[112].mxu0 }
 0x805   : > { %v8841_v8 = vpop.f32.mrb[113].mxu0 }
 0x806   : > { %v8844_v61 = vpop.f32.mrb[114].mxu0 }
 0x807   : > { %4642 = vrot.lane.b32.xlu0 %v10292_v29, %s6971_s10  ;;  %v8849_v43 = vpop.f32.mrb[115].mxu0  ;;  %v4018_v29 = vsub.f32 %v10417_v31, %v3997_v0  ;;  %v8870_v31 = vpop.eup %6441 }
 0x808   : > { %v4003_v47 = vpop.xlane.xlu0 %4002  ;;  %v4105_v5 = vpack.c.bf16 %v8870_v31, %v8863_v45 }
 0x809   : > { %v4021_v57 = vsub.f32 %v10419_v58, %v4003_v47  ;;  %v4044_v26 = vmul.f32 1.442695, %v4018_v29  ;;  %v8872_v58 = vpop.eup %6443 }
 0x80a   : > { %v4106_v9 = vpack.c.bf16 %v8867_v50, %v8872_v58  ;;  %v8887_v47 = vpop.eup %6445 }
 0x80b   : > { %v4050_v0 = vmul.f32 1.442695, %v4021_v57  ;;  %6453 = vpow2.f32 %v4044_v26  ;;  %v8889_v12 = vpop.eup %6447 }
 0x80c   : > { %v4007_v59 = vpop.xlane.xlu0 %4006  ;;  %v8853_v10 = vpop.f32.mrb[116].mxu0 }
 0x80d   : > { %10429 = vst [vmem:[#allocation87_spill] sm:$0xff] %v8853_v10  ;;  %v8855_v28 = vpop.f32.mrb[117].mxu0  ;;  %6455 = vpow2.f32 %v4050_v0  ;;  %v8891_v41 = vpop.eup %6449 }
 0x80e   : > { %v8858_v44 = vpop.f32.mrb[118].mxu0  ;;  %6457 = vpow2.f32 %v4046_v25  ;;  %v8894_v35 = vpop.eup %6451  ;;  %v4107_v27 = vpack.c.bf16 %v8891_v41, %v8887_v47  ;;  %v10438_v25 = vld [vmem:[#allocation113_spill] sm:$0xff] }
 0x80f   : > { %10430 = vst [vmem:[#allocation92_spill] sm:$0xff] %v8858_v44  ;;  %v8861_v36 = vpop.f32.mrb[119].mxu0  ;;  %6459 = vpow2.f32 %v4048_v24  ;;  %v4108_v29 = vpack.c.bf16 %v8889_v12, %v8894_v35 }
 0x810   : > { %v4143_v51 = vpop.permute.xlu0 %4142 }
 0x811   : > { %5936 = vmatprep.subr.bf16.mxu0 %v4143_v51 }
 0x812   : > { %5937 = vmatpush3.bf16.msra.mxu0 %v4143_v51 }
 0x814   : > { %v8876_v30 = vpop.f32.mrb[120].mxu0 }
 0x815   : > { %10431 = vst [vmem:[#allocation94_spill] sm:$0xff] %v8876_v30  ;;  %v8880_v7 = vpop.f32.mrb[121].mxu0  ;;  %5939 = vmatmul.mubr.bf16.vlgmr.msra.gmra.mrb[128].mxu0 %v4105_v5  ;;  %v8900_v57 = vpop.eup %6453  ;;  %v10437_v5 = vld [vmem:[#allocation115_spill] sm:$0xff] }
 0x816   : > { %10432 = vst [vmem:[#allocation93_spill] sm:$0xff] %v8880_v7  ;;  %4496 = vmax.xlane.f32.xlu1 %v10433_v22  ;;  %v8883_v21 = vpop.f32.mrb[122].mxu0  ;;  %5942 = vmatprep.mubr.bf16.mxu0 %v4106_v9  ;;  %v4023_v9 = vsub.f32 %v10420_v32, %v4007_v59 }
 0x817   : > { %10434 = vst [vmem:[#allocation91_spill] sm:$0xff] %v8883_v21  ;;  %v8885_v3 = vpop.f32.mrb[123].mxu0  ;;  %v8902_v23 = vpop.eup %6455 }
 0x818   : > { %10435 = vst [vmem:[#allocation98_spill] sm:$0xff] %v8885_v3  ;;  %v8904_v51 = vpop.eup %6457  ;;  %v4054_v24 = vmul.f32 1.442695, %v4023_v9 }
 0x819   : > { %v8906_v42 = vpop.eup %6459  ;;  %v4109_v26 = vpack.c.bf16 %v8904_v51, %v8900_v57 }
 0x81a   : > { %4500 = vmax.xlane.f32.xlu1 %v10436_v38  ;;  %v4110_v0 = vpack.c.bf16 %v8902_v23, %v8906_v42  ;;  %6461 = vpow2.f32 %v4054_v24 }
 0x81d   : > { %5943 = vmatmul.mubr.bf16.gmra.mrb[132].mxu0 %v4107_v27 }
 0x81e   : > { %5946 = vmatprep.mubr.bf16.mxu0 %v4108_v29 }
 0x824   : > { %v8927_v32 = vpop.eup %6461 }
 0x825   : > { %5947 = vmatmul.mubr.bf16.gmra.mrb[136].mxu0 %v4109_v26 }
 0x826   : > { %4502 = vmax.xlane.f32.xlu0 %v10437_v5  ;;  %5950 = vmatprep.mubr.bf16.mxu0 %v4110_v0 }
 0x82a   : > { %4506 = vmax.xlane.f32.xlu0 %v10438_v25 }
 0x82b   : > { %4644 = vrot.lane.b32.xlu1 %v10210_v16, %s6971_s10 }
 0x831   : > { %v4005_v27 = vpop.xlane.xlu1 %4004 }
 0x832   : > { %v4022_v29 = vsub.f32 %v10421_v62, %v4005_v27  ;;  %v8918_v21 = vpop.f32.mrb[124].mxu0 }
 0x833   : > { %10439 = vst [vmem:[#allocation102_spill] sm:$0xff] %v8918_v21  ;;  %v8920_v30 = vpop.f32.mrb[125].mxu0 }
 0x834   : > { %10440 = vst [vmem:[#allocation100_spill] sm:$0xff] %v8920_v30  ;;  %v4052_v3 = vmul.f32 1.442695, %v4022_v29  ;;  %v8922_v26 = vpop.f32.mrb[126].mxu0 }
 0x835   : > { %10441 = vst [vmem:[#allocation96_spill] sm:$0xff] %v8922_v26  ;;  %v4485_v0 = vpop.xlane.xlu1 %4484  ;;  %v8924_v7 = vpop.f32.mrb[127].mxu0  ;;  %v10444_v26 = vld [vmem:[#allocation26_spill] sm:$0xff] }
 0x836   : > { %10442 = vst [vmem:[#allocation105_spill] sm:$0xff] %v8924_v7  ;;  %6463 = vpow2.f32 %v4052_v3  ;;  %v4516_v16 = vsub.f32 %v10422_v33, %v4485_v0  ;;  %v10443_v0 = vld [vmem:[#allocation31_spill] sm:$0xff] }
 0x838   : > { %v4532_v59 = vmul.f32 1.442695, %v4516_v16 }
 0x839   : > { %v4637_v44 = vpop.permute.xlu1 %4636 }
 0x83a   : > { %5972 = vmatprep.subr.bf16.mxu0 %v4637_v44  ;;  %6465 = vpow2.f32 %v4532_v59  ;;  %v10446_v59 = vld [vmem:[#allocation33_spill] sm:$0xff] }
 0x83b   : > { %5973 = vmatpush3.bf16.msra.mxu0 %v4637_v44 }
 0x840   : > { %v8929_v62 = vpop.eup %6463  ;;  %4646 = vrot.lane.b32.xlu0 %v10233_v34, %s6971_s10 }
 0x841   : > { %v4487_v9 = vpop.xlane.xlu0 %4486  ;;  %v4111_v24 = vpack.c.bf16 %v8927_v32, %v8929_v62 }
 0x842   : > { %v4517_v27 = vsub.f32 %v10423_v17, %v4487_v9  ;;  %v10445_v17 = vld [vmem:[#allocation121_spill] sm:$0xff] }
 0x843   : > { %5951 = vmatmul.mubr.bf16.gmra.mrb[140].mxu0 %v4111_v24 }
 0x844   : > { %v4534_v3 = vmul.f32 1.442695, %v4517_v27  ;;  %v8936_v29 = vpop.eup %6465 }
 0x845   : > { %v4491_v44 = vpop.xlane.xlu0 %4490 }
 0x846   : > { %6467 = vpow2.f32 %v4534_v3  ;;  %v4519_v9 = vsub.f32 %v10424_v14, %v4491_v44 }
 0x848   : > { %v4538_v24 = vmul.f32 1.442695, %v4519_v9 }
 0x849   : > { %v4639_v33 = vpop.permute.xlu0 %4638 }
 0x84a   : > { %5974 = vmatprep.subr.bf16.mxu0 %v4639_v33  ;;  %6469 = vpow2.f32 %v4538_v24 }
 0x84b   : > { %5975 = vmatpush3.bf16.msra.mxu0 %v4639_v33 }
 0x84f   : > { %4504 = vmax.xlane.f32.xlu1 %v10443_v0 }
 0x850   : > { %v8939_v34 = vpop.eup %6467 }
 0x851   : > { %v4612_v16 = vpack.c.bf16 %v8939_v34, %v8936_v29 }
 0x853   : > { %4508 = vmax.xlane.f32.xlu1 %v10444_v26  ;;  %5988 = vmatprep.mubr.bf16.mxu0 %v4612_v16 }
 0x854   : > { %v8951_v30 = vpop.eup %6469 }
 0x85f   : > { %4510 = vmax.xlane.f32.xlu0 %v10445_v17 }
 0x863   : > { %4514 = vmax.xlane.f32.xlu0 %v10446_v59 }
 0x864   : > { %4648 = vrot.lane.b32.xlu1 %v10270_v63, %s6971_s10 }
 0x86a   : > { %v4489_v27 = vpop.xlane.xlu1 %4488 }
 0x86b   : > { %v4518_v3 = vsub.f32 %v10425_v15, %v4489_v27 }
 0x86d   : > { %v4536_v33 = vmul.f32 1.442695, %v4518_v3  ;;  %v10448_v3 = vld [vmem:[#allocation95_spill] sm:$0xff] }
 0x86e   : > { %v4493_v21 = vpop.xlane.xlu1 %4492 }
 0x86f   : > { %6471 = vpow2.f32 %v4536_v33  ;;  %v4520_v16 = vsub.f32 %v10426_v19, %v4493_v21  ;;  %v10447_v21 = vld [vmem:[#allocation118_spill] sm:$0xff]  ;;  %v10449_v33 = vld [vmem:[#allocation101_spill] sm:$0xff] }
 0x871   : > { %v4540_v63 = vmul.f32 1.442695, %v4520_v16  ;;  %v10451_v16 = vld [vmem:[#allocation99_spill] sm:$0xff] }
 0x872   : > { %v4641_v7 = vpop.permute.xlu1 %4640 }
 0x873   : > { %5976 = vmatprep.subr.bf16.mxu0 %v4641_v7  ;;  %6473 = vpow2.f32 %v4540_v63  ;;  %v10452_v63 = vld [vmem:[#allocation32_spill] sm:$0xff] }
 0x874   : > { %5977 = vmatpush3.bf16.msra.mxu0 %v4641_v7 }
 0x879   : > { %v8953_v10 = vpop.eup %6471  ;;  %4650 = vrot.lane.b32.xlu0 %v10275_v56, %s6971_s10 }
 0x87a   : > { %v4495_v14 = vpop.xlane.xlu0 %4494  ;;  %v4613_v15 = vpack.c.bf16 %v8951_v30, %v8953_v10 }
 0x87b   : > { %v4521_v44 = vsub.f32 %v10427_v46, %v4495_v14  ;;  %v10450_v46 = vld [vmem:[#allocation97_spill] sm:$0xff] }
 0x87c   : > { %v10453_v14 = vld [vmem:[#allocation57_spill] sm:$0xff] }
 0x87d   : > { %v4542_v9 = vmul.f32 1.442695, %v4521_v44  ;;  %v8960_v19 = vpop.eup %6473  ;;  %v10454_v44 = vld [vmem:[#allocation34_spill] sm:$0xff] }
 0x87e   : > { %v4499_v24 = vpop.xlane.xlu0 %4498 }
 0x87f   : > { %6475 = vpow2.f32 %v4542_v9  ;;  %v4523_v9 = vsub.f32 %v10428_v55, %v4499_v24 }
 0x881   : > { %v4546_v56 = vmul.f32 1.442695, %v4523_v9 }
 0x882   : > { %v4643_v7 = vpop.permute.xlu0 %4642 }
 0x883   : > { %5978 = vmatprep.subr.bf16.mxu0 %v4643_v7  ;;  %6477 = vpow2.f32 %v4546_v56 }
 0x884   : > { %5979 = vmatpush3.bf16.msra.mxu0 %v4643_v7  ;;  %v10455_v7 = vld [vmem:[#allocation35_spill] sm:$0xff] }
 0x888   : > { %4512 = vmax.xlane.f32.xlu1 %v10447_v21 }
 0x889   : > { %v8963_v27 = vpop.eup %6475 }
 0x88c   : > { %1516 = vadd.xlane.f32.xlu1 %v10448_v3 }
 0x890   : > { %1520 = vadd.xlane.f32.xlu1 %v10449_v33 }
 0x894   : > { %1522 = vadd.xlane.f32.xlu1 %v10450_v46  ;;  %v10456_v46 = vld [vmem:[#allocation122_spill] sm:$0xff] }
 0x898   : > { %1518 = vadd.xlane.f32.xlu0 %v10451_v16  ;;  %2024 = vadd.xlane.f32.xlu1 %v10452_v63 }
 0x89c   : > { %2534 = vadd.xlane.f32.xlu0 %v10453_v14  ;;  %2026 = vadd.xlane.f32.xlu1 %v10454_v44  ;;  %v10457_v14 = vld [vmem:[#allocation56_spill] sm:$0xff] }
 0x8a0   : > { %2538 = vadd.xlane.f32.xlu0 %v8421_v48  ;;  %2028 = vadd.xlane.f32.xlu1 %v10455_v7 }
 0x8a3   : > { %v4497_v3 = vpop.xlane.xlu1 %4496 }
 0x8a4   : > { %v4522_v33 = vsub.f32 %v10433_v22, %v4497_v3  ;;  %3042 = vadd.xlane.f32.xlu0 %v8529_v54  ;;  %2030 = vadd.xlane.f32.xlu1 %v10456_v46  ;;  %v8987_v54 = vpop.eup %6477 }
 0x8a6   : > { %v4544_v16 = vmul.f32 1.442695, %v4522_v33 }
 0x8a7   : > { %v4501_v63 = vpop.xlane.xlu1 %4500 }
 0x8a8   : > { %6479 = vpow2.f32 %v4544_v16  ;;  %3046 = vadd.xlane.f32.xlu0 %v8608_v37  ;;  %2532 = vadd.xlane.f32.xlu1 %v10457_v14  ;;  %v4524_v48 = vsub.f32 %v10436_v38, %v4501_v63  ;;  %v10458_v38 = vld [vmem:[#allocation106_spill] sm:$0xff]  ;;  %v10470_v63 = vld [vmem:[#allocation140_spill] sm:$0xff] }
 0x8aa   : > { %v4548_v37 = vmul.f32 1.442695, %v4524_v48 }
 0x8ab   : > { %v4645_v55 = vpop.permute.xlu1 %4644 }
 0x8ac   : > { %3550 = vadd.xlane.f32.xlu0 %v8677_v4  ;;  %2536 = vadd.xlane.f32.xlu1 %v8413_v18  ;;  %6481 = vpow2.f32 %v4548_v37 }
 0x8ad   : > { %5980 = vmatprep.subr.bf16.mxu0 %v4645_v55 }
 0x8ae   : > { %5981 = vmatpush3.bf16.msra.mxu0 %v4645_v55 }
 0x8b0   : > { %3554 = vadd.xlane.f32.xlu0 %v8739_v60  ;;  %3040 = vadd.xlane.f32.xlu1 %v8526_v2 }
 0x8b2   : > { %v8989_v22 = vpop.eup %6479 }
 0x8b3   : > { %v4503_v24 = vpop.xlane.xlu0 %4502  ;;  %v4615_v56 = vpack.c.bf16 %v8987_v54, %v8989_v22 }
 0x8b4   : > { %v4525_v4 = vsub.f32 %v10437_v5, %v4503_v24  ;;  %4058 = vadd.xlane.f32.xlu0 %v8808_v6  ;;  %3044 = vadd.xlane.f32.xlu1 %v8601_v53  ;;  %v10462_v5 = vld [vmem:[#allocation25_spill] sm:$0xff] }
 0x8b6   : > { %v4550_v18 = vmul.f32 1.442695, %v4525_v4  ;;  %v9002_v53 = vpop.eup %6481  ;;  %v10471_v4 = vld [vmem:[#allocation145_spill] sm:$0xff] }
 0x8b7   : > { %v4507_v60 = vpop.xlane.xlu0 %4506 }
 0x8b8   : > { %6483 = vpow2.f32 %v4550_v18  ;;  %4062 = vadd.xlane.f32.xlu0 %v8870_v31  ;;  %3548 = vadd.xlane.f32.xlu1 %v8674_v52  ;;  %v10459_v52 = vld [vmem:[#allocation104_spill] sm:$0xff]  ;;  %v4527_v44 = vsub.f32 %v10438_v25, %v4507_v60 }
 0x8b9   : > { %v10467_v25 = vld [vmem:[#allocation156_spill] sm:$0xff] }
 0x8ba   : > { %v4554_v9 = vmul.f32 1.442695, %v4527_v44 }
 0x8bb   : > { %v4647_v2 = vpop.permute.xlu0 %4646 }
 0x8bc   : > { %4566 = vadd.xlane.f32.xlu0 %v8939_v34  ;;  %3552 = vadd.xlane.f32.xlu1 %v8732_v13  ;;  %v10460_v13 = vld [vmem:[#allocation38_spill] sm:$0xff]  ;;  %v10463_v34 = vld [vmem:[#allocation108_spill] sm:$0xff]  ;;  %6485 = vpow2.f32 %v4554_v9 }
 0x8bd   : > { %5982 = vmatprep.subr.bf16.mxu0 %v4647_v2 }
 0x8be   : > { %5983 = vmatpush3.bf16.msra.mxu0 %v4647_v2  ;;  %v10472_v2 = vld [vmem:[#allocation157_spill] sm:$0xff] }
 0x8c0   : > { %4570 = vadd.xlane.f32.xlu0 %v8951_v30  ;;  %4056 = vadd.xlane.f32.xlu1 %v8805_v49  ;;  %v10461_v49 = vld [vmem:[#allocation36_spill] sm:$0xff] }
 0x8c2   : > { %v9004_v6 = vpop.eup %6483 }
 0x8c3   : > { %v4616_v31 = vpack.c.bf16 %v9004_v6, %v9002_v53 }
 0x8c4   : > { %1526 = vadd.xlane.f32.xlu0 %v10458_v38  ;;  %4060 = vadd.xlane.f32.xlu1 %v8863_v45  ;;  %v10464_v45 = vld [vmem:[#allocation39_spill] sm:$0xff] }
 0x8c8   : > { %1530 = vadd.xlane.f32.xlu0 %v10459_v52  ;;  %4564 = vadd.xlane.f32.xlu1 %v8936_v29  ;;  %v10465_v29 = vld [vmem:[#allocation37_spill] sm:$0xff] }
 0x8cc   : > { %2034 = vadd.xlane.f32.xlu0 %v10460_v13  ;;  %4568 = vadd.xlane.f32.xlu1 %v8953_v10  ;;  %v10485_v10 = vld [vmem:[#allocation52_spill] sm:$0xff] }
 0x8d0   : > { %2038 = vadd.xlane.f32.xlu0 %v10461_v49  ;;  %1524 = vadd.xlane.f32.xlu1 %v10462_v5 }
 0x8d4   : > { %2542 = vadd.xlane.f32.xlu0 %v8423_v20  ;;  %1528 = vadd.xlane.f32.xlu1 %v10463_v34  ;;  %v10466_v20 = vld [vmem:[#allocation27_spill] sm:$0xff]  ;;  %v10477_v34 = vld [vmem:[#allocation161_spill] sm:$0xff] }
 0x8d8   : > { %2546 = vadd.xlane.f32.xlu0 %v8437_v1  ;;  %2032 = vadd.xlane.f32.xlu1 %v10464_v45  ;;  %v10468_v1 = vld [vmem:[#allocation28_spill] sm:$0xff] }
 0x8dc   : > { %3050 = vadd.xlane.f32.xlu0 %v8605_v39  ;;  %2036 = vadd.xlane.f32.xlu1 %v10465_v29  ;;  %v4505_v7 = vpop.xlane.xlu1 %4504  ;;  %v10469_v39 = vld [vmem:[#allocation163_spill] sm:$0xff] }
 0x8dd   : > { %v4526_v3 = vsub.f32 %v10443_v0, %v4505_v7 }
 0x8df   : > { %v4552_v33 = vmul.f32 1.442695, %v4526_v3  ;;  %v10483_v3 = vld [vmem:[#allocation112_spill] sm:$0xff] }
 0x8e0   : > { %3054 = vadd.xlane.f32.xlu0 %v8629_v40  ;;  %2540 = vadd.xlane.f32.xlu1 %v10466_v20  ;;  %v4509_v46 = vpop.xlane.xlu1 %4508  ;;  %v9034_v40 = vpop.eup %6485  ;;  %v10492_v20 = vld [vmem:[#allocation146_spill] sm:$0xff] }
 0x8e1   : > { %6487 = vpow2.f32 %v4552_v33  ;;  %v4528_v44 = vsub.f32 %v10444_v26, %v4509_v46  ;;  %v10481_v26 = vpack.c.bf16 %v8963_v27, %v8960_v19  ;;  %v10493_v46 = vld [vmem:[#allocation43_spill] sm:$0xff] }
 0x8e3   : > { %v4556_v9 = vmul.f32 1.442695, %v4528_v44  ;;  %v10503_v44 = vld [vmem:[#allocation147_spill] sm:$0xff] }
 0x8e4   : > { %3558 = vadd.xlane.f32.xlu0 %v10467_v25  ;;  %2544 = vadd.xlane.f32.xlu1 %v10468_v1  ;;  %v4649_v16 = vpop.permute.xlu1 %4648 }
 0x8e5   : > { %5984 = vmatprep.subr.bf16.mxu0 %v4649_v16 }
 0x8e6   : > { %5985 = vmatpush3.bf16.msra.mxu0 %v4649_v16 }
 0x8e8   : > { %3562 = vadd.xlane.f32.xlu0 %v10469_v39  ;;  %3048 = vadd.xlane.f32.xlu1 %v10470_v63  ;;  %v9030_v0 = vpop.f32.mrb[128].mxu0 }
 0x8e9   : > { %v9032_v14 = vpop.f32.mrb[129].mxu0 }
 0x8ea   : > { %v9036_v55 = vpop.f32.mrb[130].mxu0 }
 0x8eb   : > { %v9038_v48 = vpop.eup %6487  ;;  %v9040_v37 = vpop.f32.mrb[131].mxu0 }
 0x8ec   : > { %v4511_v24 = vpop.xlane.xlu0 %4510  ;;  %4066 = vadd.xlane.f32.xlu0 %v8867_v50  ;;  %3052 = vadd.xlane.f32.xlu1 %v10471_v4  ;;  %v4617_v18 = vpack.c.bf16 %v9034_v40, %v9038_v48  ;;  %v10496_v4 = vld [vmem:[#allocation150_spill] sm:$0xff] }
 0x8ed   : > { %v4529_v49 = vsub.f32 %v10445_v17, %v4511_v24 }
 0x8f0   : > { %v4515_v60 = vpop.xlane.xlu0 %4514  ;;  %4070 = vadd.xlane.f32.xlu0 %v8891_v41  ;;  %3556 = vadd.xlane.f32.xlu1 %v10472_v2  ;;  %v9048_v38 = vpop.f32.mrb[132].mxu0  ;;  %v4558_v41 = vmul.f32 1.442695, %v4529_v49  ;;  %v10500_v49 = vld [vmem:[#allocation162_spill] sm:$0xff] }
 0x8f1   : > { %10473 = vst [vmem:[#allocation109_spill] sm:$0xff] %v9048_v38  ;;  %v9050_v52 = vpop.f32.mrb[133].mxu0  ;;  %v4531_v33 = vsub.f32 %v10446_v59, %v4515_v60 }
 0x8f2   : > { %10474 = vst [vmem:[#allocation107_spill] sm:$0xff] %v9050_v52  ;;  %v9052_v13 = vpop.f32.mrb[134].mxu0  ;;  %6489 = vpow2.f32 %v4558_v41 }
 0x8f3   : > { %10475 = vst [vmem:[#allocation103_spill] sm:$0xff] %v9052_v13  ;;  %v9055_v5 = vpop.f32.mrb[135].mxu0  ;;  %6491 = vpow2.f32 %v4556_v9  ;;  %v4562_v25 = vmul.f32 1.442695, %v4531_v33  ;;  %v10507_v33 = vld [vmem:[#allocation61_spill] sm:$0xff] }
 0x8f4   : > { %10476 = vst [vmem:[#allocation111_spill] sm:$0xff] %v9055_v5  ;;  %v4651_v50 = vpop.permute.xlu0 %4650  ;;  %4574 = vadd.xlane.f32.xlu0 %v8963_v27  ;;  %3560 = vadd.xlane.f32.xlu1 %v10477_v34  ;;  %v10487_v27 = vld [vmem:[#allocation30_spill] sm:$0xff] }
 0x8f5   : > { %5986 = vmatprep.subr.bf16.mxu0 %v4651_v50  ;;  %6493 = vpow2.f32 %v4562_v25  ;;  %v10502_v34 = vld [vmem:[#allocation166_spill] sm:$0xff]  ;;  %v10508_v25 = vld [vmem:[#allocation164_spill] sm:$0xff] }
 0x8f6   : > { %5987 = vmatpush3.bf16.msra.mxu0 %v4651_v50 }
 0x8f8   : > { %4578 = vadd.xlane.f32.xlu0 %v8987_v54  ;;  %4064 = vadd.xlane.f32.xlu1 %v8872_v58  ;;  %v9062_v45 = vpop.f32.mrb[136].mxu0  ;;  %v10484_v58 = vld [vmem:[#allocation110_spill] sm:$0xff] }
 0x8f9   : > { %10478 = vst [vmem:[#allocation115_spill] sm:$0xff] %v9062_v45  ;;  %v9064_v17 = vpop.f32.mrb[137].mxu0  ;;  %5989 = vmatmul.mubr.bf16.vlgmr.msra.gmra.mrb[144].mxu0 %v4613_v15  ;;  %v10486_v15 = vld [vmem:[#allocation55_spill] sm:$0xff]  ;;  %v10488_v54 = vld [vmem:[#allocation54_spill] sm:$0xff] }
 0x8fa   : > { %10479 = vst [vmem:[#allocation113_spill] sm:$0xff] %v9064_v17  ;;  %v9069_v29 = vpop.f32.mrb[138].mxu0  ;;  %5992 = vmatprep.mubr.bf16.mxu0 %v10481_v26 }
 0x8fb   : > { %10480 = vst [vmem:[#allocation31_spill] sm:$0xff] %v9069_v29  ;;  %v9074_v7 = vpop.f32.mrb[139].mxu0 }
 0x8fc   : > { %10482 = vst [vmem:[#allocation26_spill] sm:$0xff] %v9074_v7  ;;  %1534 = vadd.xlane.f32.xlu0 %v10483_v3  ;;  %4068 = vadd.xlane.f32.xlu1 %v8887_v47  ;;  %v9088_v30 = vpop.eup %6489  ;;  %v10504_v3 = vld [vmem:[#allocation148_spill] sm:$0xff] }
 0x8fd   : > { %v9090_v47 = vpop.eup %6491 }
 0x8ff   : > { %v9118_v9 = vpop.eup %6493 }
 0x900   : > { %1538 = vadd.xlane.f32.xlu0 %v10484_v58  ;;  %4572 = vadd.xlane.f32.xlu1 %v8960_v19  ;;  %v4618_v19 = vpack.c.bf16 %v9088_v30, %v9090_v47 }
 0x901   : > { %5993 = vmatmul.mubr.bf16.gmra.mrb[148].mxu0 %v4615_v56  ;;  %v10489_v56 = vld [vmem:[#allocation114_spill] sm:$0xff] }
 0x902   : > { %5996 = vmatprep.mubr.bf16.mxu0 %v4616_v31  ;;  %v10490_v31 = vld [vmem:[#allocation65_spill] sm:$0xff] }
 0x904   : > { %2042 = vadd.xlane.f32.xlu0 %v10485_v10  ;;  %4576 = vadd.xlane.f32.xlu1 %v8989_v22  ;;  %v10491_v22 = vld [vmem:[#allocation40_spill] sm:$0xff] }
 0x908   : > { %2046 = vadd.xlane.f32.xlu0 %v10486_v15  ;;  %1532 = vadd.xlane.f32.xlu1 %v10487_v27 }
 0x909   : > { %5997 = vmatmul.mubr.bf16.gmra.mrb[152].mxu0 %v4617_v18  ;;  %v10497_v18 = vld [vmem:[#allocation59_spill] sm:$0xff] }
 0x90a   : > { %6000 = vmatprep.mubr.bf16.mxu0 %v4618_v19  ;;  %v10505_v19 = vld [vmem:[#allocation60_spill] sm:$0xff] }
 0x90c   : > { %2550 = vadd.xlane.f32.xlu0 %v10488_v54  ;;  %1536 = vadd.xlane.f32.xlu1 %v10489_v56 }
 0x910   : > { %2554 = vadd.xlane.f32.xlu0 %v10490_v31  ;;  %2040 = vadd.xlane.f32.xlu1 %v10491_v22  ;;  %v10506_v31 = vld [vmem:[#allocation88_spill] sm:$0xff] }
 0x914   : > { %3058 = vadd.xlane.f32.xlu0 %v10492_v20  ;;  %2044 = vadd.xlane.f32.xlu1 %v10493_v46 }
 0x915   : > { %v4513_v1 = vpop.xlane.xlu1 %4512 }
 0x916   : > { %v4530_v16 = vsub.f32 %v10447_v21, %v4513_v1  ;;  %v9104_v39 = vpop.f32.mrb[140].mxu0  ;;  %v10501_v21 = vld [vmem:[#allocation58_spill] sm:$0xff] }
 0x917   : > { %10494 = vst [vmem:[#allocation121_spill] sm:$0xff] %v9104_v39  ;;  %v9106_v63 = vpop.f32.mrb[141].mxu0 }
 0x918   : > { %10495 = vst [vmem:[#allocation33_spill] sm:$0xff] %v9106_v63  ;;  %v4560_v24 = vmul.f32 1.442695, %v4530_v16  ;;  %3062 = vadd.xlane.f32.xlu0 %v10496_v4  ;;  %2548 = vadd.xlane.f32.xlu1 %v10497_v18  ;;  %v9110_v2 = vpop.f32.mrb[142].mxu0 }
 0x919   : > { %10498 = vst [vmem:[#allocation118_spill] sm:$0xff] %v9110_v2  ;;  %v1517_v59 = vpop.xlane.xlu1 %1516  ;;  %v9112_v60 = vpop.f32.mrb[143].mxu0  ;;  %v10537_v2 = vld [vmem:[#allocation151_spill] sm:$0xff] }
 0x91a   : > { %10499 = vst [vmem:[#allocation95_spill] sm:$0xff] %v9112_v60  ;;  %6495 = vpow2.f32 %v4560_v24  ;;  %v10509_v24 = vld [vmem:[#allocation21_spill] sm:$0xff] }
 0x91b   : > { %6497 = vrcp.f32 %v1517_v59 }
 0x91c   : > { %3566 = vadd.xlane.f32.xlu0 %v10500_v49  ;;  %2552 = vadd.xlane.f32.xlu1 %v10501_v21  ;;  %v10510_v21 = vld [vmem:[#allocation22_spill] sm:$0xff] }
 0x91d   : > { %v1521_v50 = vpop.xlane.xlu1 %1520 }
 0x91e   : > { %6499 = vrcp.f32 %v1521_v50 }
 0x920   : > { %3570 = vadd.xlane.f32.xlu0 %v10502_v34  ;;  %3056 = vadd.xlane.f32.xlu1 %v10503_v44 }
 0x921   : > { %v1523_v41 = vpop.xlane.xlu1 %1522 }
 0x922   : > { %6501 = vrcp.f32 %v1523_v41  ;;  %v10512_v41 = vld [vmem:[#allocation117_spill] sm:$0xff] }
 0x924   : > { %v9120_v26 = vpop.eup %6495  ;;  %4074 = vadd.xlane.f32.xlu0 %v8889_v12  ;;  %3060 = vadd.xlane.f32.xlu1 %v10504_v3 }
 0x925   : > { %v6498_v58 = vpop.eup %6497  ;;  %v1519_v10 = vpop.xlane.xlu0 %1518  ;;  %v4619_v27 = vpack.c.bf16 %v9118_v9, %v9120_v26 }
 0x926   : > { %v2025_v15 = vpop.xlane.xlu1 %2024  ;;  %6503 = vrcp.f32 %v1519_v10  ;;  %v9127_v54 = vmul.f32 %v6498_v58, %v10505_v19  ;;  %v10513_v58 = vld [vmem:[#allocation75_spill] sm:$0xff] }
 0x927   : > { %6505 = vrcp.f32 %v2025_v15  ;;  %6001 = vmatmul.mubr.bf16.gmra.mrb[156].mxu0 %v4619_v27  ;;  %v10514_v15 = vld [vmem:[#allocation126_spill] sm:$0xff] }
 0x928   : > { %v6500_v56 = vpop.eup %6499  ;;  %4078 = vadd.xlane.f32.xlu0 %v8904_v51  ;;  %3564 = vadd.xlane.f32.xlu1 %v10506_v31 }
 0x929   : > { %v2535_v12 = vpop.xlane.xlu0 %2534  ;;  %v9132_v20 = vmul.f32 %v6500_v56, %v10507_v33  ;;  %v10515_v56 = vld [vmem:[#allocation119_spill] sm:$0xff] }
 0x92a   : > { %v2027_v22 = vpop.xlane.xlu1 %2026  ;;  %6507 = vrcp.f32 %v2535_v12 }
 0x92b   : > { %6509 = vrcp.f32 %v2027_v22  ;;  %v10516_v22 = vld [vmem:[#allocation70_spill] sm:$0xff] }
 0x92c   : > { %v6502_v46 = vpop.eup %6501  ;;  %4582 = vadd.xlane.f32.xlu0 %v9004_v6  ;;  %3568 = vadd.xlane.f32.xlu1 %v10508_v25  ;;  %v10511_v6 = vld [vmem:[#allocation123_spill] sm:$0xff] }
 0x92d   : > { %v2539_v1 = vpop.xlane.xlu0 %2538  ;;  %v9137_v4 = vmul.f32 %v6502_v46, %v10509_v24  ;;  %v10517_v46 = vld [vmem:[#allocation68_spill] sm:$0xff] }
 0x92e   : > { %v2029_v16 = vpop.xlane.xlu1 %2028  ;;  %6511 = vrcp.f32 %v2539_v1 }
 0x92f   : > { %6513 = vrcp.f32 %v2029_v16  ;;  %v10518_v16 = vld [vmem:[#allocation42_spill] sm:$0xff] }
 0x930   : > { %v6504_v51 = vpop.eup %6503  ;;  %4586 = vadd.xlane.f32.xlu0 %v9034_v40  ;;  %4072 = vadd.xlane.f32.xlu1 %v8894_v35 }
 0x931   : > { %v6506_v18 = vpop.eup %6505  ;;  %v3043_v59 = vpop.xlane.xlu0 %3042  ;;  %v9142_v50 = vmul.f32 %v6504_v51, %v10510_v21 }
 0x932   : > { %v2031_v49 = vpop.xlane.xlu1 %2030  ;;  %6515 = vrcp.f32 %v3043_v59  ;;  %v9145_v34 = vmul.f32 %v6506_v18, %v10511_v6  ;;  %v10519_v18 = vld [vmem:[#allocation82_spill] sm:$0xff]  ;;  %v10521_v6 = vld [vmem:[#allocation45_spill] sm:$0xff] }
 0x933   : > { %6517 = vrcp.f32 %v2031_v49  ;;  %v10520_v49 = vld [vmem:[#allocation124_spill] sm:$0xff] }
 0x934   : > { %v6508_v44 = vpop.eup %6507  ;;  %1542 = vadd.xlane.f32.xlu0 %v10512_v41  ;;  %4076 = vadd.xlane.f32.xlu1 %v8900_v57 }
 0x935   : > { %v6510_v3 = vpop.eup %6509  ;;  %v9149_v40 = vpop.xlane.xlu0 %3046  ;;  %v9152_v10 = vmul.f32 %v6508_v44, %v10513_v58  ;;  %v10522_v44 = vld [vmem:[#allocation116_spill] sm:$0xff] }
 0x936   : > { %v2533_v35 = vpop.xlane.xlu1 %2532  ;;  %v9155_v27 = vmul.f32 %v6510_v3, %v10514_v15  ;;  %v10524_v15 = vld [vmem:[#allocation63_spill] sm:$0xff] }
 0x937   : > { %6519 = vrcp.f32 %v2533_v35 }
 0x938   : > { %v6512_v19 = vpop.eup %6511  ;;  %1546 = vadd.xlane.f32.xlu0 %v10515_v56  ;;  %4580 = vadd.xlane.f32.xlu1 %v9002_v53 }
 0x939   : > { %v6514_v31 = vpop.eup %6513  ;;  %v9159_v12 = vpop.xlane.xlu0 %3550  ;;  %v9162_v33 = vmul.f32 %v6512_v19, %v10516_v22  ;;  %v10525_v19 = vld [vmem:[#allocation120_spill] sm:$0xff]  ;;  %v10526_v22 = vld [vmem:[#allocation73_spill] sm:$0xff] }
 0x93a   : > { %v2537_v57 = vpop.xlane.xlu1 %2536  ;;  %v9165_v25 = vmul.f32 %v6514_v31, %v10517_v46 }
 0x93b   : > { %6521 = vrcp.f32 %v2537_v57 }
 0x93c   : > { %v6516_v1 = vpop.eup %6515  ;;  %2050 = vadd.xlane.f32.xlu0 %v10518_v16  ;;  %4584 = vadd.xlane.f32.xlu1 %v9038_v48  ;;  %v10523_v48 = vld [vmem:[#allocation72_spill] sm:$0xff]  ;;  %v10528_v16 = vld [vmem:[#allocation47_spill] sm:$0xff] }
 0x93d   : > { %v6518_v24 = vpop.eup %6517  ;;  %v9169_v51 = vpop.xlane.xlu0 %3554  ;;  %v9172_v59 = vmul.f32 %v6516_v1, %v10519_v18  ;;  %v10527_v1 = vld [vmem:[#allocation125_spill] sm:$0xff] }
 0x93e   : > { %v3041_v53 = vpop.xlane.xlu1 %3040  ;;  %v9175_v21 = vmul.f32 %v6518_v24, %v10520_v49  ;;  %v10529_v49 = vld [vmem:[#allocation81_spill] sm:$0xff] }
 0x93f   : > { %6523 = vrcp.f32 %v3041_v53 }
 0x940   : > { %2054 = vadd.xlane.f32.xlu0 %v10521_v6  ;;  %1540 = vadd.xlane.f32.xlu1 %v10522_v44  ;;  %v10530_v44 = vld [vmem:[#allocation149_spill] sm:$0xff]  ;;  %6525 = vrcp.f32 %v9149_v40 }
 0x941   : > { %v6520_v41 = vpop.eup %6519  ;;  %v9179_v3 = vpop.xlane.xlu0 %4058  ;;  %6527 = vrcp.f32 %v9159_v12 }
 0x942   : > { %v9181_v35 = vpop.xlane.xlu1 %3044  ;;  %v9184_v58 = vmul.f32 %v6520_v41, %v10523_v48  ;;  %v10531_v41 = vld [vmem:[#allocation41_spill] sm:$0xff]  ;;  %6529 = vrcp.f32 %v9169_v51 }
 0x943   : > { %6531 = vrcp.f32 %v9179_v3 }
 0x944   : > { %2558 = vadd.xlane.f32.xlu0 %v10524_v15  ;;  %1544 = vadd.xlane.f32.xlu1 %v10525_v19  ;;  %v10532_v19 = vld [vmem:[#allocation154_spill] sm:$0xff]  ;;  %6533 = vrcp.f32 %v9181_v35 }
 0x945   : > { %v6522_v56 = vpop.eup %6521  ;;  %v9188_v31 = vpop.xlane.xlu0 %4062 }
 0x946   : > { %v9190_v57 = vpop.xlane.xlu1 %3548  ;;  %v9193_v46 = vmul.f32 %v6522_v56, %v10526_v22  ;;  %v10533_v56 = vld [vmem:[#allocation64_spill] sm:$0xff]  ;;  %6535 = vrcp.f32 %v9188_v31 }
 0x947   : > { %6537 = vrcp.f32 %v9190_v57 }
 0x948   : > { %2562 = vadd.xlane.f32.xlu0 %v10527_v1  ;;  %2048 = vadd.xlane.f32.xlu1 %v10528_v16  ;;  %v10534_v16 = vld [vmem:[#allocation165_spill] sm:$0xff] }
 0x949   : > { %v6524_v24 = vpop.eup %6523  ;;  %v9197_v53 = vpop.xlane.xlu0 %4566 }
 0x94a   : > { %v9199_v18 = vpop.xlane.xlu1 %3552  ;;  %v9202_v6 = vmul.f32 %v6524_v24, %v10529_v49  ;;  %v10535_v24 = vld [vmem:[#allocation127_spill] sm:$0xff]  ;;  %v6526_v40 = vpop.eup %6525 }
 0x94b   : > { %v6528_v12 = vpop.eup %6527  ;;  %6539 = vrcp.f32 %v9199_v18 }
 0x94c   : > { %3066 = vadd.xlane.f32.xlu0 %v10530_v44  ;;  %2052 = vadd.xlane.f32.xlu1 %v10531_v41  ;;  %v10536_v41 = vld [vmem:[#allocation170_spill] sm:$0xff]  ;;  %v6530_v51 = vpop.eup %6529 }
 0x94d   : > { %v9206_v48 = vpop.xlane.xlu0 %4570  ;;  %v6532_v35 = vpop.eup %6531 }
 0x94e   : > { %v9208_v15 = vpop.xlane.xlu1 %4056 }
 0x94f   : > { %6541 = vrcp.f32 %v9208_v15 }
 0x950   : > { %3070 = vadd.xlane.f32.xlu0 %v10532_v19  ;;  %2556 = vadd.xlane.f32.xlu1 %v10533_v56  ;;  %v10538_v56 = vld [vmem:[#allocation155_spill] sm:$0xff] }
 0x951   : > { %v9212_v22 = vpop.xlane.xlu0 %1526 }
 0x952   : > { %v9214_v1 = vpop.xlane.xlu1 %4060 }
 0x953   : > { %6543 = vrcp.f32 %v9214_v1 }
 0x954   : > { %3574 = vadd.xlane.f32.xlu0 %v10534_v16  ;;  %2560 = vadd.xlane.f32.xlu1 %v10535_v24  ;;  %v10539_v24 = vld [vmem:[#allocation167_spill] sm:$0xff] }
 0x955   : > { %v9218_v49 = vpop.xlane.xlu0 %1530 }
 0x956   : > { %v9220_v44 = vpop.xlane.xlu1 %4564 }
 0x957   : > { %6545 = vrcp.f32 %v9220_v44  ;;  %v6207_v44 = vld [vmem:[#allocation11 + $0x30] sm:$0xff]  }
 0x958   : > { %3578 = vadd.xlane.f32.xlu0 %v10536_v41  ;;  %3064 = vadd.xlane.f32.xlu1 %v10537_v2  ;;  %v10540_v2 = vld [vmem:[#allocation171_spill] sm:$0xff]  ;;  %6547 = vrcp.f32 %v9197_v53 }
 0x959   : > { %v9224_v39 = vpop.xlane.xlu0 %2034 }
 0x95a   : > { %v9226_v19 = vpop.xlane.xlu1 %4568 }
 0x95b   : > { %6549 = vrcp.f32 %v9226_v19 }
 0x95c   : > { %4082 = vadd.xlane.f32.xlu0 %v8902_v23  ;;  %3068 = vadd.xlane.f32.xlu1 %v10538_v56  ;;  %6551 = vrcp.f32 %v9206_v48 }
 0x95d   : > { %v9230_v60 = vpop.xlane.xlu0 %2038 }
 0x95e   : > { %v9232_v16 = vpop.xlane.xlu1 %1524 }
 0x95f   : > { %6553 = vrcp.f32 %v9232_v16 }
 0x960   : > { %4086 = vadd.xlane.f32.xlu0 %v8927_v32  ;;  %3572 = vadd.xlane.f32.xlu1 %v10539_v24  ;;  %6555 = vrcp.f32 %v9212_v22 }
 0x961   : > { %v9236_v63 = vpop.xlane.xlu0 %2542 }
 0x962   : > { %v9238_v41 = vpop.xlane.xlu1 %1528 }
 0x963   : > { %6557 = vrcp.f32 %v9238_v41 }
 0x964   : > { %4590 = vadd.xlane.f32.xlu0 %v9088_v30  ;;  %3576 = vadd.xlane.f32.xlu1 %v10540_v2  ;;  %6559 = vrcp.f32 %v9218_v49 }
 0x965   : > { %v9242_v29 = vpop.xlane.xlu0 %2546 }
 0x966   : > { %v9244_v23 = vpop.xlane.xlu1 %2032 }
 0x967   : > { %6561 = vrcp.f32 %v9244_v23 }
 0x968   : > { %4594 = vadd.xlane.f32.xlu0 %v9118_v9  ;;  %4080 = vadd.xlane.f32.xlu1 %v8906_v42  ;;  %6563 = vrcp.f32 %v9224_v39 }
 0x969   : > { %v9248_v56 = vpop.xlane.xlu0 %3050 }
 0x96a   : > { %v9250_v32 = vpop.xlane.xlu1 %2036 }
 0x96c   : > { %4084 = vadd.xlane.f32.xlu1 %v8929_v62 }
 0x96d   : > { %v9253_v24 = vpop.xlane.xlu0 %3054 }
 0x96e   : > { %v9255_v45 = vpop.xlane.xlu1 %2540 }
 0x970   : > { %4588 = vadd.xlane.f32.xlu1 %v9090_v47 }
 0x971   : > { %v9258_v30 = vpop.xlane.xlu0 %3558 }
 0x972   : > { %v9260_v2 = vpop.xlane.xlu1 %2544 }
 0x974   : > { %4592 = vadd.xlane.f32.xlu1 %v9120_v26 }
 0x975   : > { %v9263_v9 = vpop.xlane.xlu0 %3562 }
 0x976   : > { %v9265_v42 = vpop.xlane.xlu1 %3048 }
 0x979   : > { %v9267_v7 = vpop.xlane.xlu0 %4066 }
 0x97a   : > { %v9269_v17 = vpop.xlane.xlu1 %3052 }
 0x97d   : > { %v9271_v62 = vpop.xlane.xlu0 %4070 }
 0x97e   : > { %v9273_v13 = vpop.xlane.xlu1 %3556  ;;  %1743 = vrot.lane.b32.xlu0 %v9142_v50, %s6971_s10 }
 0x981   : > { %v9277_v47 = vpop.xlane.xlu0 %4574 }
 0x982   : > { %v9279_v38 = vpop.xlane.xlu1 %3560  ;;  %2251 = vrot.lane.b32.xlu0 %v9155_v27, %s6970_s12 }
 0x985   : > { %v9283_v26 = vpop.xlane.xlu0 %4578  ;;  %1741 = vrot.lane.b32.xlu1 %v9127_v54, %s6971_s10 }
 0x986   : > { %v9285_v5 = vpop.xlane.xlu1 %4064  ;;  %2255 = vrot.lane.b32.xlu0 %v9175_v21, %s6970_s12 }
 0x989   : > { %v9292_v50 = vpop.xlane.xlu0 %1534  ;;  %1745 = vrot.lane.b32.xlu1 %v9132_v20, %s6971_s10 }
 0x98a   : > { %v9294_v52 = vpop.xlane.xlu1 %4068  ;;  %2759 = vrot.lane.b32.xlu0 %v9152_v10, %s6968_s9  ;;  %v10542_v10 = vld [vmem:[#allocation83_spill] sm:$0xff] }
 0x98d   : > { %v9301_v27 = vpop.xlane.xlu0 %1538  ;;  %1747 = vrot.lane.b32.xlu1 %v9137_v4, %s6971_s10  ;;  %v3236_v4 = vmul.f32 %v6526_v40, %v10542_v10 }
 0x98e   : > { %10541 = vst [vmem:[#allocation101_spill] sm:$0xff] %v9301_v27  ;;  %v9303_v54 = vpop.xlane.xlu1 %4572  ;;  %2763 = vrot.lane.b32.xlu0 %v9162_v33, %s6968_s9 }
 0x991   : > { %v9310_v21 = vpop.xlane.xlu0 %2042  ;;  %2249 = vrot.lane.b32.xlu1 %v9145_v34, %s6970_s12  ;;  %v3742_v34 = vmul.f32 %v6528_v12, %v8849_v43  ;;  %v6534_v43 = vpop.eup %6533  ;;  %6565 = vrcp.f32 %v9250_v32  ;;  %v10558_v32 = vld [vmem:[#allocation46_spill] sm:$0xff] }
 0x992   : > { %v9312_v20 = vpop.xlane.xlu1 %4576  ;;  %3267 = vrot.lane.b32.xlu0 %v9172_v59, %s6969_s7  ;;  %v6536_v57 = vpop.eup %6535  ;;  %6567 = vrcp.f32 %v9230_v60 }
 0x993   : > { %v6538_v18 = vpop.eup %6537  ;;  %v4252_v12 = vmul.f32 %v6536_v57, %v9036_v55  ;;  %6569 = vrcp.f32 %v9255_v45 }
 0x994   : > { %v6540_v15 = vpop.eup %6539  ;;  %6571 = vrcp.f32 %v9236_v63  ;;  %v10563_v63 = vld [vmem:[#allocation129_spill] sm:$0xff] }
 0x995   : > { %v9320_v27 = vpop.xlane.xlu0 %2046  ;;  %2253 = vrot.lane.b32.xlu1 %v9165_v25, %s6970_s12  ;;  %v3744_v25 = vmul.f32 %v6530_v51, %v8844_v61  ;;  %v10543_v61 = vld [vmem:[#allocation77_spill] sm:$0xff]  ;;  %v3743_v55 = vmul.f32 %v6540_v15, %v8839_v11 }
 0x996   : > { %v9322_v33 = vpop.xlane.xlu1 %1532  ;;  %3271 = vrot.lane.b32.xlu0 %v3236_v4, %s6969_s7 }
 0x999   : > { %v9330_v59 = vpop.xlane.xlu0 %2550  ;;  %2757 = vrot.lane.b32.xlu1 %v9184_v58, %s6968_s9  ;;  %v4250_v58 = vmul.f32 %v6532_v35, %v9040_v37  ;;  %v6542_v35 = vpop.eup %6541  ;;  %6573 = vrcp.f32 %v9260_v2  ;;  %v10566_v2 = vld [vmem:[#allocation131_spill] sm:$0xff] }
 0x99a   : > { %v9332_v3 = vpop.xlane.xlu1 %1536  ;;  %3775 = vrot.lane.b32.xlu0 %v3742_v34, %s6967_s30  ;;  %v4249_v1 = vmul.f32 %v6542_v35, %v9032_v14  ;;  %v6544_v57 = vpop.eup %6543  ;;  %6575 = vrcp.f32 %v9242_v29 }
 0x99b   : > { %v6546_v19 = vpop.eup %6545  ;;  %6577 = vrcp.f32 %v9265_v42  ;;  %v10569_v42 = vld [vmem:[#allocation74_spill] sm:$0xff] }
 0x99d   : > { %v9339_v40 = vpop.xlane.xlu0 %2554  ;;  %2761 = vrot.lane.b32.xlu1 %v9193_v46, %s6968_s9  ;;  %v3235_v46 = vmul.f32 %v6534_v43, %v10543_v61 }
 0x99e   : > { %v9341_v31 = vpop.xlane.xlu1 %2040  ;;  %3779 = vrot.lane.b32.xlu0 %v3744_v25, %s6967_s30 }
 0x9a1   : > { %v9348_v10 = vpop.xlane.xlu0 %3058  ;;  %3265 = vrot.lane.b32.xlu1 %v9202_v6, %s6969_s7  ;;  %v3741_v6 = vmul.f32 %v6538_v18, %v8841_v8  ;;  %v4251_v18 = vmul.f32 %v6544_v57, %v9030_v0 }
 0x9a2   : > { %v9350_v4 = vpop.xlane.xlu1 %2044  ;;  %4283 = vrot.lane.b32.xlu0 %v4250_v58, %s6965_s26 }
 0x9a5   : > { %v9358_v34 = vpop.xlane.xlu0 %3062  ;;  %3269 = vrot.lane.b32.xlu1 %v3235_v46, %s6969_s7  ;;  %v6201_v46 = vld [vmem:[#allocation11] sm:$0xff]  }
 0x9a6   : > { %v9360_v37 = vpop.xlane.xlu1 %2548  ;;  %4287 = vrot.lane.b32.xlu0 %v4252_v12, %s6965_s26  ;;  %6004 = vmatprep.subr.bf16.mxu1 %v6201_v46 }
 0x9a7   : > { %6005 = vmatpush3.bf16.msra.mxu1 %v6201_v46  ;;  %v6205_v46 = vld [vmem:[#allocation11 + $0x20] sm:$0xff]  }
 0x9a9   : > { %v9366_v51 = vpop.xlane.xlu0 %3566  ;;  %3773 = vrot.lane.b32.xlu1 %v3741_v6, %s6967_s30  ;;  %v6202_v6 = vld [vmem:[#allocation11 + $0x8] sm:$0xff]  }
 0x9aa   : > { %v9368_v25 = vpop.xlane.xlu1 %2552  ;;  %6006 = vmatprep.subr.bf16.mxu1 %v6202_v6 }
 0x9ab   : > { %6007 = vmatpush3.bf16.msra.mxu1 %v6202_v6 }
 0x9ad   : > { %v9372_v43 = vpop.xlane.xlu0 %3570  ;;  %3777 = vrot.lane.b32.xlu1 %v3743_v55, %s6967_s30  ;;  %v6203_v55 = vld [vmem:[#allocation11 + $0x10] sm:$0xff]  }
 0x9ae   : > { %v9374_v58 = vpop.xlane.xlu1 %3056  ;;  %6008 = vmatprep.subr.bf16.mxu1 %v6203_v55 }
 0x9af   : > { %6009 = vmatpush3.bf16.msra.mxu1 %v6203_v55 }
 0x9b1   : > { %v9378_v8 = vpop.xlane.xlu0 %4074  ;;  %4281 = vrot.lane.b32.xlu1 %v4249_v1, %s6965_s26  ;;  %v6204_v1 = vld [vmem:[#allocation11 + $0x18] sm:$0xff]  }
 0x9b2   : > { %v9380_v61 = vpop.xlane.xlu1 %3060  ;;  %6010 = vmatprep.subr.bf16.mxu1 %v6204_v1 }
 0x9b3   : > { %6011 = vmatpush3.bf16.msra.mxu1 %v6204_v1 }
 0x9b4   : > { %6012 = vmatprep.subr.bf16.mxu1 %v6205_v46 }
 0x9b5   : > { %v9384_v11 = vpop.xlane.xlu0 %4078  ;;  %4285 = vrot.lane.b32.xlu1 %v4251_v18, %s6965_s26 }
 0x9b6   : > { %v9386_v12 = vpop.xlane.xlu1 %3564 }
 0x9b7   : > { %6013 = vmatpush3.bf16.msra.mxu1 %v6205_v46 }
 0x9b9   : > { %v9389_v14 = vpop.xlane.xlu0 %4582 }
 0x9ba   : > { %10544 = vst [vmem:[#allocation97_spill] sm:$0xff] %v9389_v14  ;;  %v9391_v15 = vpop.xlane.xlu1 %3568 }
 0x9bd   : > { %v9393_v35 = vpop.xlane.xlu0 %4586 }
 0x9be   : > { %10545 = vst [vmem:[#allocation99_spill] sm:$0xff] %v9393_v35  ;;  %v9395_v0 = vpop.xlane.xlu1 %4072  ;;  %v6206_v35 = vld [vmem:[#allocation11 + $0x28] sm:$0xff]  }
 0x9bf   : > { %6014 = vmatprep.subr.bf16.mxu1 %v6206_v35 }
 0x9c0   : > { %6015 = vmatpush3.bf16.msra.mxu1 %v6206_v35  ;;  %v6548_v35 = vpop.eup %6547  ;;  %6579 = vrcp.f32 %v9248_v56 }
 0x9c1   : > { %v9397_v57 = vpop.xlane.xlu0 %1542  ;;  %6016 = vmatprep.subr.bf16.mxu1 %v6207_v44 }
 0x9c2   : > { %10546 = vst [vmem:[#allocation32_spill] sm:$0xff] %v9397_v57  ;;  %v9399_v18 = vpop.xlane.xlu1 %4076 }
 0x9c4   : > { %6017 = vmatpush3.bf16.msra.mxu1 %v6207_v44  ;;  %v6550_v44 = vpop.eup %6549  ;;  %6581 = vrcp.f32 %v9269_v17  ;;  %v10571_v17 = vld [vmem:[#allocation76_spill] sm:$0xff] }
 0x9c5   : > { %v9402_v14 = vpop.xlane.xlu0 %1546  ;;  %v6552_v41 = vpop.eup %6551  ;;  %6583 = vrcp.f32 %v9253_v24 }
 0x9c6   : > { %10547 = vst [vmem:[#allocation57_spill] sm:$0xff] %v9402_v14  ;;  %v9404_v6 = vpop.xlane.xlu1 %4580 }
 0x9c7   : > { %10548 = vst [vmem:[#allocation34_spill] sm:$0xff] %v9404_v6 }
 0x9c9   : > { %v9409_v55 = vpop.xlane.xlu0 %2050 }
 0x9ca   : > { %10549 = vst [vmem:[#allocation35_spill] sm:$0xff] %v9409_v55  ;;  %v9411_v1 = vpop.xlane.xlu1 %4584  ;;  %v6208_v55 = vld [vmem:[#allocation11 + $0x38] sm:$0xff]  }
 0x9cb   : > { %10550 = vst [vmem:[#allocation122_spill] sm:$0xff] %v9411_v1  ;;  %6018 = vmatprep.subr.bf16.mxu1 %v6208_v55 }
 0x9cc   : > { %v5990_v14 = vpop.f32.mrb[144].mxu0  ;;  %6019 = vmatpush3.bf16.msra.mxu1 %v6208_v55 }
 0x9cd   : > { %v9415_v46 = vpop.xlane.xlu0 %2054  ;;  %v4694_v48 = vpop.f32.mrb[145].mxu0 }
 0x9ce   : > { %10551 = vst [vmem:[#allocation56_spill] sm:$0xff] %v9415_v46  ;;  %v9417_v53 = vpop.xlane.xlu1 %1540  ;;  %v4757_v57 = vmul.f32 %v6546_v19, %v4694_v48  ;;  %v5991_v1 = vpop.f32.mrb[146].mxu0 }
 0x9cf   : > { %10552 = vst [vmem:[#allocation106_spill] sm:$0xff] %v9417_v53  ;;  %v4697_v16 = vpop.f32.mrb[147].mxu0  ;;  %v4759_v53 = vmul.f32 %v6550_v44, %v5990_v14  ;;  %v6554_v19 = vpop.eup %6553  ;;  %v4760_v48 = vmul.f32 %v6552_v41, %v5991_v1  ;;  %6585 = vrcp.f32 %v9273_v13  ;;  %v10573_v13 = vld [vmem:[#allocation85_spill] sm:$0xff] }
 0x9d0   : > { %v4758_v22 = vmul.f32 %v6548_v35, %v4697_v16  ;;  %4789 = vrot.lane.b32.xlu1 %v4757_v57, %s6966_s28  ;;  %v6556_v55 = vpop.eup %6555  ;;  %v10555_v16 = vld [vmem:[#allocation44_spill] sm:$0xff]  ;;  %6587 = vrcp.f32 %v9258_v30 }
 0x9d1   : > { %v9422_v6 = vpop.xlane.xlu0 %2558  ;;  %v1713_v39 = vmul.f32 %v6554_v19, %v10555_v16  ;;  %v1714_v41 = vmul.f32 %v6556_v55, %v10558_v32 }
 0x9d2   : > { %10553 = vst [vmem:[#allocation104_spill] sm:$0xff] %v9422_v6  ;;  %v9424_v46 = vpop.xlane.xlu1 %1544  ;;  %4791 = vrot.lane.b32.xlu0 %v4758_v22, %s6966_s28  ;;  %v6558_v22 = vpop.eup %6557  ;;  %v10562_v6 = vld [vmem:[#allocation49_spill] sm:$0xff]  ;;  %6589 = vrcp.f32 %v9279_v38  ;;  %v10575_v38 = vld [vmem:[#allocation80_spill] sm:$0xff] }
 0x9d4   : > { %v9429_v49 = vpop.f32.mrb[148].mxu0  ;;  %4793 = vrot.lane.b32.xlu1 %v4759_v53, %s6966_s28 }
 0x9d5   : > { %v9432_v57 = vpop.xlane.xlu0 %2562  ;;  %v9437_v23 = vpop.f32.mrb[149].mxu0 }
 0x9d6   : > { %10554 = vst [vmem:[#allocation38_spill] sm:$0xff] %v9432_v57  ;;  %v9434_v35 = vpop.xlane.xlu1 %2048  ;;  %4795 = vrot.lane.b32.xlu0 %v4760_v48, %s6966_s28  ;;  %v9440_v14 = vpop.f32.mrb[150].mxu0  ;;  %v10559_v48 = vld [vmem:[#allocation23_spill] sm:$0xff] }
 0x9d7   : > { %v9444_v1 = vpop.f32.mrb[151].mxu0  ;;  %v6560_v57 = vpop.eup %6559  ;;  %v1715_v19 = vmul.f32 %v6558_v22, %v10559_v48  ;;  %6591 = vrcp.f32 %v9263_v9 }
 0x9d8   : > { %1749 = vrot.lane.b32.xlu1 %v1713_v39, %s6971_s10  ;;  %v6562_v16 = vpop.eup %6561  ;;  %v1716_v55 = vmul.f32 %v6560_v57, %v10562_v6  ;;  %6593 = vrcp.f32 %v9285_v5 }
 0x9d9   : > { %v9447_v53 = vpop.xlane.xlu0 %3066  ;;  %v6564_v32 = vpop.eup %6563  ;;  %6595 = vrcp.f32 %v9267_v7 }
 0x9da   : > { %10556 = vst [vmem:[#allocation36_spill] sm:$0xff] %v9447_v53  ;;  %v9449_v44 = vpop.xlane.xlu1 %2052  ;;  %1751 = vrot.lane.b32.xlu0 %v1714_v41, %s6971_s10  ;;  %v2221_v41 = vmul.f32 %v6562_v16, %v10563_v63  ;;  %v6566_v48 = vpop.eup %6565  ;;  %v2222_v57 = vmul.f32 %v6564_v32, %v10566_v2  ;;  %6597 = vrcp.f32 %v9294_v52 }
 0x9db   : > { %10557 = vst [vmem:[#allocation25_spill] sm:$0xff] %v9449_v44 }
 0x9dc   : > { %v9456_v60 = vpop.f32.mrb[152].mxu0  ;;  %1753 = vrot.lane.b32.xlu1 %v1715_v19, %s6971_s10 }
 0x9dd   : > { %v9459_v39 = vpop.xlane.xlu0 %3070  ;;  %v9465_v45 = vpop.f32.mrb[153].mxu0 }
 0x9de   : > { %10560 = vst [vmem:[#allocation108_spill] sm:$0xff] %v9459_v39  ;;  %v9461_v53 = vpop.xlane.xlu1 %2556  ;;  %1755 = vrot.lane.b32.xlu0 %v1716_v55, %s6971_s10  ;;  %v9468_v22 = vpop.f32.mrb[154].mxu0  ;;  %v10567_v55 = vld [vmem:[#allocation128_spill] sm:$0xff] }
 0x9df   : > { %10561 = vst [vmem:[#allocation39_spill] sm:$0xff] %v9461_v53  ;;  %v9472_v19 = vpop.f32.mrb[155].mxu0  ;;  %v6568_v53 = vpop.eup %6567  ;;  %v2223_v16 = vmul.f32 %v6566_v48, %v10567_v55  ;;  %6599 = vrcp.f32 %v9271_v62 }
 0x9e0   : > { %2257 = vrot.lane.b32.xlu1 %v2221_v41, %s6970_s12  ;;  %v6570_v63 = vpop.eup %6569  ;;  %6601 = vrcp.f32 %v9303_v54 }
 0x9e1   : > { %v9475_v39 = vpop.xlane.xlu0 %3574  ;;  %v6572_v44 = vpop.eup %6571  ;;  %v2729_v32 = vmul.f32 %v6570_v63, %v10569_v42  ;;  %v10572_v63 = vld [vmem:[#allocation138_spill] sm:$0xff]  ;;  %6603 = vrcp.f32 %v9277_v47 }
 0x9e2   : > { %10564 = vst [vmem:[#allocation37_spill] sm:$0xff] %v9475_v39  ;;  %v9477_v6 = vpop.xlane.xlu1 %2560  ;;  %2259 = vrot.lane.b32.xlu0 %v2222_v57, %s6970_s12  ;;  %v10568_v39 = vld [vmem:[#allocation130_spill] sm:$0xff]  ;;  %v6574_v2 = vpop.eup %6573  ;;  %v10570_v57 = vld [vmem:[#allocation139_spill] sm:$0xff]  ;;  %6605 = vrcp.f32 %v9312_v20 }
 0x9e3   : > { %10565 = vst [vmem:[#allocation27_spill] sm:$0xff] %v9477_v6  ;;  %v2224_v6 = vmul.f32 %v6568_v53, %v10568_v39  ;;  %v2730_v55 = vmul.f32 %v6572_v44, %v10570_v57  ;;  %v2731_v53 = vmul.f32 %v6574_v2, %v10571_v17 }
 0x9e4   : > { %2261 = vrot.lane.b32.xlu1 %v2223_v16, %s6970_s12  ;;  %v6576_v16 = vpop.eup %6575  ;;  %6607 = vrcp.f32 %v9283_v26 }
 0x9e5   : > { %v9485_v29 = vpop.xlane.xlu0 %3578  ;;  %v6578_v39 = vpop.eup %6577  ;;  %v2732_v42 = vmul.f32 %v6576_v16, %v10572_v63  ;;  %6609 = vrcp.f32 %v9322_v33 }
 0x9e6   : > { %v9487_v41 = vpop.xlane.xlu1 %3064  ;;  %2263 = vrot.lane.b32.xlu0 %v2224_v6, %s6970_s12  ;;  %v3237_v44 = vmul.f32 %v6578_v39, %v10573_v13 }
 0x9e8   : > { %2765 = vrot.lane.b32.xlu1 %v2729_v32, %s6968_s9  ;;  %v6580_v32 = vpop.eup %6579  ;;  %6611 = vrcp.f32 %v9292_v50 }
 0x9e9   : > { %v9495_v56 = vpop.xlane.xlu0 %4082  ;;  %v6582_v57 = vpop.eup %6581  ;;  %6613 = vrcp.f32 %v9332_v3 }
 0x9ea   : > { %v9497_v48 = vpop.xlane.xlu1 %3068  ;;  %2767 = vrot.lane.b32.xlu0 %v2730_v55, %s6968_s9  ;;  %v10574_v55 = vld [vmem:[#allocation86_spill] sm:$0xff]  ;;  %v3239_v16 = vmul.f32 %v6582_v57, %v10575_v38 }
 0x9eb   : > { %v3238_v17 = vmul.f32 %v6580_v32, %v10574_v55 }
 0x9ec   : > { %2769 = vrot.lane.b32.xlu1 %v2731_v53, %s6968_s9  ;;  %v6584_v53 = vpop.eup %6583 }
 0x9ed   : > { %v9505_v24 = vpop.xlane.xlu0 %4086  ;;  %v6586_v63 = vpop.eup %6585 }
 0x9ee   : > { %v9507_v6 = vpop.xlane.xlu1 %3572  ;;  %2771 = vrot.lane.b32.xlu0 %v2732_v42, %s6968_s9  ;;  %v10576_v42 = vld [vmem:[#allocation29_spill] sm:$0xff]  ;;  %v3745_v5 = vmul.f32 %v6586_v63, %v8855_v28  ;;  %v10577_v28 = vld [vmem:[#allocation87_spill] sm:$0xff] }
 0x9ef   : > { %v3240_v13 = vmul.f32 %v6584_v53, %v10576_v42  ;;  %v10578_v42 = vld [vmem:[#allocation92_spill] sm:$0xff] }
 0x9f0   : > { %3273 = vrot.lane.b32.xlu1 %v3237_v44, %s6969_s7  ;;  %v6588_v44 = vpop.eup %6587 }
 0x9f1   : > { %v9515_v30 = vpop.xlane.xlu0 %4590  ;;  %v6590_v32 = vpop.eup %6589  ;;  %v3746_v55 = vmul.f32 %v6588_v44, %v8861_v36 }
 0x9f2   : > { %v9517_v2 = vpop.xlane.xlu1 %3576  ;;  %3275 = vrot.lane.b32.xlu0 %v3238_v17, %s6969_s7  ;;  %v6592_v17 = vpop.eup %6591  ;;  %v3747_v38 = vmul.f32 %v6590_v32, %v10577_v28  ;;  %v10579_v32 = vld [vmem:[#allocation107_spill] sm:$0xff] }
 0x9f3   : > { %v6594_v62 = vpop.eup %6593  ;;  %v10580_v28 = vld [vmem:[#allocation111_spill] sm:$0xff] }
 0x9f4   : > { %3277 = vrot.lane.b32.xlu1 %v3239_v16, %s6969_s7  ;;  %v6596_v44 = vpop.eup %6595  ;;  %v4253_v54 = vmul.f32 %v6594_v62, %v10579_v32  ;;  %v10582_v62 = vld [vmem:[#allocation103_spill] sm:$0xff] }
 0x9f5   : > { %v9525_v9 = vpop.xlane.xlu0 %4594  ;;  %v4254_v47 = vmul.f32 %v6596_v44, %v10580_v28 }
 0x9f6   : > { %v9527_v39 = vpop.xlane.xlu1 %4080  ;;  %3279 = vrot.lane.b32.xlu0 %v3240_v13, %s6969_s7  ;;  %v3748_v13 = vmul.f32 %v6592_v17, %v10578_v42 }
 0x9f8   : > { %3781 = vrot.lane.b32.xlu1 %v3745_v5, %s6967_s30 }
 0x9f9   : > { %v1744_v57 = vpop.permute.xlu0 %1743 }
 0x9fa   : > { %v9535_v7 = vpop.xlane.xlu1 %4084  ;;  %1791 = vst.msk [vmem:[#allocation4 + $0x8] sm:$0xff] %vm1789_vm1, %v1744_v57  ;;  %v9539_v53 = vpop.f32.mrb[156].mxu0  ;;  %3783 = vrot.lane.b32.xlu0 %v3746_v55, %s6967_s30 }
 0x9fb   : > { %v9542_v52 = vpop.f32.mrb[157].mxu0  ;;  %v6598_v57 = vpop.eup %6597 }
 0x9fc   : > { %v9546_v16 = vpop.f32.mrb[158].mxu0  ;;  %3785 = vrot.lane.b32.xlu1 %v3747_v38, %s6967_s30  ;;  %v6600_v38 = vpop.eup %6599 }
 0x9fd   : > { %v2252_v63 = vpop.permute.xlu0 %2251  ;;  %v9554_v5 = vpop.f32.mrb[159].mxu0 }
 0x9fe   : > { %v9549_v36 = vpop.xlane.xlu1 %4588  ;;  %2299 = vst.msk [vmem:[#allocation4 + $0x8] sm:$0xff] %vm2297_vm2, %v2252_v63  ;;  %3787 = vrot.lane.b32.xlu0 %v3748_v13, %s6967_s30  ;;  %v10581_v63 = vld [vmem:[#allocation109_spill] sm:$0xff]  ;;  %v4256_v13 = vmul.f32 %v6600_v38, %v10582_v62  ;;  %v6602_v32 = vpop.eup %6601 }
 0x9ff   : > { %v4255_v42 = vmul.f32 %v6598_v57, %v10581_v63  ;;  %v4761_v33 = vmul.f32 %v6602_v32, %v9437_v23  ;;  %v6604_v44 = vpop.eup %6603 }
 0xa00   : > { %4289 = vrot.lane.b32.xlu1 %v4253_v54, %s6965_s26  ;;  %v10583_v54 = vld [vmem:[#allocation101_spill] sm:$0xff]  ;;  %v4762_v50 = vmul.f32 %v6604_v44, %v9444_v1 }
 0xa01   : > { %v2256_v17 = vpop.permute.xlu0 %2255  ;;  %6615 = vrcp.f32 %v10583_v54  ;;  %v10587_v54 = vld [vmem:[#allocation24_spill] sm:$0xff] }
 0xa02   : > { %v9561_v55 = vpop.xlane.xlu1 %4592  ;;  %4291 = vrot.lane.b32.xlu0 %v4254_v47, %s6965_s26  ;;  %v6606_v47 = vpop.eup %6605  ;;  %6617 = vrcp.f32 %v9341_v31  ;;  %v10584_v31 = vld [vmem:[#allocation48_spill] sm:$0xff] }
 0xa03   : > { %v6608_v3 = vpop.eup %6607  ;;  %v4763_v38 = vmul.f32 %v6606_v47, %v9429_v49  ;;  %6619 = vrcp.f32 %v9310_v21 }
 0xa04   : > { %4293 = vrot.lane.b32.xlu1 %v4255_v42, %s6965_s26  ;;  %v6610_v23 = vpop.eup %6609  ;;  %v4764_v1 = vmul.f32 %v6608_v3, %v9440_v14  ;;  %6621 = vrcp.f32 %v9350_v4  ;;  %v10585_v4 = vld [vmem:[#allocation50_spill] sm:$0xff] }
 0xa05   : > { %v2760_v20 = vpop.permute.xlu0 %2759  ;;  %v1717_v49 = vmul.f32 %v6610_v23, %v10584_v31  ;;  %6623 = vrcp.f32 %v9320_v27  ;;  %v10591_v31 = vld [vmem:[#allocation133_spill] sm:$0xff] }
 0xa06   : > { %v1742_v26 = vpop.permute.xlu1 %1741  ;;  %2807 = vst.msk [vmem:[#allocation4 + $0x8] sm:$0xff] %vm2805_vm3, %v2760_v20  ;;  %4295 = vrot.lane.b32.xlu0 %v4256_v13, %s6965_s26  ;;  %6625 = vrcp.f32 %v9360_v37  ;;  %v10588_v37 = vld [vmem:[#allocation132_spill] sm:$0xff] }
 0xa07   : > { %1790 = vst.msk [vmem:[#allocation4] sm:$0xff] %vm1789_vm1, %v1742_v26  ;;  %v6612_v26 = vpop.eup %6611  ;;  %6627 = vrcp.f32 %v9330_v59 }
 0xa08   : > { %4797 = vrot.lane.b32.xlu1 %v4761_v33, %s6966_s28  ;;  %v6614_v21 = vpop.eup %6613  ;;  %v1718_v62 = vmul.f32 %v6612_v26, %v10585_v4  ;;  %6629 = vrcp.f32 %v9368_v25  ;;  %v10590_v25 = vld [vmem:[#allocation66_spill] sm:$0xff] }
 0xa09   : > { %v2764_v28 = vpop.permute.xlu0 %2763  ;;  %6631 = vrcp.f32 %v9339_v40 }
 0xa0a   : > { %v1746_v57 = vpop.permute.xlu1 %1745  ;;  %4799 = vrot.lane.b32.xlu0 %v4762_v50, %s6966_s28  ;;  %6633 = vrcp.f32 %v9374_v58  ;;  %v10592_v58 = vld [vmem:[#allocation142_spill] sm:$0xff] }
 0xa0b   : > { %1792 = vst.msk [vmem:[#allocation4 + $0x10] sm:$0xff] %vm1789_vm1, %v1746_v57  ;;  %v6616_v13 = vpop.eup %6615  ;;  %6635 = vrcp.f32 %v9348_v10 }
 0xa0c   : > { %4801 = vrot.lane.b32.xlu1 %v4763_v38, %s6966_s28  ;;  %v6618_v27 = vpop.eup %6617  ;;  %v1720_v50 = vmul.f32 %v6616_v13, %v10587_v54  ;;  %v10589_v38 = vld [vmem:[#allocation71_spill] sm:$0xff]  ;;  %6637 = vrcp.f32 %v9380_v61  ;;  %v10594_v61 = vld [vmem:[#allocation141_spill] sm:$0xff] }
 0xa0d   : > { %v3268_v42 = vpop.permute.xlu0 %3267  ;;  %v6620_v57 = vpop.eup %6619  ;;  %6639 = vrcp.f32 %v9358_v34 }
 0xa0e   : > { %v1748_v63 = vpop.permute.xlu1 %1747  ;;  %3315 = vst.msk [vmem:[#allocation4 + $0x8] sm:$0xff] %vm3313_vm4, %v3268_v42  ;;  %4803 = vrot.lane.b32.xlu0 %v4764_v1, %s6966_s28  ;;  %v6622_v47 = vpop.eup %6621  ;;  %v2226_v23 = vmul.f32 %v6620_v57, %v10589_v38  ;;  %6641 = vrcp.f32 %v9386_v12  ;;  %v10596_v12 = vld [vmem:[#allocation159_spill] sm:$0xff]  ;;  %v10599_v38 = vld [vmem:[#allocation84_spill] sm:$0xff] }
 0xa0f   : > { %1793 = vst.msk [vmem:[#allocation4 + $0x18] sm:$0xff] %vm1789_vm1, %v1748_v63  ;;  %v6624_v1 = vpop.eup %6623  ;;  %v2227_v63 = vmul.f32 %v6622_v47, %v10590_v25  ;;  %6643 = vrcp.f32 %v9366_v51 }
 0xa10   : > { %2301 = vst.msk [vmem:[#allocation4 + $0x18] sm:$0xff] %vm2297_vm2, %v2256_v17  ;;  %1757 = vrot.lane.b32.xlu1 %v1717_v49, %s6971_s10  ;;  %v10586_v17 = vld [vmem:[#allocation51_spill] sm:$0xff]  ;;  %v6626_v42 = vpop.eup %6625  ;;  %v2228_v49 = vmul.f32 %v6624_v1, %v10591_v31  ;;  %6645 = vrcp.f32 %v9391_v15  ;;  %v10598_v15 = vld [vmem:[#allocation158_spill] sm:$0xff] }
 0xa11   : > { %2809 = vst.msk [vmem:[#allocation4 + $0x18] sm:$0xff] %vm2805_vm3, %v2764_v28  ;;  %v3272_v20 = vpop.permute.xlu0 %3271  ;;  %v1719_v32 = vmul.f32 %v6614_v21, %v10586_v17  ;;  %v2225_v28 = vmul.f32 %v6618_v27, %v10588_v37  ;;  %v6628_v21 = vpop.eup %6627  ;;  %6647 = vrcp.f32 %v9372_v43  ;;  %v10597_v37 = vld [vmem:[#allocation160_spill] sm:$0xff] }
 0xa12   : > { %v2250_v14 = vpop.permute.xlu1 %2249  ;;  %3317 = vst.msk [vmem:[#allocation4 + $0x18] sm:$0xff] %vm3313_vm4, %v3272_v20  ;;  %1759 = vrot.lane.b32.xlu0 %v1718_v62, %s6971_s10  ;;  %v6630_v20 = vpop.eup %6629  ;;  %v10593_v62 = vld [vmem:[#allocation144_spill] sm:$0xff]  ;;  %6649 = vrcp.f32 %v9395_v0  ;;  %v10600_v0 = vld [vmem:[#allocation93_spill] sm:$0xff] }
 0xa13   : > { %2298 = vst.msk [vmem:[#allocation4] sm:$0xff] %vm2297_vm2, %v2250_v14  ;;  %v2733_v14 = vmul.f32 %v6626_v42, %v10592_v58  ;;  %v2734_v13 = vmul.f32 %v6628_v21, %v10593_v62  ;;  %v6632_v17 = vpop.eup %6631  ;;  %6651 = vrcp.f32 %v9378_v8  ;;  %v10601_v42 = vld [vmem:[#allocation98_spill] sm:$0xff] }
 0xa14   : > { %1761 = vrot.lane.b32.xlu1 %v1719_v32, %s6971_s10  ;;  %v2735_v32 = vmul.f32 %v6630_v20, %v10594_v61  ;;  %v6634_v27 = vpop.eup %6633  ;;  %6653 = vrcp.f32 %v9399_v18  ;;  %v10602_v18 = vld [vmem:[#allocation94_spill] sm:$0xff]  ;;  %v10608_v61 = vld [vmem:[#allocation99_spill] sm:$0xff] }
 0xa15   : > { %v3776_v44 = vpop.permute.xlu0 %3775  ;;  %v6636_v54 = vpop.eup %6635  ;;  %6655 = vrcp.f32 %v9384_v11  ;;  %v10603_v21 = vld [vmem:[#allocation34_spill] sm:$0xff] }
 0xa16   : > { %v2254_v33 = vpop.permute.xlu1 %2253  ;;  %3823 = vst.msk [vmem:[#allocation4 + $0x8] sm:$0xff] %vm3821_vm5, %v3776_v44  ;;  %1763 = vrot.lane.b32.xlu0 %v1720_v50, %s6971_s10  ;;  %v3241_v50 = vmul.f32 %v6634_v27, %v10596_v12  ;;  %v6638_v57 = vpop.eup %6637  ;;  %6657 = vrcp.f32 %v10603_v21  ;;  %v10612_v12 = vld [vmem:[#allocation32_spill] sm:$0xff] }
 0xa17   : > { %2300 = vst.msk [vmem:[#allocation4 + $0x10] sm:$0xff] %vm2297_vm2, %v2254_v33  ;;  %v10595_v33 = vld [vmem:[#allocation143_spill] sm:$0xff]  ;;  %v6640_v47 = vpop.eup %6639 }
 0xa18   : > { %2265 = vrot.lane.b32.xlu1 %v2225_v28, %s6970_s12  ;;  %v2736_v44 = vmul.f32 %v6632_v17, %v10595_v33  ;;  %v3242_v28 = vmul.f32 %v6636_v54, %v10597_v37  ;;  %v10607_v17 = vld [vmem:[#allocation122_spill] sm:$0xff] }
 0xa19   : > { %v3780_v3 = vpop.permute.xlu0 %3779  ;;  %v10610_v33 = vld [vmem:[#allocation106_spill] sm:$0xff] }
 0xa1a   : > { %v2758_v59 = vpop.permute.xlu1 %2757  ;;  %3825 = vst.msk [vmem:[#allocation4 + $0x18] sm:$0xff] %vm3821_vm5, %v3780_v3  ;;  %2267 = vrot.lane.b32.xlu0 %v2226_v23, %s6970_s12  ;;  %v6642_v3 = vpop.eup %6641  ;;  %v3244_v23 = vmul.f32 %v6640_v47, %v10599_v38  ;;  %v10614_v47 = vld [vmem:[#allocation57_spill] sm:$0xff] }
 0xa1b   : > { %2806 = vst.msk [vmem:[#allocation4] sm:$0xff] %vm2805_vm3, %v2758_v59  ;;  %v3243_v59 = vmul.f32 %v6638_v57, %v10598_v15  ;;  %v6644_v1 = vpop.eup %6643  ;;  %v3749_v25 = vmul.f32 %v6642_v3, %v10600_v0  ;;  %v10616_v0 = vld [vmem:[#allocation25_spill] sm:$0xff] }
 0xa1c   : > { %2269 = vrot.lane.b32.xlu1 %v2227_v63, %s6970_s12  ;;  %v6646_v63 = vpop.eup %6645 }
 0xa1d   : > { %v4284_v26 = vpop.permute.xlu0 %4283  ;;  %v3751_v31 = vmul.f32 %v6646_v63, %v10602_v18  ;;  %v10620_v18 = vld [vmem:[#allocation39_spill] sm:$0xff] }
 0xa1e   : > { %v2762_v40 = vpop.permute.xlu1 %2761  ;;  %4331 = vst.msk [vmem:[#allocation4 + $0x8] sm:$0xff] %vm4329_vm6, %v4284_v26  ;;  %2271 = vrot.lane.b32.xlu0 %v2228_v49, %s6970_s12  ;;  %v6648_v26 = vpop.eup %6647 }
 0xa1f   : > { %2808 = vst.msk [vmem:[#allocation4 + $0x10] sm:$0xff] %vm2805_vm3, %v2762_v40  ;;  %v3750_v40 = vmul.f32 %v6644_v1, %v10601_v42  ;;  %v6650_v49 = vpop.eup %6649 }
 0xa20   : > { %2773 = vrot.lane.b32.xlu1 %v2733_v14, %s6968_s9  ;;  %v10604_v14 = vld [vmem:[#allocation91_spill] sm:$0xff]  ;;  %v6652_v20 = vpop.eup %6651 }
 0xa21   : > { %v4288_v4 = vpop.permute.xlu0 %4287  ;;  %v3752_v11 = vmul.f32 %v6648_v26, %v10604_v14  ;;  %v10622_v14 = vld [vmem:[#allocation104_spill] sm:$0xff] }
 0xa22   : > { %v3266_v10 = vpop.permute.xlu1 %3265  ;;  %4333 = vst.msk [vmem:[#allocation4 + $0x18] sm:$0xff] %vm4329_vm6, %v4288_v4  ;;  %2775 = vrot.lane.b32.xlu0 %v2734_v13, %s6968_s9  ;;  %v10606_v4 = vld [vmem:[#allocation113_spill] sm:$0xff]  ;;  %v6654_v13 = vpop.eup %6653 }
 0xa23   : > { %3314 = vst.msk [vmem:[#allocation4] sm:$0xff] %vm3313_vm4, %v3266_v10  ;;  %v10605_v10 = vld [vmem:[#allocation97_spill] sm:$0xff]  ;;  %v4257_v62 = vmul.f32 %v6650_v49, %v10606_v4 }
 0xa24   : > { %2777 = vrot.lane.b32.xlu1 %v2735_v32, %s6968_s9  ;;  %6659 = vrcp.f32 %v10605_v10  ;;  %v10609_v32 = vld [vmem:[#allocation26_spill] sm:$0xff]  ;;  %v10621_v49 = vld [vmem:[#allocation53_spill] sm:$0xff] }
 0xa25   : > { %6661 = vrcp.f32 %v10607_v17  ;;  %v4258_v27 = vmul.f32 %v6652_v20, %v10609_v32  ;;  %v10623_v20 = vld [vmem:[#allocation67_spill] sm:$0xff] }
 0xa26   : > { %v3270_v34 = vpop.permute.xlu1 %3269  ;;  %2779 = vrot.lane.b32.xlu0 %v2736_v44, %s6968_s9  ;;  %6663 = vrcp.f32 %v10608_v61  ;;  %v10611_v44 = vld [vmem:[#allocation115_spill] sm:$0xff] }
 0xa27   : > { %3316 = vst.msk [vmem:[#allocation4 + $0x10] sm:$0xff] %vm3313_vm4, %v3270_v34  ;;  %v6656_v34 = vpop.eup %6655  ;;  %6665 = vrcp.f32 %v10610_v33  ;;  %v4259_v54 = vmul.f32 %v6654_v13, %v10611_v44  ;;  %v10624_v17 = vld [vmem:[#allocation27_spill] sm:$0xff]  ;;  %v10626_v44 = vld [vmem:[#allocation38_spill] sm:$0xff] }
 0xa28   : > { %3281 = vrot.lane.b32.xlu1 %v3241_v50, %s6969_s7  ;;  %6667 = vrcp.f32 %v10612_v12  ;;  %v10613_v50 = vld [vmem:[#allocation31_spill] sm:$0xff]  ;;  %v10627_v12 = vld [vmem:[#allocation137_spill] sm:$0xff] }
 0xa29   : > { %v4260_v57 = vmul.f32 %v6656_v34, %v10613_v50  ;;  %6669 = vrcp.f32 %v9424_v46 }
 0xa2a   : > { %v3774_v51 = vpop.permute.xlu1 %3773  ;;  %3283 = vrot.lane.b32.xlu0 %v3242_v28, %s6969_s7  ;;  %6671 = vrcp.f32 %v10614_v47 }
 0xa2b   : > { %3822 = vst.msk [vmem:[#allocation4] sm:$0xff] %vm3821_vm5, %v3774_v51  ;;  %v6658_v51 = vpop.eup %6657  ;;  %6673 = vrcp.f32 %v9434_v35 }
 0xa2c   : > { %3285 = vrot.lane.b32.xlu1 %v3243_v59, %s6969_s7  ;;  %v4765_v37 = vmul.f32 %v6658_v51, %v9465_v45  ;;  %v10615_v45 = vld [vmem:[#allocation35_spill] sm:$0xff] }
 0xa2d   : > { %6675 = vrcp.f32 %v10615_v45 }
 0xa2e   : > { %v3778_v43 = vpop.permute.xlu1 %3777  ;;  %3287 = vrot.lane.b32.xlu0 %v3244_v23, %s6969_s7  ;;  %v6660_v28 = vpop.eup %6659  ;;  %6677 = vrcp.f32 %v10616_v0 }
 0xa2f   : > { %3824 = vst.msk [vmem:[#allocation4 + $0x10] sm:$0xff] %vm3821_vm5, %v3778_v43  ;;  %v4766_v15 = vmul.f32 %v6660_v28, %v9472_v19  ;;  %v6662_v59 = vpop.eup %6661 }
 0xa30   : > { %3789 = vrot.lane.b32.xlu1 %v3749_v25, %s6967_s30  ;;  %v6664_v3 = vpop.eup %6663  ;;  %v4767_v43 = vmul.f32 %v6662_v59, %v9456_v60  ;;  %v10617_v60 = vld [vmem:[#allocation62_spill] sm:$0xff] }
 0xa31   : > { %v6666_v46 = vpop.eup %6665  ;;  %v4768_v23 = vmul.f32 %v6664_v3, %v9468_v22  ;;  %v10619_v22 = vld [vmem:[#allocation69_spill] sm:$0xff] }
 0xa32   : > { %v4282_v8 = vpop.permute.xlu1 %4281  ;;  %3791 = vrot.lane.b32.xlu0 %v3750_v40, %s6967_s30  ;;  %v6668_v1 = vpop.eup %6667  ;;  %v1721_v25 = vmul.f32 %v6666_v46, %v10617_v60  ;;  %v10630_v46 = vld [vmem:[#allocation136_spill] sm:$0xff] }
 0xa33   : > { %4330 = vst.msk [vmem:[#allocation4] sm:$0xff] %vm4329_vm6, %v4282_v8  ;;  %v6670_v63 = vpop.eup %6669  ;;  %v10618_v8 = vld [vmem:[#allocation56_spill] sm:$0xff]  ;;  %v1722_v40 = vmul.f32 %v6668_v1, %v10619_v22 }
 0xa34   : > { %3793 = vrot.lane.b32.xlu1 %v3751_v31, %s6967_s30  ;;  %6679 = vrcp.f32 %v10618_v8  ;;  %v6672_v26 = vpop.eup %6671  ;;  %v1723_v21 = vmul.f32 %v6670_v63, %v10621_v49 }
 0xa35   : > { %6681 = vrcp.f32 %v10620_v18  ;;  %v1724_v10 = vmul.f32 %v6672_v26, %v10623_v20  ;;  %v10635_v26 = vld [vmem:[#allocation37_spill] sm:$0xff] }
 0xa36   : > { %v4286_v58 = vpop.permute.xlu1 %4285  ;;  %3795 = vrot.lane.b32.xlu0 %v3752_v11, %s6967_s30  ;;  %6683 = vrcp.f32 %v10622_v14 }
 0xa37   : > { %4332 = vst.msk [vmem:[#allocation4 + $0x10] sm:$0xff] %vm4329_vm6, %v4286_v58  ;;  %v6674_v58 = vpop.eup %6673  ;;  %6685 = vrcp.f32 %v10624_v17 }
 0xa38   : > { %4297 = vrot.lane.b32.xlu1 %v4257_v62, %s6965_s26  ;;  %v6676_v13 = vpop.eup %6675  ;;  %6687 = vrcp.f32 %v10626_v44 }
 0xa39   : > { %v6678_v33 = vpop.eup %6677  ;;  %v2230_v50 = vmul.f32 %v6676_v13, %v10627_v12  ;;  %6689 = vrcp.f32 %v9487_v41  ;;  %v10639_v13 = vld [vmem:[#allocation90_spill] sm:$0xff]  ;;  %v10642_v12 = vld [vmem:[#allocation105_spill] sm:$0xff] }
 0xa3a   : > { %4299 = vrot.lane.b32.xlu0 %v4258_v27, %s6965_s26  ;;  %v10625_v27 = vld [vmem:[#allocation135_spill] sm:$0xff] }
 0xa3b   : > { %v2229_v34 = vmul.f32 %v6674_v58, %v10625_v27  ;;  %v10637_v58 = vld [vmem:[#allocation89_spill] sm:$0xff] }
 0xa3c   : > { %4301 = vrot.lane.b32.xlu1 %v4259_v54, %s6965_s26 }
 0xa3e   : > { %4303 = vrot.lane.b32.xlu0 %v4260_v57, %s6965_s26 }
 0xa40   : > { %4805 = vrot.lane.b32.xlu1 %v4765_v37, %s6966_s28  ;;  %v6680_v37 = vpop.eup %6679 }
 0xa41   : > { %v6682_v3 = vpop.eup %6681  ;;  %v2232_v45 = vmul.f32 %v6680_v37, %v10630_v46  ;;  %v10646_v46 = vld [vmem:[#allocation95_spill] sm:$0xff] }
 0xa42   : > { %v4790_v38 = vpop.permute.xlu1 %4789  ;;  %4807 = vrot.lane.b32.xlu0 %v4766_v15, %s6966_s28  ;;  %v10628_v15 = vld [vmem:[#allocation134_spill] sm:$0xff]  ;;  %v6684_v41 = vpop.eup %6683 }
 0xa43   : > { %4838 = vst.msk [vmem:[#allocation4] sm:$0xff] %vm4837_vm7, %v4790_v38  ;;  %v2231_v59 = vmul.f32 %v6678_v33, %v10628_v15  ;;  %v6686_v0 = vpop.eup %6685  ;;  %v10641_v33 = vld [vmem:[#allocation100_spill] sm:$0xff] }
 0xa44   : > { %v4792_v19 = vpop.permute.xlu0 %4791  ;;  %4809 = vrot.lane.b32.xlu1 %v4767_v43, %s6966_s28  ;;  %v10629_v43 = vld [vmem:[#allocation36_spill] sm:$0xff]  ;;  %v6688_v8 = vpop.eup %6687 }
 0xa45   : > { %4839 = vst.msk [vmem:[#allocation4 + $0x8] sm:$0xff] %vm4837_vm7, %v4792_v19  ;;  %6691 = vrcp.f32 %v10629_v43  ;;  %v10631_v19 = vld [vmem:[#allocation78_spill] sm:$0xff] }
 0xa46   : > { %v4794_v35 = vpop.permute.xlu1 %4793  ;;  %4811 = vrot.lane.b32.xlu0 %v4768_v23, %s6966_s28  ;;  %6693 = vrcp.f32 %v9497_v48  ;;  %v2737_v1 = vmul.f32 %v6682_v3, %v10631_v19  ;;  %v10645_v3 = vld [vmem:[#allocation33_spill] sm:$0xff] }
 0xa47   : > { %4840 = vst.msk [vmem:[#allocation4 + $0x10] sm:$0xff] %vm4837_vm7, %v4794_v35  ;;  %v10632_v35 = vld [vmem:[#allocation108_spill] sm:$0xff] }
 0xa48   : > { %v4796_v42 = vpop.permute.xlu0 %4795  ;;  %1765 = vrot.lane.b32.xlu1 %v1721_v25, %s6971_s10  ;;  %6695 = vrcp.f32 %v10632_v35  ;;  %v10633_v25 = vld [vmem:[#allocation153_spill] sm:$0xff] }
 0xa49   : > { %4841 = vst.msk [vmem:[#allocation4 + $0x18] sm:$0xff] %vm4837_vm7, %v4796_v42  ;;  %v2738_v63 = vmul.f32 %v6684_v41, %v10633_v25  ;;  %6697 = vrcp.f32 %v9507_v6  ;;  %v10634_v42 = vld [vmem:[#allocation79_spill] sm:$0xff] }
 0xa4a   : > { %v1750_v31 = vpop.permute.xlu1 %1749  ;;  %1767 = vrot.lane.b32.xlu0 %v1722_v40, %s6971_s10  ;;  %v4854_v4 = vld [vmem:[#allocation4] sm:$0xff]  ;;  %v2739_v22 = vmul.f32 %v6686_v0, %v10634_v42  ;;  %v6690_v40 = vpop.eup %6689  ;;  %6699 = vrcp.f32 %v10635_v26 }
 0xa4b   : > { %1794 = vst.msk [vmem:[#allocation4 + $0x20] sm:$0xff] %vm1789_vm1, %v1750_v31  ;;  %v10636_v31 = vld [vmem:[#allocation152_spill] sm:$0xff]  ;;  %6701 = vrcp.f32 %v9517_v2  ;;  %v3245_v14 = vmul.f32 %v6690_v40, %v10637_v58 }
 0xa4c   : > { %v1752_v11 = vpop.permute.xlu0 %1751  ;;  %1769 = vrot.lane.b32.xlu1 %v1723_v21, %s6971_s10  ;;  %v4855_v62 = vld [vmem:[#allocation4 + $0x8] sm:$0xff]  ;;  %v2740_v49 = vmul.f32 %v6688_v8, %v10636_v31  ;;  %6703 = vrcp.f32 %v9485_v29 }
 0xa4d   : > { %1795 = vst.msk [vmem:[#allocation4 + $0x28] sm:$0xff] %vm1789_vm1, %v1752_v11  ;;  %v4870_v61 = vpack.c.bf16 %v4855_v62, %v4854_v4  ;;  %6705 = vrcp.f32 %v9527_v39 }
 0xa4e   : > { %v1754_v32 = vpop.permute.xlu1 %1753  ;;  %1771 = vrot.lane.b32.xlu0 %v1724_v10, %s6971_s10  ;;  %v4856_v57 = vld [vmem:[#allocation4 + $0x10] sm:$0xff]  ;;  %v10638_v10 = vld [vmem:[#allocation169_spill] sm:$0xff]  ;;  %6707 = vrcp.f32 %v9495_v56 }
 0xa4f   : > { %1796 = vst.msk [vmem:[#allocation4 + $0x30] sm:$0xff] %vm1789_vm1, %v1754_v32  ;;  %6020 = vmatprep.mubr.bf16.mxu1 %v4870_v61  ;;  %v6692_v21 = vpop.eup %6691  ;;  %v10640_v32 = vld [vmem:[#allocation168_spill] sm:$0xff]  ;;  %6709 = vrcp.f32 %v9535_v7 }
 0xa50   : > { %v1756_v54 = vpop.permute.xlu0 %1755  ;;  %2273 = vrot.lane.b32.xlu1 %v2229_v34, %s6970_s12  ;;  %v4857_v51 = vld [vmem:[#allocation4 + $0x18] sm:$0xff]  ;;  %v6694_v11 = vpop.eup %6693  ;;  %v3246_v4 = vmul.f32 %v6692_v21, %v10638_v10  ;;  %6711 = vrcp.f32 %v9505_v24 }
 0xa51   : > { %1797 = vst.msk [vmem:[#allocation4 + $0x38] sm:$0xff] %vm1789_vm1, %v1756_v54  ;;  %v4871_v28 = vpack.c.bf16 %v4857_v51, %v4856_v57  ;;  %v3247_v17 = vmul.f32 %v6694_v11, %v10639_v13  ;;  %6713 = vrcp.f32 %v9549_v36  ;;  %v10643_v51 = vld [vmem:[#allocation102_spill] sm:$0xff] }
 0xa52   : > { %v2258_v47 = vpop.permute.xlu1 %2257  ;;  %2275 = vrot.lane.b32.xlu0 %v2230_v50, %s6970_s12  ;;  %v6696_v62 = vpop.eup %6695  ;;  %6715 = vrcp.f32 %v9515_v30 }
 0xa53   : > { %2302 = vst.msk [vmem:[#allocation4 + $0x20] sm:$0xff] %vm2297_vm2, %v2258_v47  ;;  %6021 = vmatmul.mubr.bf16.vlgmr.msra.gmra.mrb[144].mxu1 %v4871_v28  ;;  %v6698_v61 = vpop.eup %6697  ;;  %v3248_v27 = vmul.f32 %v6696_v62, %v10640_v32  ;;  %v10644_v47 = vld [vmem:[#allocation96_spill] sm:$0xff]  ;;  %6717 = vrcp.f32 %v9561_v55 }
 0xa54   : > { %v2260_v38 = vpop.permute.xlu0 %2259  ;;  %2277 = vrot.lane.b32.xlu1 %v2231_v59, %s6970_s12  ;;  %v6700_v34 = vpop.eup %6699  ;;  %v3753_v44 = vmul.f32 %v6698_v61, %v10641_v33  ;;  %6719 = vrcp.f32 %v9525_v9  ;;  %v10648_v9 = vld [vmem:[#allocation118_spill] sm:$0xff] }
 0xa55   : > { %2303 = vst.msk [vmem:[#allocation4 + $0x28] sm:$0xff] %vm2297_vm2, %v2260_v38  ;;  %v6702_v54 = vpop.eup %6701  ;;  %v3754_v50 = vmul.f32 %v6700_v34, %v10642_v12 }
 0xa56   : > { %v2262_v23 = vpop.permute.xlu1 %2261  ;;  %2279 = vrot.lane.b32.xlu0 %v2232_v45, %s6970_s12  ;;  %v6704_v57 = vpop.eup %6703  ;;  %v3755_v37 = vmul.f32 %v6702_v54, %v10643_v51 }
 0xa57   : > { %2304 = vst.msk [vmem:[#allocation4 + $0x30] sm:$0xff] %vm2297_vm2, %v2262_v23  ;;  %v6706_v28 = vpop.eup %6705  ;;  %v3756_v15 = vmul.f32 %v6704_v57, %v10644_v47  ;;  %v10647_v23 = vld [vmem:[#allocation121_spill] sm:$0xff] }
 0xa58   : > { %v2264_v60 = vpop.permute.xlu0 %2263  ;;  %2781 = vrot.lane.b32.xlu1 %v2737_v1, %s6968_s9  ;;  %v6708_v59 = vpop.eup %6707  ;;  %v4261_v43 = vmul.f32 %v6706_v28, %v10645_v3 }
 0xa59   : > { %2305 = vst.msk [vmem:[#allocation4 + $0x38] sm:$0xff] %vm2297_vm2, %v2264_v60  ;;  %v6710_v38 = vpop.eup %6709  ;;  %v4262_v45 = vmul.f32 %v6708_v59, %v10646_v46 }
 0xa5a   : > { %v2766_v48 = vpop.permute.xlu1 %2765  ;;  %2783 = vrot.lane.b32.xlu0 %v2738_v63, %s6968_s9  ;;  %v6712_v41 = vpop.eup %6711  ;;  %v4263_v19 = vmul.f32 %v6710_v38, %v10647_v23 }
 0xa5b   : > { %2810 = vst.msk [vmem:[#allocation4 + $0x20] sm:$0xff] %vm2805_vm3, %v2766_v48  ;;  %v6714_v1 = vpop.eup %6713  ;;  %v4264_v35 = vmul.f32 %v6712_v41, %v10648_v9 }
 0xa5c   : > { %v2768_v18 = vpop.permute.xlu0 %2767  ;;  %2785 = vrot.lane.b32.xlu1 %v2739_v22, %s6968_s9  ;;  %v6716_v60 = vpop.eup %6715  ;;  %v4769_v63 = vmul.f32 %v6714_v1, %v9542_v52 }
 0xa5d   : > { %2811 = vst.msk [vmem:[#allocation4 + $0x28] sm:$0xff] %vm2805_vm3, %v2768_v18  ;;  %v6718_v8 = vpop.eup %6717  ;;  %v4770_v48 = vmul.f32 %v6716_v60, %v9554_v5 }
 0xa5e   : > { %v2770_v6 = vpop.permute.xlu1 %2769  ;;  %2787 = vrot.lane.b32.xlu0 %v2740_v49, %s6968_s9  ;;  %v6720_v22 = vpop.eup %6719  ;;  %v4771_v26 = vmul.f32 %v6718_v8, %v9539_v53 }
 0xa5f   : > { %2812 = vst.msk [vmem:[#allocation4 + $0x30] sm:$0xff] %vm2805_vm3, %v2770_v6  ;;  %v4772_v52 = vmul.f32 %v6720_v22, %v9546_v16 }
 0xa60   : > { %v2772_v20 = vpop.permute.xlu0 %2771  ;;  %3289 = vrot.lane.b32.xlu1 %v3245_v14, %s6969_s7 }
 0xa61   : > { %2813 = vst.msk [vmem:[#allocation4 + $0x38] sm:$0xff] %vm2805_vm3, %v2772_v20 }
 0xa62   : > { %v3274_v2 = vpop.permute.xlu1 %3273  ;;  %3291 = vrot.lane.b32.xlu0 %v3246_v4, %s6969_s7 }
 0xa63   : > { %3318 = vst.msk [vmem:[#allocation4 + $0x20] sm:$0xff] %vm3313_vm4, %v3274_v2 }
 0xa64   : > { %v3276_v29 = vpop.permute.xlu0 %3275  ;;  %3293 = vrot.lane.b32.xlu1 %v3247_v17, %s6969_s7 }
 0xa65   : > { %3319 = vst.msk [vmem:[#allocation4 + $0x28] sm:$0xff] %vm3313_vm4, %v3276_v29 }
 0xa66   : > { %v3278_v39 = vpop.permute.xlu1 %3277  ;;  %3295 = vrot.lane.b32.xlu0 %v3248_v27, %s6969_s7 }
 0xa67   : > { %3320 = vst.msk [vmem:[#allocation4 + $0x30] sm:$0xff] %vm3313_vm4, %v3278_v39 }
 0xa68   : > { %v3280_v56 = vpop.permute.xlu0 %3279  ;;  %3797 = vrot.lane.b32.xlu1 %v3753_v44, %s6967_s30 }
 0xa69   : > { %3321 = vst.msk [vmem:[#allocation4 + $0x38] sm:$0xff] %vm3313_vm4, %v3280_v56 }
 0xa6a   : > { %v3782_v7 = vpop.permute.xlu1 %3781  ;;  %3799 = vrot.lane.b32.xlu0 %v3754_v50, %s6967_s30 }
 0xa6b   : > { %3826 = vst.msk [vmem:[#allocation4 + $0x20] sm:$0xff] %vm3821_vm5, %v3782_v7 }
 0xa6c   : > { %v3784_v24 = vpop.permute.xlu0 %3783  ;;  %3801 = vrot.lane.b32.xlu1 %v3755_v37, %s6967_s30 }
 0xa6d   : > { %3827 = vst.msk [vmem:[#allocation4 + $0x28] sm:$0xff] %vm3821_vm5, %v3784_v24 }
 0xa6e   : > { %v3786_v36 = vpop.permute.xlu1 %3785  ;;  %3803 = vrot.lane.b32.xlu0 %v3756_v15, %s6967_s30 }
 0xa6f   : > { %3828 = vst.msk [vmem:[#allocation4 + $0x30] sm:$0xff] %vm3821_vm5, %v3786_v36 }
 0xa70   : > { %v3788_v30 = vpop.permute.xlu0 %3787  ;;  %4305 = vrot.lane.b32.xlu1 %v4261_v43, %s6965_s26 }
 0xa71   : > { %3829 = vst.msk [vmem:[#allocation4 + $0x38] sm:$0xff] %vm3821_vm5, %v3788_v30 }
 0xa72   : > { %v4290_v55 = vpop.permute.xlu1 %4289  ;;  %4307 = vrot.lane.b32.xlu0 %v4262_v45, %s6965_s26 }
 0xa73   : > { %4334 = vst.msk [vmem:[#allocation4 + $0x20] sm:$0xff] %vm4329_vm6, %v4290_v55 }
 0xa74   : > { %v4292_v0 = vpop.permute.xlu0 %4291  ;;  %4309 = vrot.lane.b32.xlu1 %v4263_v19, %s6965_s26 }
 0xa75   : > { %4335 = vst.msk [vmem:[#allocation4 + $0x28] sm:$0xff] %vm4329_vm6, %v4292_v0 }
 0xa76   : > { %v4294_v25 = vpop.permute.xlu1 %4293  ;;  %4311 = vrot.lane.b32.xlu0 %v4264_v35, %s6965_s26  ;;  %s6867_s26 = sshll.u32 %s6972_s16, 4  ;;  %s6868_s26 = int_to_ptr.vmem [resolvable:$false] %s6867_s26 }
 0xa77   : > { %4336 = vst.msk [vmem:[#allocation4 + $0x30] sm:$0xff] %vm4329_vm6, %v4294_v25  ;;  %p6870_p3 = scmp.lt.s32.totalorder %s9878_s27, %s6868_s26 }
 0xa78   : > { %v4296_v42 = vpop.permute.xlu0 %4295  ;;  %4813 = vrot.lane.b32.xlu1 %v4769_v63, %s6966_s28 }
 0xa79   : > { %4337 = vst.msk [vmem:[#allocation4 + $0x38] sm:$0xff] %vm4329_vm6, %v4296_v42 }
 0xa7a   : > { %v4798_v40 = vpop.permute.xlu1 %4797  ;;  %4815 = vrot.lane.b32.xlu0 %v4770_v48, %s6966_s28 }
 0xa7b   : > { %4842 = vst.msk [vmem:[#allocation4 + $0x20] sm:$0xff] %vm4837_vm7, %v4798_v40 }
 0xa7c   : > { %v4800_v18 = vpop.permute.xlu0 %4799  ;;  %4817 = vrot.lane.b32.xlu1 %v4771_v26, %s6966_s28 }
 0xa7d   : > { %4843 = vst.msk [vmem:[#allocation4 + $0x28] sm:$0xff] %vm4837_vm7, %v4800_v18 }
 0xa7e   : > { %v4802_v5 = vpop.permute.xlu1 %4801  ;;  %4819 = vrot.lane.b32.xlu0 %v4772_v52, %s6966_s28  ;;  %s6869_s28 = scalar_lea.vmem %s6868_s26, 4096 }
 0xa7f   : > { %4844 = vst.msk [vmem:[#allocation4 + $0x30] sm:$0xff] %vm4837_vm7, %v4802_v5  ;;  %p6871_p7 = scmp.lt.s32.totalorder %s6869_s28, %s6863_s15 }
 0xa80   : > { %v4804_v31 = vpop.permute.xlu0 %4803 }
 0xa81   : > { %4845 = vst.msk [vmem:[#allocation4 + $0x38] sm:$0xff] %vm4837_vm7, %v4804_v31  ;;  %p6872_p9 = por %p6871_p7, %p6870_p3 }
 0xa82   : > { %v1758_v49 = vpop.permute.xlu1 %1757  ;;  %v4858_v21 = vld [vmem:[#allocation4 + $0x20] sm:$0xff] }
 0xa83   : > { %1798 = vst.msk [vmem:[#allocation4 + $0x40] sm:$0xff] %vm1789_vm1, %v1758_v49  ;;  %p6873_p0 = pnand %p6872_p9, %p6866_p10 }
 0xa84   : > { %v1760_v53 = vpop.permute.xlu0 %1759  ;;  %v4859_v6 = vld [vmem:[#allocation4 + $0x28] sm:$0xff] }
 0xa85   : > { %1799 = vst.msk [vmem:[#allocation4 + $0x48] sm:$0xff] %vm1789_vm1, %v1760_v53  ;;  %v4872_v16 = vpack.c.bf16 %v4859_v6, %v4858_v21 }
 0xa86   : > { %v1762_v58 = vpop.permute.xlu1 %1761  ;;  %v4860_v11 = vld [vmem:[#allocation4 + $0x30] sm:$0xff] }
 0xa87   : > { %1800 = vst.msk [vmem:[#allocation4 + $0x50] sm:$0xff] %vm1789_vm1, %v1762_v58  ;;  %6024 = vmatprep.mubr.bf16.mxu1 %v4872_v16 }
 0xa88   : > { %v1764_v14 = vpop.permute.xlu0 %1763  ;;  %v4861_v20 = vld [vmem:[#allocation4 + $0x38] sm:$0xff] }
 0xa89   : > { %1801 = vst.msk [vmem:[#allocation4 + $0x58] sm:$0xff] %vm1789_vm1, %v1764_v14  ;;  %v4873_v10 = vpack.c.bf16 %v4861_v20, %v4860_v11 }
 0xa8a   : > { %v2266_v4 = vpop.permute.xlu1 %2265 }
 0xa8b   : > { %2306 = vst.msk [vmem:[#allocation4 + $0x40] sm:$0xff] %vm2297_vm2, %v2266_v4  ;;  %6025 = vmatmul.mubr.bf16.gmra.mrb[148].mxu1 %v4873_v10  ;;  %v5324_v4 = vld [vmem:[#allocation13] ss:$0 sm:$0xff] }
 0xa8c   : > { %v2268_v62 = vpop.permute.xlu0 %2267 }
 0xa8d   : > { %2307 = vst.msk [vmem:[#allocation4 + $0x48] sm:$0xff] %vm2297_vm2, %v2268_v62 }
 0xa8e   : > { %v2270_v2 = vpop.permute.xlu1 %2269 }
 0xa8f   : > { %2308 = vst.msk [vmem:[#allocation4 + $0x50] sm:$0xff] %vm2297_vm2, %v2270_v2 }
 0xa90   : > { %v2272_v13 = vpop.permute.xlu0 %2271 }
 0xa91   : > { %2309 = vst.msk [vmem:[#allocation4 + $0x58] sm:$0xff] %vm2297_vm2, %v2272_v13 }
 0xa92   : > { %v2774_v17 = vpop.permute.xlu1 %2773 }
 0xa93   : > { %2814 = vst.msk [vmem:[#allocation4 + $0x40] sm:$0xff] %vm2805_vm3, %v2774_v17 }
 0xa94   : > { %v2776_v61 = vpop.permute.xlu0 %2775 }
 0xa95   : > { %2815 = vst.msk [vmem:[#allocation4 + $0x48] sm:$0xff] %vm2805_vm3, %v2776_v61 }
 0xa96   : > { %v2778_v29 = vpop.permute.xlu1 %2777 }
 0xa97   : > { %2816 = vst.msk [vmem:[#allocation4 + $0x50] sm:$0xff] %vm2805_vm3, %v2778_v29 }
 0xa98   : > { %v2780_v32 = vpop.permute.xlu0 %2779 }
 0xa99   : > { %2817 = vst.msk [vmem:[#allocation4 + $0x58] sm:$0xff] %vm2805_vm3, %v2780_v32 }
 0xa9a   : > { %v3282_v27 = vpop.permute.xlu1 %3281 }
 0xa9b   : > { %3322 = vst.msk [vmem:[#allocation4 + $0x40] sm:$0xff] %vm3313_vm4, %v3282_v27 }
 0xa9c   : > { %v3284_v34 = vpop.permute.xlu0 %3283 }
 0xa9d   : > { %3323 = vst.msk [vmem:[#allocation4 + $0x48] sm:$0xff] %vm3313_vm4, %v3284_v34 }
 0xa9e   : > { %v3286_v39 = vpop.permute.xlu1 %3285 }
 0xa9f   : > { %3324 = vst.msk [vmem:[#allocation4 + $0x50] sm:$0xff] %vm3313_vm4, %v3286_v39 }
 0xaa0   : > { %v3288_v33 = vpop.permute.xlu0 %3287 }
 0xaa1   : > { %3325 = vst.msk [vmem:[#allocation4 + $0x58] sm:$0xff] %vm3313_vm4, %v3288_v33 }
 0xaa2   : > { %v3790_v44 = vpop.permute.xlu1 %3789 }
 0xaa3   : > { %3830 = vst.msk [vmem:[#allocation4 + $0x40] sm:$0xff] %vm3821_vm5, %v3790_v44 }
 0xaa4   : > { %v3792_v54 = vpop.permute.xlu0 %3791 }
 0xaa5   : > { %3831 = vst.msk [vmem:[#allocation4 + $0x48] sm:$0xff] %vm3821_vm5, %v3792_v54 }
 0xaa6   : > { %v3794_v56 = vpop.permute.xlu1 %3793 }
 0xaa7   : > { %3832 = vst.msk [vmem:[#allocation4 + $0x50] sm:$0xff] %vm3821_vm5, %v3794_v56 }
 0xaa8   : > { %v3796_v12 = vpop.permute.xlu0 %3795 }
 0xaa9   : > { %3833 = vst.msk [vmem:[#allocation4 + $0x58] sm:$0xff] %vm3821_vm5, %v3796_v12 }
 0xaaa   : > { %v4298_v50 = vpop.permute.xlu1 %4297 }
 0xaab   : > { %4338 = vst.msk [vmem:[#allocation4 + $0x40] sm:$0xff] %vm4329_vm6, %v4298_v50 }
 0xaac   : > { %v4300_v57 = vpop.permute.xlu0 %4299 }
 0xaad   : > { %4339 = vst.msk [vmem:[#allocation4 + $0x48] sm:$0xff] %vm4329_vm6, %v4300_v57 }
 0xaae   : > { %v4302_v7 = vpop.permute.xlu1 %4301 }
 0xaaf   : > { %4340 = vst.msk [vmem:[#allocation4 + $0x50] sm:$0xff] %vm4329_vm6, %v4302_v7 }
 0xab0   : > { %v4304_v51 = vpop.permute.xlu0 %4303 }
 0xab1   : > { %4341 = vst.msk [vmem:[#allocation4 + $0x58] sm:$0xff] %vm4329_vm6, %v4304_v51 }
 0xab2   : > { %v4806_v37 = vpop.permute.xlu1 %4805 }
 0xab3   : > { %4846 = vst.msk [vmem:[#allocation4 + $0x40] sm:$0xff] %vm4837_vm7, %v4806_v37 }
 0xab4   : > { %v4808_v28 = vpop.permute.xlu0 %4807 }
 0xab5   : > { %4847 = vst.msk [vmem:[#allocation4 + $0x48] sm:$0xff] %vm4837_vm7, %v4808_v28 }
 0xab6   : > { %v4810_v24 = vpop.permute.xlu1 %4809 }
 0xab7   : > { %4848 = vst.msk [vmem:[#allocation4 + $0x50] sm:$0xff] %vm4837_vm7, %v4810_v24 }
 0xab8   : > { %v4812_v47 = vpop.permute.xlu0 %4811 }
 0xab9   : > { %4849 = vst.msk [vmem:[#allocation4 + $0x58] sm:$0xff] %vm4837_vm7, %v4812_v47 }
 0xaba   : > { %v1766_v15 = vpop.permute.xlu1 %1765  ;;  %v4862_v36 = vld [vmem:[#allocation4 + $0x40] sm:$0xff] }
 0xabb   : > { %1802 = vst.msk [vmem:[#allocation4 + $0x60] sm:$0xff] %vm1789_vm1, %v1766_v15 }
 0xabc   : > { %v1768_v59 = vpop.permute.xlu0 %1767  ;;  %v4863_v3 = vld [vmem:[#allocation4 + $0x48] sm:$0xff] }
 0xabd   : > { %1803 = vst.msk [vmem:[#allocation4 + $0x68] sm:$0xff] %vm1789_vm1, %v1768_v59  ;;  %v4874_v43 = vpack.c.bf16 %v4863_v3, %v4862_v36 }
 0xabe   : > { %v1770_v38 = vpop.permute.xlu1 %1769  ;;  %v4864_v46 = vld [vmem:[#allocation4 + $0x50] sm:$0xff] }
 0xabf   : > { %1804 = vst.msk [vmem:[#allocation4 + $0x70] sm:$0xff] %vm1789_vm1, %v1770_v38  ;;  %6028 = vmatprep.mubr.bf16.mxu1 %v4874_v43 }
 0xac0   : > { %v1772_v30 = vpop.permute.xlu0 %1771  ;;  %v4865_v45 = vld [vmem:[#allocation4 + $0x58] sm:$0xff] }
 0xac1   : > { %1805 = vst.msk [vmem:[#allocation4 + $0x78] sm:$0xff] %vm1789_vm1, %v1772_v30  ;;  %v4875_v41 = vpack.c.bf16 %v4865_v45, %v4864_v46 }
 0xac2   : > { %v2274_v55 = vpop.permute.xlu1 %2273 }
 0xac3   : > { %2310 = vst.msk [vmem:[#allocation4 + $0x60] sm:$0xff] %vm2297_vm2, %v2274_v55  ;;  %6029 = vmatmul.mubr.bf16.gmra.mrb[152].mxu1 %v4875_v41 }
 0xac4   : > { %v2276_v23 = vpop.permute.xlu0 %2275 }
 0xac5   : > { %2311 = vst.msk [vmem:[#allocation4 + $0x68] sm:$0xff] %vm2297_vm2, %v2276_v23 }
 0xac6   : > { %v2278_v19 = vpop.permute.xlu1 %2277 }
 0xac7   : > { %2312 = vst.msk [vmem:[#allocation4 + $0x70] sm:$0xff] %vm2297_vm2, %v2278_v19 }
 0xac8   : > { %v2280_v1 = vpop.permute.xlu0 %2279 }
 0xac9   : > { %2313 = vst.msk [vmem:[#allocation4 + $0x78] sm:$0xff] %vm2297_vm2, %v2280_v1 }
 0xaca   : > { %v2782_v0 = vpop.permute.xlu1 %2781 }
 0xacb   : > { %2818 = vst.msk [vmem:[#allocation4 + $0x60] sm:$0xff] %vm2805_vm3, %v2782_v0 }
 0xacc   : > { %v2784_v9 = vpop.permute.xlu0 %2783 }
 0xacd   : > { %2819 = vst.msk [vmem:[#allocation4 + $0x68] sm:$0xff] %vm2805_vm3, %v2784_v9 }
 0xace   : > { %v2786_v35 = vpop.permute.xlu1 %2785 }
 0xacf   : > { %2820 = vst.msk [vmem:[#allocation4 + $0x70] sm:$0xff] %vm2805_vm3, %v2786_v35 }
 0xad0   : > { %v2788_v60 = vpop.permute.xlu0 %2787 }
 0xad1   : > { %2821 = vst.msk [vmem:[#allocation4 + $0x78] sm:$0xff] %vm2805_vm3, %v2788_v60 }
 0xad2   : > { %v3290_v25 = vpop.permute.xlu1 %3289 }
 0xad3   : > { %3326 = vst.msk [vmem:[#allocation4 + $0x60] sm:$0xff] %vm3313_vm4, %v3290_v25 }
 0xad4   : > { %v3292_v63 = vpop.permute.xlu0 %3291 }
 0xad5   : > { %3327 = vst.msk [vmem:[#allocation4 + $0x68] sm:$0xff] %vm3313_vm4, %v3292_v63 }
 0xad6   : > { %v3294_v8 = vpop.permute.xlu1 %3293 }
 0xad7   : > { %3328 = vst.msk [vmem:[#allocation4 + $0x70] sm:$0xff] %vm3313_vm4, %v3294_v8 }
 0xad8   : > { %v3296_v48 = vpop.permute.xlu0 %3295 }
 0xad9   : > { %3329 = vst.msk [vmem:[#allocation4 + $0x78] sm:$0xff] %vm3313_vm4, %v3296_v48 }
 0xada   : > { %v3798_v42 = vpop.permute.xlu1 %3797 }
 0xadb   : > { %3834 = vst.msk [vmem:[#allocation4 + $0x60] sm:$0xff] %vm3821_vm5, %v3798_v42 }
 0xadc   : > { %v3800_v22 = vpop.permute.xlu0 %3799 }
 0xadd   : > { %3835 = vst.msk [vmem:[#allocation4 + $0x68] sm:$0xff] %vm3821_vm5, %v3800_v22 }
 0xade   : > { %v3802_v40 = vpop.permute.xlu1 %3801 }
 0xadf   : > { %3836 = vst.msk [vmem:[#allocation4 + $0x70] sm:$0xff] %vm3821_vm5, %v3802_v40 }
 0xae0   : > { %v3804_v26 = vpop.permute.xlu0 %3803 }
 0xae1   : > { %3837 = vst.msk [vmem:[#allocation4 + $0x78] sm:$0xff] %vm3821_vm5, %v3804_v26 }
 0xae2   : > { %v4306_v52 = vpop.permute.xlu1 %4305 }
 0xae3   : > { %4342 = vst.msk [vmem:[#allocation4 + $0x60] sm:$0xff] %vm4329_vm6, %v4306_v52 }
 0xae4   : > { %v4308_v18 = vpop.permute.xlu0 %4307 }
 0xae5   : > { %4343 = vst.msk [vmem:[#allocation4 + $0x68] sm:$0xff] %vm4329_vm6, %v4308_v18 }
 0xae6   : > { %v4310_v5 = vpop.permute.xlu1 %4309 }
 0xae7   : > { %4344 = vst.msk [vmem:[#allocation4 + $0x70] sm:$0xff] %vm4329_vm6, %v4310_v5 }
 0xae8   : > { %v4312_v31 = vpop.permute.xlu0 %4311 }
 0xae9   : > { %4345 = vst.msk [vmem:[#allocation4 + $0x78] sm:$0xff] %vm4329_vm6, %v4312_v31 }
 0xaea   : > { %v4814_v49 = vpop.permute.xlu1 %4813 }
 0xaeb   : > { %4850 = vst.msk [vmem:[#allocation4 + $0x60] sm:$0xff] %vm4837_vm7, %v4814_v49 }
 0xaec   : > { %v4816_v53 = vpop.permute.xlu0 %4815 }
 0xaed   : > { %4851 = vst.msk [vmem:[#allocation4 + $0x68] sm:$0xff] %vm4837_vm7, %v4816_v53 }
 0xaee   : > { %v4818_v21 = vpop.permute.xlu1 %4817 }
 0xaef   : > { %4852 = vst.msk [vmem:[#allocation4 + $0x70] sm:$0xff] %vm4837_vm7, %v4818_v21 }
 0xaf0   : > { %v4820_v6 = vpop.permute.xlu0 %4819 }
 0xaf1   : > { %4853 = vst.msk [vmem:[#allocation4 + $0x78] sm:$0xff] %vm4837_vm7, %v4820_v6 }
 0xaf2   : > { %v4866_v16 = vld [vmem:[#allocation4 + $0x60] sm:$0xff] }
 0xaf4   : > { %v4867_v58 = vld [vmem:[#allocation4 + $0x68] sm:$0xff] }
 0xaf5   : > { %v4876_v14 = vpack.c.bf16 %v4867_v58, %v4866_v16 }
 0xaf6   : > { %v4868_v11 = vld [vmem:[#allocation4 + $0x70] sm:$0xff] }
 0xaf7   : > { %6032 = vmatprep.mubr.bf16.mxu1 %v4876_v14 }
 0xaf8   : > { %v4869_v20 = vld [vmem:[#allocation4 + $0x78] sm:$0xff] }
 0xaf9   : > { %v4877_v10 = vpack.c.bf16 %v4869_v20, %v4868_v11 }
 0xafb   : > { %6033 = vmatmul.mubr.bf16.gmra.mrb[156].mxu1 %v4877_v10 }
 0xb26   : > { %v6022_v62 = vpop.f32.mrb[144].mxu1 }
 0xb27   : > { %v4992_v2 = vadd.f32 %v6022_v62, %v5324_v4  ;;  %v4983_v13 = vpop.f32.mrb[145].mxu1 }
 0xb28   : > { %v4984_v17 = vadd.f32 %v5324_v4, %v4983_v13  ;;  %v6023_v61 = vpop.f32.mrb[146].mxu1 }
 0xb29   : > { %5048 = vst [vmem:[%s9856_s25 + $0x10] sm:$0xff] %v4992_v2  ;;  %v4995_v29 = vadd.f32 %v6023_v61, %v5324_v4  ;;  %v4986_v32 = vpop.f32.mrb[147].mxu1 }
 0xb2a   : > { %5046 = vst [vmem:[%s9856_s25] sm:$0xff] %v4984_v17  ;;  %v4987_v27 = vadd.f32 %v5324_v4, %v4986_v32 }
 0xb2b   : > { %5049 = vst [vmem:[%s9856_s25 + $0x18] sm:$0xff] %v4995_v29 }
 0xb2c   : > { %5047 = vst [vmem:[%s9856_s25 + $0x8] sm:$0xff] %v4987_v27 }
 0xb5e   : > { %v6026_v34 = vpop.f32.mrb[148].mxu1 }
 0xb5f   : > { %v5008_v39 = vadd.f32 %v6026_v34, %v5324_v4  ;;  %v4999_v33 = vpop.f32.mrb[149].mxu1 }
 0xb60   : > { %v5000_v44 = vadd.f32 %v5324_v4, %v4999_v33  ;;  %v6027_v54 = vpop.f32.mrb[150].mxu1 }
 0xb61   : > { %5052 = vst [vmem:[%s9856_s25 + $0x30] sm:$0xff] %v5008_v39  ;;  %v5011_v56 = vadd.f32 %v6027_v54, %v5324_v4  ;;  %v5002_v12 = vpop.f32.mrb[151].mxu1 }
 0xb62   : > { %5050 = vst [vmem:[%s9856_s25 + $0x20] sm:$0xff] %v5000_v44  ;;  %v5003_v50 = vadd.f32 %v5324_v4, %v5002_v12 }
 0xb63   : > { %5053 = vst [vmem:[%s9856_s25 + $0x38] sm:$0xff] %v5011_v56 }
 0xb64   : > { %5051 = vst [vmem:[%s9856_s25 + $0x28] sm:$0xff] %v5003_v50 }
 0xb96   : > { %v6030_v57 = vpop.f32.mrb[152].mxu1 }
 0xb97   : > { %v5024_v7 = vadd.f32 %v6030_v57, %v5324_v4  ;;  %v5015_v51 = vpop.f32.mrb[153].mxu1 }
 0xb98   : > { %v5016_v37 = vadd.f32 %v5324_v4, %v5015_v51  ;;  %v6031_v28 = vpop.f32.mrb[154].mxu1 }
 0xb99   : > { %5056 = vst [vmem:[%s9856_s25 + $0x50] sm:$0xff] %v5024_v7  ;;  %v5027_v24 = vadd.f32 %v6031_v28, %v5324_v4  ;;  %v5018_v47 = vpop.f32.mrb[155].mxu1 }
 0xb9a   : > { %5054 = vst [vmem:[%s9856_s25 + $0x40] sm:$0xff] %v5016_v37  ;;  %v5019_v15 = vadd.f32 %v5324_v4, %v5018_v47 }
 0xb9b   : > { %5057 = vst [vmem:[%s9856_s25 + $0x58] sm:$0xff] %v5027_v24 }
 0xb9c   : > { %5055 = vst [vmem:[%s9856_s25 + $0x48] sm:$0xff] %v5019_v15 }
 0xbce   : > { %v6034_v59 = vpop.f32.mrb[156].mxu1 }
 0xbcf   : > { %v5040_v36 = vadd.f32 %v6034_v59, %v5324_v4  ;;  %v5031_v3 = vpop.f32.mrb[157].mxu1 }
 0xbd0   : > { %v5032_v43 = vadd.f32 %v5324_v4, %v5031_v3  ;;  %v6035_v38 = vpop.f32.mrb[158].mxu1 }
 0xbd1   : > { %5060 = vst [vmem:[%s9856_s25 + $0x70] sm:$0xff] %v5040_v36  ;;  %v5043_v30 = vadd.f32 %v6035_v38, %v5324_v4  ;;  %v5034_v46 = vpop.f32.mrb[159].mxu1 }
 0xbd2   : > { %5058 = vst [vmem:[%s9856_s25 + $0x60] sm:$0xff] %v5032_v43  ;;  %v5035_v45 = vadd.f32 %v5324_v4, %v5034_v46 }
 0xbd3   : > { %5061 = vst [vmem:[%s9856_s25 + $0x78] sm:$0xff] %v5043_v30 }
 0xbd4   : > { %5059 = vst [vmem:[%s9856_s25 + $0x68] sm:$0xff] %v5035_v45 }
 0xbd5   : > { %6876 = shalt.err (!%p6873_p0)
}
 0xbd6   : > { %s6877_s30 = scalar_lea.hbm %s9876_s13, 2048  ;;  %s6881_s12 = scalar_lea.hbm %s9935_s5, 4096 }
 0xbd7   : > { %p6878_p4 = scmp.ne.s32.totalorder %s9876_s13, %s6877_s30  ;;  %p6882_p12 = scmp.lt.u32.totalorder %s9876_s13, %s9935_s5 }
 0xbd8   : > { %p6883_p1 = scmp.lt.u32.totalorder %s6881_s12, %s6877_s30  ;;  %p6885_p8 = scmp.lt.u32.totalorder %s6877_s30, %s9876_s13 }
 0xbd9   : > { %p6879_p13 = pnand %p6878_p4, %p7183_p5 }
 0xbda   : > { %p6884_p11 = por %p6883_p1, %p6882_p12 }
 0xbdb   : > { %p6880_p2 = pneg %p6879_p13 }
 0xbdc   : > { %p6886_p6 = por %p6885_p8, %p6884_p11 }
 0xbde   : > { %p6887_p10 = pnand %p6886_p6, %p6880_p2 }
 0xbe0   : > { %6890 = shalt.err (!%p6887_p10)
}
 0xbe1   : > { %s6973_s25 = smov 128   ;;  %s6974_s6 = smov 8  }
 0xbe2   : > { %6054 = dma.vmem_to_hbm [thread:$0]  (%p7183_p5), %s9878_s27, 2048, %s9876_s13, %s5063_s21, %s6973_s25, %s6973_s25, %s6974_s6  }
 0xbe3 PF: > { %s10649_s18 = sld [smem:[#allocation19_spill]]  ;;  %s10650_s29 = sld [smem:[#allocation20_spill]] }
 0xbe4   : > { %p10652_p7 = scmp.ge.s32.totalorder %s6953_s23, 2 }
 0xbe9   : > { %s5093_s15 = sand.u32 1, %s10649_s18   ;;  %p10651_p3 = scmp.ne.s32.totalorder %s10650_s29, 0 }
 0xbea   : > { %s5094_s16 = scalar_lea.sflag [#allocation7], %s5093_s15 }
 0xbeb   : > { %p6074_p9 = pnand %p10652_p7, %p10651_p3 }
 0xbed   : > { %6928 = dma.done.wait (!%p6074_p9), %s5094_s16, 2048  }
 0xbee   : > { %6930 = vsyncadd (!%p6074_p9), %s5094_s16, 4294965248  ;;  %s23_s23 = sadd.s32 1, %s6953_s23   ;;  %s10653_s18 = smov %s6937_s19 }
 0xbef   : > { %p20_p0 = scmp.ge.s32.totalorder %s23_s23, 4   ;;  %s10654_s19 = smov %s6941_s20 }
 0xbf0   : > { %s10655_s20 = smov %s7192_s17  ;;  %s10656_s21 = smov %s6949_s22 }
 0xbf1   : > { %s10657_s22 = smov %s10659_s24  ;;  %22 = sbr.rel (!%p20_p0) target bundleno = 8 (0x8), region = 106 }
 0xbf8   :  { %5099 = vsyncpa [#allocation6], 1 }
 0xbf9   :  { %5101 = vsyncpa [#allocation6 + $0x1], 1 }
 0xbfa   :  { %5102 = vsyncpa [#allocation9], 1 }
 0xbfb   :  { %5103 = vsyncpa [#allocation12], 1 }
 0xbfc   :  { %5104 = vsyncpa [#allocation7], 1 }
 0xbfd   :  { %5106 = vsyncpa [#allocation7 + $0x1], 1 }

</bundles_post_ra>
